<compile_context>
chip_gen: v7x
topology: tpu7x:2x2x1
jax: 0.10.0
libtpu: 0.0.40
codegen_flags: <defaults>
</compile_context>

<pallas_src>
import functools
import math

import jax
import jax.numpy as jnp
from jax.experimental import pallas as pl
from jax.experimental.pallas import tpu as pltpu

# ----------------------------- model config ---------------------------------
D_MODEL = 32
NHEAD = 4
HEAD_DIM = D_MODEL // NHEAD
FFN = 64
NUM_LAYERS = 2
MAX_LEN = 32
LN_EPS = 1e-5
MASK_NEG = -1e30   # finite "minus infinity" (avoids NaN for fully-masked rows)

# vecs slab row indices (per layer, each row padded to max(8*D, FFN) lanes)
_ROW_BQKV, _ROW_B1, _ROW_BO, _ROW_B2 = 0, 1, 2, 3
_ROW_LN1G, _ROW_LN1B, _ROW_LN2G, _ROW_LN2B = 4, 5, 6, 7


# ----------------------------- fused Pallas kernel ---------------------------
def _rope_encoder_kernel(x_ref, mask_ref, trig_ref, wmat_ref, w2_ref, vecs_ref,
                         lnf_ref, o_ref, *, nhead, num_layers, d_model, ffn,
                         use_final_norm):
    """Whole RopeEncoder forward for one block of flattened (batch*seq) rows."""
    d = d_model
    hd = d // nhead
    scale = 1.0 / math.sqrt(hd)

    x = x_ref[...]                       # (R, D)  rows = flattened (seq, pos)
    mask = mask_ref[0]                   # (R, R)  block-diag + key-padding additive
    cos = trig_ref[0]                    # (R, D)  per-head tiled cos
    sin = trig_ref[1]                    # (R, D)  per-head tiled, sign-folded sin

    def layer_norm(v, g, b):
        mu = jnp.mean(v, axis=-1, keepdims=True)
        c = v - mu
        var = jnp.mean(c * c, axis=-1, keepdims=True)
        return c * jax.lax.rsqrt(var + LN_EPS) * g + b

    for layer in range(num_layers):
        wm = wmat_ref[layer]             # (D, 8D + FFN): [Wq|Wq_sw|Wk|Wk_sw|Wvo*4|W1]
        vl = vecs_ref[layer]             # (8, max(8D, FFN)) packed bias / LN rows

        # ---------------- self-attention block (pre-norm) --------------------
        h = layer_norm(x, vl[_ROW_LN1G:_ROW_LN1G + 1, :d],
                       vl[_ROW_LN1B:_ROW_LN1B + 1, :d])
        qkv = (jnp.dot(h, wm[:, :8 * d], preferred_element_type=jnp.float32)
               + vl[_ROW_BQKV:_ROW_BQKV + 1, :8 * d])        # (R, 8D)

        # Full-width RoPE: rotate-half swap pre-folded into the projection
        # (columns [D:2D) / [3D:4D) already hold swap(q) / swap(k)).
        q_rot = qkv[:, 0:d] * cos + qkv[:, d:2 * d] * sin     # (R, D)
        k_rot = qkv[:, 2 * d:3 * d] * cos + qkv[:, 3 * d:4 * d] * sin

        attn = jnp.zeros(x.shape, jnp.float32)
        for hh in range(nhead):
            qh = q_rot[:, hh * hd:(hh + 1) * hd]               # (R, hd)
            kh = k_rot[:, hh * hd:(hh + 1) * hd]
            s = jax.lax.dot_general(qh, kh, (((1,), (1,)), ((), ())),
                                    preferred_element_type=jnp.float32)
            s = s * scale + mask                                # (R, R)
            s = s - jnp.max(s, axis=-1, keepdims=True)
            p = jnp.exp(s)
            p = p * pl.reciprocal(jnp.sum(p, axis=-1, keepdims=True),
                                  approx=True)
            # value columns already carry Wo (per-head fold): one (R,R)x(R,D)
            vfold = qkv[:, (4 + hh) * d:(5 + hh) * d]           # (R, D)
            attn = attn + jnp.dot(p, vfold,
                                  preferred_element_type=jnp.float32)
        x = x + attn + vl[_ROW_BO:_ROW_BO + 1, :d]              # + out_proj bias

        # ---------------- feed-forward block (pre-norm) ----------------------
        h2 = layer_norm(x, vl[_ROW_LN2G:_ROW_LN2G + 1, :d],
                        vl[_ROW_LN2B:_ROW_LN2B + 1, :d])
        ff = jnp.maximum(
            jnp.dot(h2, wm[:, 8 * d:], preferred_element_type=jnp.float32)
            + vl[_ROW_B1:_ROW_B1 + 1, :ffn], 0.0)
        x = x + jnp.dot(ff, w2_ref[layer],
                        preferred_element_type=jnp.float32) \
              + vl[_ROW_B2:_ROW_B2 + 1, :d]

    if use_final_norm:
        lnf = lnf_ref[...]                                      # (2, D)
        x = layer_norm(x, lnf[0:1, :], lnf[1:2, :])
    o_ref[...] = x


# ----------------------------------- wrapper ---------------------------------
def _default_num_splits(batch):
    """2-way TensorCore split on v7x (2 TCs/chip); single step elsewhere."""
    try:
        kind = jax.devices()[0].device_kind.lower()
    except Exception:
        return 1
    if batch % 2 == 0 and ("v7" in kind or "tpu7" in kind):
        return 2
    return 1


def rope_encoder_forward(params, x, key_padding_mask=None, *,
                         nhead=NHEAD, use_final_norm=True, num_splits=None):
    """x: (B, L, D) float.  key_padding_mask: (B, L) bool, True == may attend
    (F.scaled_dot_product_attention bool-mask semantics)."""
    x = x.astype(jnp.float32)
    B, L, D = x.shape
    max_len = params["cos"].shape[0]
    assert L <= max_len, f"sequence length {L} exceeds RoPE table ({max_len})"

    num_layers = params["wmat"].shape[0]
    ffn = params["w2"].shape[1]

    if num_splits is None:
        num_splits = _default_num_splits(B)
    if B % num_splits != 0:
        num_splits = 1
    Bs = B // num_splits          # sequences per grid step
    BLs = Bs * L                  # rows per grid step
    BL = B * L

    x2d = x.reshape(BL, D)

    # Block-diagonal (same-sequence) + key-padding additive mask, per split.
    seq_id = jnp.repeat(jnp.arange(Bs), L)                      # (BLs,)
    same = seq_id[:, None] == seq_id[None, :]                   # (BLs, BLs)
    if key_padding_mask is None:
        attm = jnp.ones((num_splits, BLs), jnp.bool_)
    else:
        attm = key_padding_mask.astype(jnp.bool_).reshape(num_splits, BLs)
    allowed = same[None, :, :] & attm[:, None, :]
    add_mask = jnp.where(allowed, 0.0, MASK_NEG).astype(jnp.float32)

    # cos / sign-folded-sin tables tiled to (rows-per-step, D).
    trig = jnp.stack([jnp.tile(params["cos"][:L], (Bs, 1)),
                      jnp.tile(params["sin"][:L], (Bs, 1))])    # (2, BLs, D)

    kernel = functools.partial(
        _rope_encoder_kernel, nhead=nhead, num_layers=num_layers,
        d_model=D, ffn=ffn, use_final_norm=use_final_norm)

    out2d = pl.pallas_call(
        kernel,
        out_shape=jax.ShapeDtypeStruct((BL, D), jnp.float32),
        grid=(num_splits,),
        in_specs=[
            pl.BlockSpec((BLs, D), lambda s: (s, 0)),                 # x rows
            pl.BlockSpec((1, BLs, BLs), lambda s: (s, 0, 0)),         # add. mask
            pl.BlockSpec(trig.shape, lambda s: (0, 0, 0)),            # cos/sin
            pl.BlockSpec(params["wmat"].shape, lambda s: (0, 0, 0)),  # W slab
            pl.BlockSpec(params["w2"].shape, lambda s: (0, 0, 0)),    # W2 slab
            pl.BlockSpec(params["vecs"].shape, lambda s: (0, 0, 0)),  # bias/LN slab
            pl.BlockSpec(params["lnf"].shape, lambda s: (0, 0)),      # final LN
        ],
        out_specs=pl.BlockSpec((BLs, D), lambda s: (s, 0)),
        compiler_params=pltpu.CompilerParams(
            dimension_semantics=("parallel",)),
    )(x2d, add_mask, trig, params["wmat"], params["w2"],
      params["vecs"], params["lnf"])
    return out2d.reshape(B, L, D)


# ------------------- parameter init & kernel-layout prep ---------------------
def init_raw_params(key, *, d_model=D_MODEL, ffn=FFN, num_layers=NUM_LAYERS):
    """PyTorch-layout parameters: Linear weights are (out_features, in_features)."""
    keys = iter(jax.random.split(key, 16 * num_layers + 4))

    def lin(out_d, in_d):
        w = jax.random.normal(next(keys), (out_d, in_d), jnp.float32) / math.sqrt(in_d)
        b = 0.02 * jax.random.normal(next(keys), (out_d,), jnp.float32)
        return w, b

    layers = []
    for _ in range(num_layers):
        p = {}
        p["Wq"], p["bq"] = lin(d_model, d_model)
        p["Wk"], p["bk"] = lin(d_model, d_model)
        p["Wv"], p["bv"] = lin(d_model, d_model)
        p["Wo"], p["bo"] = lin(d_model, d_model)
        p["W1"], p["b1"] = lin(ffn, d_model)
        p["W2"], p["b2"] = lin(d_model, ffn)
        p["ln1_g"], p["ln1_b"] = jnp.ones((d_model,)), jnp.zeros((d_model,))
        p["ln2_g"], p["ln2_b"] = jnp.ones((d_model,)), jnp.zeros((d_model,))
        layers.append(p)
    return {"layers": layers,
            "lnf_g": jnp.ones((d_model,)), "lnf_b": jnp.zeros((d_model,))}


def prepare_params(raw, *, nhead=NHEAD, max_len=MAX_LEN):
    """Fuse / transpose / pack weights into the kernel layout.

    Folds applied per layer (all exact, verified against the reference):
      * per-head [even...|odd...] feature permutation of Wq/Wk outputs
        (converts interleaved RoPE into rotate-half form);
      * extra "swapped" q/k projection columns (rotate-half lane swap folded
        into the weights, so RoPE needs no in-kernel permutation);
      * Wo folded into per-head value weights: Wvo_h = (Wo[:,h] @ Wv[h,:]).T;
      * everything packed into 3 dense f32 slabs + lnf + trig tables.
    """
    layers = raw["layers"]
    d = layers[0]["Wq"].shape[0]
    ffn = layers[0]["W1"].shape[0]
    hd = d // nhead
    hd2 = hd // 2
    row_w = max(8 * d, ffn)

    within = jnp.concatenate([jnp.arange(0, hd, 2), jnp.arange(1, hd, 2)])
    perm = jnp.concatenate([within + h * hd for h in range(nhead)])
    swap_w = jnp.concatenate([jnp.arange(hd2, hd), jnp.arange(0, hd2)])
    swap = jnp.concatenate([swap_w + h * hd for h in range(nhead)])

    def pad_row(v):
        return jnp.pad(v, (0, row_w - v.shape[0]))

    wmat, w2s, vecs = [], [], []
    for p in layers:
        Wq_p, bq_p = p["Wq"][perm, :], p["bq"][perm]
        Wk_p, bk_p = p["Wk"][perm, :], p["bk"][perm]
        Wq_s, bq_s = Wq_p[swap, :], bq_p[swap]
        Wk_s, bk_s = Wk_p[swap, :], bk_p[swap]
        vo_w, vo_b = [], []
        for h in range(nhead):
            Wo_h = p["Wo"][:, h * hd:(h + 1) * hd]              # (D, hd)
            Wv_h = p["Wv"][h * hd:(h + 1) * hd, :]              # (hd, D)
            vo_w.append((Wo_h @ Wv_h).T)                        # (D_in, D_out)
            vo_b.append(Wo_h @ p["bv"][h * hd:(h + 1) * hd])    # (D,)
        wfused = jnp.concatenate(
            [Wq_p.T, Wq_s.T, Wk_p.T, Wk_s.T] + vo_w, axis=1)    # (D, 8D)
        bfused = jnp.concatenate([bq_p, bq_s, bk_p, bk_s] + vo_b)  # (8D,)

        wmat.append(jnp.concatenate([wfused, p["W1"].T], axis=1))  # (D, 8D+FFN)
        w2s.append(p["W2"].T)                                       # (FFN, D)
        vecs.append(jnp.stack([
            pad_row(bfused), pad_row(p["b1"]), pad_row(p["bo"]), pad_row(p["b2"]),
            pad_row(p["ln1_g"]), pad_row(p["ln1_b"]),
            pad_row(p["ln2_g"]), pad_row(p["ln2_b"])]))             # (8, row_w)

    inv_freq = 1.0 / (10000.0 ** (jnp.arange(0, hd, 2, dtype=jnp.float32) / hd))
    freqs = jnp.arange(max_len, dtype=jnp.float32)[:, None] * inv_freq[None, :]
    cos, sin = jnp.cos(freqs), jnp.sin(freqs)                        # (max_len, hd2)
    # Full-width tables in the kernel's per-head [even-half | odd-half] layout;
    # rotate-half sign folded into the sin table.
    cos_full = jnp.tile(jnp.concatenate([cos, cos], axis=1), (1, nhead))
    sin_full = jnp.tile(jnp.concatenate([-sin, sin], axis=1), (1, nhead))

    return {
        "wmat": jnp.stack(wmat), "w2": jnp.stack(w2s), "vecs": jnp.stack(vecs),
        "lnf": jnp.stack([raw["lnf_g"], raw["lnf_b"]]),
        "cos": cos_full, "sin": sin_full,
    }


# -------------------- pure-JAX reference (self-check only) -------------------
def _reference_forward(raw, x, key_padding_mask, *, nhead=NHEAD):
    """Direct transcription of the PyTorch RopeEncoder (interleaved RoPE)."""
    B, L, D = x.shape
    hd = D // nhead
    inv_freq = 1.0 / (10000.0 ** (jnp.arange(0, hd, 2, dtype=jnp.float32) / hd))
    freqs = jnp.arange(L, dtype=jnp.float32)[:, None] * inv_freq[None, :]
    cos, sin = jnp.cos(freqs), jnp.sin(freqs)                 # (L, hd//2)
    add_mask = jnp.where(key_padding_mask, 0.0, MASK_NEG)[:, None, None, :]

    def ln(v, g, b):
        mu = v.mean(-1, keepdims=True)
        var = ((v - mu) ** 2).mean(-1, keepdims=True)
        return (v - mu) / jnp.sqrt(var + LN_EPS) * g + b

    def rope(t):                                              # (B, H, L, hd)
        te, to = t[..., 0::2], t[..., 1::2]
        return jnp.stack([te * cos - to * sin, te * sin + to * cos],
                         axis=-1).reshape(t.shape)

    def split(z):
        return z.reshape(B, L, nhead, hd).transpose(0, 2, 1, 3)

    for p in raw["layers"]:
        h = ln(x, p["ln1_g"], p["ln1_b"])
        q = split(h @ p["Wq"].T + p["bq"])
        k = split(h @ p["Wk"].T + p["bk"])
        v = split(h @ p["Wv"].T + p["bv"])
        q, k = rope(q), rope(k)
        s = jnp.einsum("bhqd,bhkd->bhqk", q, k) / math.sqrt(hd) + add_mask
        a = jnp.einsum("bhqk,bhkd->bhqd", jax.nn.softmax(s, -1), v)
        a = a.transpose(0, 2, 1, 3).reshape(B, L, D)
        x = x + a @ p["Wo"].T + p["bo"]
        h = ln(x, p["ln2_g"], p["ln2_b"])
        x = x + jnp.maximum(h @ p["W1"].T + p["b1"], 0.0) @ p["W2"].T + p["b2"]
    return ln(x, raw["lnf_g"], raw["lnf_b"])


# ----------------------------------- main ------------------------------------
if __name__ == "__main__":
    root = jax.random.PRNGKey(0)
    k_param, k_x = jax.random.split(root)

    raw = init_raw_params(k_param)
    params = prepare_params(raw)

    B, L = 2, 16
    x = jax.random.normal(k_x, (B, L, D_MODEL), jnp.float32)
    # Bool mask with F.scaled_dot_product_attention semantics: True == attend.
    # Mask out the last 4 "padding" positions of every row.
    key_padding_mask = jnp.ones((B, L), jnp.bool_).at[:, -4:].set(False)

    fwd = jax.jit(functools.partial(rope_encoder_forward, nhead=NHEAD))
    out = fwd(params, x, key_padding_mask)
    jax.block_until_ready(out)

    assert out.shape == (B, L, D_MODEL), out.shape
    assert bool(jnp.all(jnp.isfinite(out))), "non-finite output"

    ref = _reference_forward(raw, x, key_padding_mask, nhead=NHEAD)
    max_err = float(jnp.max(jnp.abs(out - ref)))
    assert max_err < 2e-2, f"mismatch vs pure-JAX reference: {max_err}"

    print("KERNEL_OK")
</pallas_src>

<mosaic_0001>
module attributes {stable_mosaic.version = 11 : i64} {
  func.func @_rope_encoder_kernel(%arg0: i32, %arg1: memref<32x32xf32, #tpu.memory_space<vmem>>, %arg2: memref<1x32x32xf32, #tpu.memory_space<vmem>>, %arg3: memref<2x32x32xf32, #tpu.memory_space<vmem>>, %arg4: memref<2x32x320xf32, #tpu.memory_space<vmem>>, %arg5: memref<2x64x32xf32, #tpu.memory_space<vmem>>, %arg6: memref<2x8x256xf32, #tpu.memory_space<vmem>>, %arg7: memref<2x32xf32, #tpu.memory_space<vmem>>, %arg8: memref<32x32xf32, #tpu.memory_space<vmem>>) attributes {dimension_semantics = [#tpu.dimension_semantics<parallel>], iteration_bounds = array<i64: 1>, scalar_prefetch = 0 : i64, scratch_operands = 0 : i64, tpu.core_type = #tpu.core_type<tc>, window_params = [{transform_indices = @transform_0, window_bounds = array<i64: 32, 32>}, {transform_indices = @transform_1, window_bounds = array<i64: 1, 32, 32>}, {pipeline_mode = #tpu.pipeline_mode<synchronous>, transform_indices = @transform_2, window_bounds = array<i64: 2, 32, 32>}, {pipeline_mode = #tpu.pipeline_mode<synchronous>, transform_indices = @transform_3, window_bounds = array<i64: 2, 32, 320>}, {pipeline_mode = #tpu.pipeline_mode<synchronous>, transform_indices = @transform_4, window_bounds = array<i64: 2, 64, 32>}, {pipeline_mode = #tpu.pipeline_mode<synchronous>, transform_indices = @transform_5, window_bounds = array<i64: 2, 8, 256>}, {pipeline_mode = #tpu.pipeline_mode<synchronous>, transform_indices = @transform_6, window_bounds = array<i64: 2, 32>}, {transform_indices = @transform_7, window_bounds = array<i64: 32, 32>}]} {
    %c0 = arith.constant 0 : index
    %c0_0 = arith.constant 0 : index
    %0 = vector.load %arg1[%c0, %c0_0] : memref<32x32xf32, #tpu.memory_space<vmem>>, vector<32x32xf32>
    %c0_1 = arith.constant 0 : index
    %c0_2 = arith.constant 0 : index
    %c0_3 = arith.constant 0 : index
    %1 = vector.load %arg2[%c0_1, %c0_2, %c0_3] : memref<1x32x32xf32, #tpu.memory_space<vmem>>, vector<1x32x32xf32>
    %2 = vector.shape_cast %1 : vector<1x32x32xf32> to vector<32x32xf32>
    %c0_4 = arith.constant 0 : index
    %c0_5 = arith.constant 0 : index
    %c0_6 = arith.constant 0 : index
    %3 = vector.load %arg3[%c0_4, %c0_5, %c0_6] : memref<2x32x32xf32, #tpu.memory_space<vmem>>, vector<1x32x32xf32>
    %4 = vector.shape_cast %3 : vector<1x32x32xf32> to vector<32x32xf32>
    %c1 = arith.constant 1 : index
    %c0_7 = arith.constant 0 : index
    %c0_8 = arith.constant 0 : index
    %5 = vector.load %arg3[%c1, %c0_7, %c0_8] : memref<2x32x32xf32, #tpu.memory_space<vmem>>, vector<1x32x32xf32>
    %6 = vector.shape_cast %5 : vector<1x32x32xf32> to vector<32x32xf32>
    %c0_9 = arith.constant 0 : index
    %c0_10 = arith.constant 0 : index
    %c0_11 = arith.constant 0 : index
    %7 = vector.load %arg4[%c0_9, %c0_10, %c0_11] : memref<2x32x320xf32, #tpu.memory_space<vmem>>, vector<1x32x320xf32>
    %8 = vector.shape_cast %7 : vector<1x32x320xf32> to vector<32x320xf32>
    %c0_12 = arith.constant 0 : index
    %c0_13 = arith.constant 0 : index
    %c0_14 = arith.constant 0 : index
    %9 = vector.load %arg6[%c0_12, %c0_13, %c0_14] : memref<2x8x256xf32, #tpu.memory_space<vmem>>, vector<1x8x256xf32>
    %10 = vector.shape_cast %9 : vector<1x8x256xf32> to vector<8x256xf32>
    %11 = vector.extract_strided_slice %10 {offsets = [4, 0], sizes = [1, 32], strides = [1, 1]} : vector<8x256xf32> to vector<1x32xf32>
    %12 = vector.extract_strided_slice %10 {offsets = [5, 0], sizes = [1, 32], strides = [1, 1]} : vector<8x256xf32> to vector<1x32xf32>
    %cst = arith.constant dense<0.000000e+00> : vector<32xf32>
    %13 = vector.multi_reduction <add>, %0, %cst [1] : vector<32x32xf32> to vector<32xf32>
    %14 = vector.shape_cast %13 : vector<32xf32> to vector<32x1xf32>
    %cst_15 = arith.constant 3.200000e+01 : f32
    %15 = vector.broadcast %cst_15 : f32 to vector<32x1xf32>
    %16 = arith.divf %14, %15 : vector<32x1xf32>
    %17 = vector.broadcast %16 : vector<32x1xf32> to vector<32x32xf32>
    %18 = arith.subf %0, %17 : vector<32x32xf32>
    %19 = arith.mulf %18, %18 : vector<32x32xf32>
    %cst_16 = arith.constant dense<0.000000e+00> : vector<32xf32>
    %20 = vector.multi_reduction <add>, %19, %cst_16 [1] : vector<32x32xf32> to vector<32xf32>
    %21 = vector.shape_cast %20 : vector<32xf32> to vector<32x1xf32>
    %cst_17 = arith.constant 3.200000e+01 : f32
    %22 = vector.broadcast %cst_17 : f32 to vector<32x1xf32>
    %23 = arith.divf %21, %22 : vector<32x1xf32>
    %cst_18 = arith.constant 9.99999974E-6 : f32
    %24 = vector.broadcast %cst_18 : f32 to vector<32x1xf32>
    %25 = arith.addf %23, %24 : vector<32x1xf32>
    %26 = math.rsqrt %25 : vector<32x1xf32>
    %27 = vector.broadcast %26 : vector<32x1xf32> to vector<32x32xf32>
    %28 = arith.mulf %18, %27 : vector<32x32xf32>
    %29 = vector.broadcast %11 : vector<1x32xf32> to vector<32x32xf32>
    %30 = arith.mulf %28, %29 : vector<32x32xf32>
    %31 = vector.broadcast %12 : vector<1x32xf32> to vector<32x32xf32>
    %32 = arith.addf %30, %31 : vector<32x32xf32>
    %33 = vector.extract_strided_slice %8 {offsets = [0, 0], sizes = [32, 256], strides = [1, 1]} : vector<32x320xf32> to vector<32x256xf32>
    %cst_19 = arith.constant dense<0.000000e+00> : vector<32x256xf32>
    %34 = tpu.matmul %32, %33, %cst_19 {dimension_numbers = #tpu.dot_dimension_numbers<[1], [0], [0], [1], [0, 0, 1, 1], [], []>} : vector<32x32xf32>, vector<32x256xf32>, vector<32x256xf32> -> vector<32x256xf32>
    %35 = vector.extract_strided_slice %10 {offsets = [0, 0], sizes = [1, 256], strides = [1, 1]} : vector<8x256xf32> to vector<1x256xf32>
    %36 = vector.broadcast %35 : vector<1x256xf32> to vector<32x256xf32>
    %37 = arith.addf %34, %36 : vector<32x256xf32>
    %38 = vector.extract_strided_slice %37 {offsets = [0, 0], sizes = [32, 32], strides = [1, 1]} : vector<32x256xf32> to vector<32x32xf32>
    %39 = arith.mulf %38, %4 : vector<32x32xf32>
    %40 = vector.extract_strided_slice %37 {offsets = [0, 32], sizes = [32, 32], strides = [1, 1]} : vector<32x256xf32> to vector<32x32xf32>
    %41 = arith.mulf %40, %6 : vector<32x32xf32>
    %42 = arith.addf %39, %41 : vector<32x32xf32>
    %43 = vector.extract_strided_slice %37 {offsets = [0, 64], sizes = [32, 32], strides = [1, 1]} : vector<32x256xf32> to vector<32x32xf32>
    %44 = arith.mulf %43, %4 : vector<32x32xf32>
    %45 = vector.extract_strided_slice %37 {offsets = [0, 96], sizes = [32, 32], strides = [1, 1]} : vector<32x256xf32> to vector<32x32xf32>
    %46 = arith.mulf %45, %6 : vector<32x32xf32>
    %47 = arith.addf %44, %46 : vector<32x32xf32>
    %cst_20 = arith.constant 0.000000e+00 : f32
    %48 = vector.broadcast %cst_20 : f32 to vector<32x32xf32>
    %49 = vector.extract_strided_slice %42 {offsets = [0, 0], sizes = [32, 8], strides = [1, 1]} : vector<32x32xf32> to vector<32x8xf32>
    %50 = vector.extract_strided_slice %47 {offsets = [0, 0], sizes = [32, 8], strides = [1, 1]} : vector<32x32xf32> to vector<32x8xf32>
    %cst_21 = arith.constant dense<0.000000e+00> : vector<32x32xf32>
    %51 = tpu.matmul %49, %50, %cst_21 {dimension_numbers = #tpu.dot_dimension_numbers<[1], [1], [0], [0], [0, 0, 1, 0], [], []>} : vector<32x8xf32>, vector<32x8xf32>, vector<32x32xf32> -> vector<32x32xf32>
    %cst_22 = arith.constant 0.353553385 : f32
    %52 = vector.broadcast %cst_22 : f32 to vector<32x32xf32>
    %53 = arith.mulf %51, %52 : vector<32x32xf32>
    %54 = arith.addf %53, %2 : vector<32x32xf32>
    %cst_23 = arith.constant dense<0xFF800000> : vector<32xf32>
    %55 = vector.multi_reduction <maximumf>, %54, %cst_23 [1] : vector<32x32xf32> to vector<32xf32>
    %56 = vector.shape_cast %55 : vector<32xf32> to vector<32x1xf32>
    %57 = vector.broadcast %56 : vector<32x1xf32> to vector<32x32xf32>
    %58 = arith.subf %54, %57 : vector<32x32xf32>
    %59 = math.exp %58 : vector<32x32xf32>
    %cst_24 = arith.constant dense<0.000000e+00> : vector<32xf32>
    %60 = vector.multi_reduction <add>, %59, %cst_24 [1] : vector<32x32xf32> to vector<32xf32>
    %61 = vector.shape_cast %60 : vector<32xf32> to vector<32x1xf32>
    %62 = tpu.reciprocal %61 {approx = true} : vector<32x1xf32> -> vector<32x1xf32>
    %63 = vector.broadcast %62 : vector<32x1xf32> to vector<32x32xf32>
    %64 = arith.mulf %59, %63 : vector<32x32xf32>
    %65 = vector.extract_strided_slice %37 {offsets = [0, 128], sizes = [32, 32], strides = [1, 1]} : vector<32x256xf32> to vector<32x32xf32>
    %cst_25 = arith.constant dense<0.000000e+00> : vector<32x32xf32>
    %66 = tpu.matmul %64, %65, %cst_25 {dimension_numbers = #tpu.dot_dimension_numbers<[1], [0], [0], [1], [0, 0, 1, 1], [], []>} : vector<32x32xf32>, vector<32x32xf32>, vector<32x32xf32> -> vector<32x32xf32>
    %67 = arith.addf %48, %66 : vector<32x32xf32>
    %68 = vector.extract_strided_slice %42 {offsets = [0, 8], sizes = [32, 8], strides = [1, 1]} : vector<32x32xf32> to vector<32x8xf32>
    %69 = vector.extract_strided_slice %47 {offsets = [0, 8], sizes = [32, 8], strides = [1, 1]} : vector<32x32xf32> to vector<32x8xf32>
    %cst_26 = arith.constant dense<0.000000e+00> : vector<32x32xf32>
    %70 = tpu.matmul %68, %69, %cst_26 {dimension_numbers = #tpu.dot_dimension_numbers<[1], [1], [0], [0], [0, 0, 1, 0], [], []>} : vector<32x8xf32>, vector<32x8xf32>, vector<32x32xf32> -> vector<32x32xf32>
    %cst_27 = arith.constant 0.353553385 : f32
    %71 = vector.broadcast %cst_27 : f32 to vector<32x32xf32>
    %72 = arith.mulf %70, %71 : vector<32x32xf32>
    %73 = arith.addf %72, %2 : vector<32x32xf32>
    %cst_28 = arith.constant dense<0xFF800000> : vector<32xf32>
    %74 = vector.multi_reduction <maximumf>, %73, %cst_28 [1] : vector<32x32xf32> to vector<32xf32>
    %75 = vector.shape_cast %74 : vector<32xf32> to vector<32x1xf32>
    %76 = vector.broadcast %75 : vector<32x1xf32> to vector<32x32xf32>
    %77 = arith.subf %73, %76 : vector<32x32xf32>
    %78 = math.exp %77 : vector<32x32xf32>
    %cst_29 = arith.constant dense<0.000000e+00> : vector<32xf32>
    %79 = vector.multi_reduction <add>, %78, %cst_29 [1] : vector<32x32xf32> to vector<32xf32>
    %80 = vector.shape_cast %79 : vector<32xf32> to vector<32x1xf32>
    %81 = tpu.reciprocal %80 {approx = true} : vector<32x1xf32> -> vector<32x1xf32>
    %82 = vector.broadcast %81 : vector<32x1xf32> to vector<32x32xf32>
    %83 = arith.mulf %78, %82 : vector<32x32xf32>
    %84 = vector.extract_strided_slice %37 {offsets = [0, 160], sizes = [32, 32], strides = [1, 1]} : vector<32x256xf32> to vector<32x32xf32>
    %cst_30 = arith.constant dense<0.000000e+00> : vector<32x32xf32>
    %85 = tpu.matmul %83, %84, %cst_30 {dimension_numbers = #tpu.dot_dimension_numbers<[1], [0], [0], [1], [0, 0, 1, 1], [], []>} : vector<32x32xf32>, vector<32x32xf32>, vector<32x32xf32> -> vector<32x32xf32>
    %86 = arith.addf %67, %85 : vector<32x32xf32>
    %87 = vector.extract_strided_slice %42 {offsets = [0, 16], sizes = [32, 8], strides = [1, 1]} : vector<32x32xf32> to vector<32x8xf32>
    %88 = vector.extract_strided_slice %47 {offsets = [0, 16], sizes = [32, 8], strides = [1, 1]} : vector<32x32xf32> to vector<32x8xf32>
    %cst_31 = arith.constant dense<0.000000e+00> : vector<32x32xf32>
    %89 = tpu.matmul %87, %88, %cst_31 {dimension_numbers = #tpu.dot_dimension_numbers<[1], [1], [0], [0], [0, 0, 1, 0], [], []>} : vector<32x8xf32>, vector<32x8xf32>, vector<32x32xf32> -> vector<32x32xf32>
    %cst_32 = arith.constant 0.353553385 : f32
    %90 = vector.broadcast %cst_32 : f32 to vector<32x32xf32>
    %91 = arith.mulf %89, %90 : vector<32x32xf32>
    %92 = arith.addf %91, %2 : vector<32x32xf32>
    %cst_33 = arith.constant dense<0xFF800000> : vector<32xf32>
    %93 = vector.multi_reduction <maximumf>, %92, %cst_33 [1] : vector<32x32xf32> to vector<32xf32>
    %94 = vector.shape_cast %93 : vector<32xf32> to vector<32x1xf32>
    %95 = vector.broadcast %94 : vector<32x1xf32> to vector<32x32xf32>
    %96 = arith.subf %92, %95 : vector<32x32xf32>
    %97 = math.exp %96 : vector<32x32xf32>
    %cst_34 = arith.constant dense<0.000000e+00> : vector<32xf32>
    %98 = vector.multi_reduction <add>, %97, %cst_34 [1] : vector<32x32xf32> to vector<32xf32>
    %99 = vector.shape_cast %98 : vector<32xf32> to vector<32x1xf32>
    %100 = tpu.reciprocal %99 {approx = true} : vector<32x1xf32> -> vector<32x1xf32>
    %101 = vector.broadcast %100 : vector<32x1xf32> to vector<32x32xf32>
    %102 = arith.mulf %97, %101 : vector<32x32xf32>
    %103 = vector.extract_strided_slice %37 {offsets = [0, 192], sizes = [32, 32], strides = [1, 1]} : vector<32x256xf32> to vector<32x32xf32>
    %cst_35 = arith.constant dense<0.000000e+00> : vector<32x32xf32>
    %104 = tpu.matmul %102, %103, %cst_35 {dimension_numbers = #tpu.dot_dimension_numbers<[1], [0], [0], [1], [0, 0, 1, 1], [], []>} : vector<32x32xf32>, vector<32x32xf32>, vector<32x32xf32> -> vector<32x32xf32>
    %105 = arith.addf %86, %104 : vector<32x32xf32>
    %106 = vector.extract_strided_slice %42 {offsets = [0, 24], sizes = [32, 8], strides = [1, 1]} : vector<32x32xf32> to vector<32x8xf32>
    %107 = vector.extract_strided_slice %47 {offsets = [0, 24], sizes = [32, 8], strides = [1, 1]} : vector<32x32xf32> to vector<32x8xf32>
    %cst_36 = arith.constant dense<0.000000e+00> : vector<32x32xf32>
    %108 = tpu.matmul %106, %107, %cst_36 {dimension_numbers = #tpu.dot_dimension_numbers<[1], [1], [0], [0], [0, 0, 1, 0], [], []>} : vector<32x8xf32>, vector<32x8xf32>, vector<32x32xf32> -> vector<32x32xf32>
    %cst_37 = arith.constant 0.353553385 : f32
    %109 = vector.broadcast %cst_37 : f32 to vector<32x32xf32>
    %110 = arith.mulf %108, %109 : vector<32x32xf32>
    %111 = arith.addf %110, %2 : vector<32x32xf32>
    %cst_38 = arith.constant dense<0xFF800000> : vector<32xf32>
    %112 = vector.multi_reduction <maximumf>, %111, %cst_38 [1] : vector<32x32xf32> to vector<32xf32>
    %113 = vector.shape_cast %112 : vector<32xf32> to vector<32x1xf32>
    %114 = vector.broadcast %113 : vector<32x1xf32> to vector<32x32xf32>
    %115 = arith.subf %111, %114 : vector<32x32xf32>
    %116 = math.exp %115 : vector<32x32xf32>
    %cst_39 = arith.constant dense<0.000000e+00> : vector<32xf32>
    %117 = vector.multi_reduction <add>, %116, %cst_39 [1] : vector<32x32xf32> to vector<32xf32>
    %118 = vector.shape_cast %117 : vector<32xf32> to vector<32x1xf32>
    %119 = tpu.reciprocal %118 {approx = true} : vector<32x1xf32> -> vector<32x1xf32>
    %120 = vector.broadcast %119 : vector<32x1xf32> to vector<32x32xf32>
    %121 = arith.mulf %116, %120 : vector<32x32xf32>
    %122 = vector.extract_strided_slice %37 {offsets = [0, 224], sizes = [32, 32], strides = [1, 1]} : vector<32x256xf32> to vector<32x32xf32>
    %cst_40 = arith.constant dense<0.000000e+00> : vector<32x32xf32>
    %123 = tpu.matmul %121, %122, %cst_40 {dimension_numbers = #tpu.dot_dimension_numbers<[1], [0], [0], [1], [0, 0, 1, 1], [], []>} : vector<32x32xf32>, vector<32x32xf32>, vector<32x32xf32> -> vector<32x32xf32>
    %124 = arith.addf %105, %123 : vector<32x32xf32>
    %125 = arith.addf %0, %124 : vector<32x32xf32>
    %126 = vector.extract_strided_slice %10 {offsets = [2, 0], sizes = [1, 32], strides = [1, 1]} : vector<8x256xf32> to vector<1x32xf32>
    %127 = vector.broadcast %126 : vector<1x32xf32> to vector<32x32xf32>
    %128 = arith.addf %125, %127 : vector<32x32xf32>
    %129 = vector.extract_strided_slice %10 {offsets = [6, 0], sizes = [1, 32], strides = [1, 1]} : vector<8x256xf32> to vector<1x32xf32>
    %130 = vector.extract_strided_slice %10 {offsets = [7, 0], sizes = [1, 32], strides = [1, 1]} : vector<8x256xf32> to vector<1x32xf32>
    %cst_41 = arith.constant dense<0.000000e+00> : vector<32xf32>
    %131 = vector.multi_reduction <add>, %128, %cst_41 [1] : vector<32x32xf32> to vector<32xf32>
    %132 = vector.shape_cast %131 : vector<32xf32> to vector<32x1xf32>
    %cst_42 = arith.constant 3.200000e+01 : f32
    %133 = vector.broadcast %cst_42 : f32 to vector<32x1xf32>
    %134 = arith.divf %132, %133 : vector<32x1xf32>
    %135 = vector.broadcast %134 : vector<32x1xf32> to vector<32x32xf32>
    %136 = arith.subf %128, %135 : vector<32x32xf32>
    %137 = arith.mulf %136, %136 : vector<32x32xf32>
    %cst_43 = arith.constant dense<0.000000e+00> : vector<32xf32>
    %138 = vector.multi_reduction <add>, %137, %cst_43 [1] : vector<32x32xf32> to vector<32xf32>
    %139 = vector.shape_cast %138 : vector<32xf32> to vector<32x1xf32>
    %cst_44 = arith.constant 3.200000e+01 : f32
    %140 = vector.broadcast %cst_44 : f32 to vector<32x1xf32>
    %141 = arith.divf %139, %140 : vector<32x1xf32>
    %cst_45 = arith.constant 9.99999974E-6 : f32
    %142 = vector.broadcast %cst_45 : f32 to vector<32x1xf32>
    %143 = arith.addf %141, %142 : vector<32x1xf32>
    %144 = math.rsqrt %143 : vector<32x1xf32>
    %145 = vector.broadcast %144 : vector<32x1xf32> to vector<32x32xf32>
    %146 = arith.mulf %136, %145 : vector<32x32xf32>
    %147 = vector.broadcast %129 : vector<1x32xf32> to vector<32x32xf32>
    %148 = arith.mulf %146, %147 : vector<32x32xf32>
    %149 = vector.broadcast %130 : vector<1x32xf32> to vector<32x32xf32>
    %150 = arith.addf %148, %149 : vector<32x32xf32>
    %151 = vector.extract_strided_slice %8 {offsets = [0, 256], sizes = [32, 64], strides = [1, 1]} : vector<32x320xf32> to vector<32x64xf32>
    %cst_46 = arith.constant dense<0.000000e+00> : vector<32x64xf32>
    %152 = tpu.matmul %150, %151, %cst_46 {dimension_numbers = #tpu.dot_dimension_numbers<[1], [0], [0], [1], [0, 0, 1, 1], [], []>} : vector<32x32xf32>, vector<32x64xf32>, vector<32x64xf32> -> vector<32x64xf32>
    %153 = vector.extract_strided_slice %10 {offsets = [1, 0], sizes = [1, 64], strides = [1, 1]} : vector<8x256xf32> to vector<1x64xf32>
    %154 = vector.broadcast %153 : vector<1x64xf32> to vector<32x64xf32>
    %155 = arith.addf %152, %154 : vector<32x64xf32>
    %cst_47 = arith.constant 0.000000e+00 : f32
    %156 = vector.broadcast %cst_47 : f32 to vector<32x64xf32>
    %157 = arith.maximumf %155, %156 : vector<32x64xf32>
    %c0_48 = arith.constant 0 : index
    %c0_49 = arith.constant 0 : index
    %c0_50 = arith.constant 0 : index
    %158 = vector.load %arg5[%c0_48, %c0_49, %c0_50] : memref<2x64x32xf32, #tpu.memory_space<vmem>>, vector<1x64x32xf32>
    %159 = vector.shape_cast %158 : vector<1x64x32xf32> to vector<64x32xf32>
    %cst_51 = arith.constant dense<0.000000e+00> : vector<32x32xf32>
    %160 = tpu.matmul %157, %159, %cst_51 {dimension_numbers = #tpu.dot_dimension_numbers<[1], [0], [0], [1], [0, 0, 1, 1], [], []>} : vector<32x64xf32>, vector<64x32xf32>, vector<32x32xf32> -> vector<32x32xf32>
    %161 = arith.addf %128, %160 : vector<32x32xf32>
    %162 = vector.extract_strided_slice %10 {offsets = [3, 0], sizes = [1, 32], strides = [1, 1]} : vector<8x256xf32> to vector<1x32xf32>
    %163 = vector.broadcast %162 : vector<1x32xf32> to vector<32x32xf32>
    %164 = arith.addf %161, %163 : vector<32x32xf32>
    %c1_52 = arith.constant 1 : index
    %c0_53 = arith.constant 0 : index
    %c0_54 = arith.constant 0 : index
    %165 = vector.load %arg4[%c1_52, %c0_53, %c0_54] : memref<2x32x320xf32, #tpu.memory_space<vmem>>, vector<1x32x320xf32>
    %166 = vector.shape_cast %165 : vector<1x32x320xf32> to vector<32x320xf32>
    %c1_55 = arith.constant 1 : index
    %c0_56 = arith.constant 0 : index
    %c0_57 = arith.constant 0 : index
    %167 = vector.load %arg6[%c1_55, %c0_56, %c0_57] : memref<2x8x256xf32, #tpu.memory_space<vmem>>, vector<1x8x256xf32>
    %168 = vector.shape_cast %167 : vector<1x8x256xf32> to vector<8x256xf32>
    %169 = vector.extract_strided_slice %168 {offsets = [4, 0], sizes = [1, 32], strides = [1, 1]} : vector<8x256xf32> to vector<1x32xf32>
    %170 = vector.extract_strided_slice %168 {offsets = [5, 0], sizes = [1, 32], strides = [1, 1]} : vector<8x256xf32> to vector<1x32xf32>
    %cst_58 = arith.constant dense<0.000000e+00> : vector<32xf32>
    %171 = vector.multi_reduction <add>, %164, %cst_58 [1] : vector<32x32xf32> to vector<32xf32>
    %172 = vector.shape_cast %171 : vector<32xf32> to vector<32x1xf32>
    %cst_59 = arith.constant 3.200000e+01 : f32
    %173 = vector.broadcast %cst_59 : f32 to vector<32x1xf32>
    %174 = arith.divf %172, %173 : vector<32x1xf32>
    %175 = vector.broadcast %174 : vector<32x1xf32> to vector<32x32xf32>
    %176 = arith.subf %164, %175 : vector<32x32xf32>
    %177 = arith.mulf %176, %176 : vector<32x32xf32>
    %cst_60 = arith.constant dense<0.000000e+00> : vector<32xf32>
    %178 = vector.multi_reduction <add>, %177, %cst_60 [1] : vector<32x32xf32> to vector<32xf32>
    %179 = vector.shape_cast %178 : vector<32xf32> to vector<32x1xf32>
    %cst_61 = arith.constant 3.200000e+01 : f32
    %180 = vector.broadcast %cst_61 : f32 to vector<32x1xf32>
    %181 = arith.divf %179, %180 : vector<32x1xf32>
    %cst_62 = arith.constant 9.99999974E-6 : f32
    %182 = vector.broadcast %cst_62 : f32 to vector<32x1xf32>
    %183 = arith.addf %181, %182 : vector<32x1xf32>
    %184 = math.rsqrt %183 : vector<32x1xf32>
    %185 = vector.broadcast %184 : vector<32x1xf32> to vector<32x32xf32>
    %186 = arith.mulf %176, %185 : vector<32x32xf32>
    %187 = vector.broadcast %169 : vector<1x32xf32> to vector<32x32xf32>
    %188 = arith.mulf %186, %187 : vector<32x32xf32>
    %189 = vector.broadcast %170 : vector<1x32xf32> to vector<32x32xf32>
    %190 = arith.addf %188, %189 : vector<32x32xf32>
    %191 = vector.extract_strided_slice %166 {offsets = [0, 0], sizes = [32, 256], strides = [1, 1]} : vector<32x320xf32> to vector<32x256xf32>
    %cst_63 = arith.constant dense<0.000000e+00> : vector<32x256xf32>
    %192 = tpu.matmul %190, %191, %cst_63 {dimension_numbers = #tpu.dot_dimension_numbers<[1], [0], [0], [1], [0, 0, 1, 1], [], []>} : vector<32x32xf32>, vector<32x256xf32>, vector<32x256xf32> -> vector<32x256xf32>
    %193 = vector.extract_strided_slice %168 {offsets = [0, 0], sizes = [1, 256], strides = [1, 1]} : vector<8x256xf32> to vector<1x256xf32>
    %194 = vector.broadcast %193 : vector<1x256xf32> to vector<32x256xf32>
    %195 = arith.addf %192, %194 : vector<32x256xf32>
    %196 = vector.extract_strided_slice %195 {offsets = [0, 0], sizes = [32, 32], strides = [1, 1]} : vector<32x256xf32> to vector<32x32xf32>
    %197 = arith.mulf %196, %4 : vector<32x32xf32>
    %198 = vector.extract_strided_slice %195 {offsets = [0, 32], sizes = [32, 32], strides = [1, 1]} : vector<32x256xf32> to vector<32x32xf32>
    %199 = arith.mulf %198, %6 : vector<32x32xf32>
    %200 = arith.addf %197, %199 : vector<32x32xf32>
    %201 = vector.extract_strided_slice %195 {offsets = [0, 64], sizes = [32, 32], strides = [1, 1]} : vector<32x256xf32> to vector<32x32xf32>
    %202 = arith.mulf %201, %4 : vector<32x32xf32>
    %203 = vector.extract_strided_slice %195 {offsets = [0, 96], sizes = [32, 32], strides = [1, 1]} : vector<32x256xf32> to vector<32x32xf32>
    %204 = arith.mulf %203, %6 : vector<32x32xf32>
    %205 = arith.addf %202, %204 : vector<32x32xf32>
    %cst_64 = arith.constant 0.000000e+00 : f32
    %206 = vector.broadcast %cst_64 : f32 to vector<32x32xf32>
    %207 = vector.extract_strided_slice %200 {offsets = [0, 0], sizes = [32, 8], strides = [1, 1]} : vector<32x32xf32> to vector<32x8xf32>
    %208 = vector.extract_strided_slice %205 {offsets = [0, 0], sizes = [32, 8], strides = [1, 1]} : vector<32x32xf32> to vector<32x8xf32>
    %cst_65 = arith.constant dense<0.000000e+00> : vector<32x32xf32>
    %209 = tpu.matmul %207, %208, %cst_65 {dimension_numbers = #tpu.dot_dimension_numbers<[1], [1], [0], [0], [0, 0, 1, 0], [], []>} : vector<32x8xf32>, vector<32x8xf32>, vector<32x32xf32> -> vector<32x32xf32>
    %cst_66 = arith.constant 0.353553385 : f32
    %210 = vector.broadcast %cst_66 : f32 to vector<32x32xf32>
    %211 = arith.mulf %209, %210 : vector<32x32xf32>
    %212 = arith.addf %211, %2 : vector<32x32xf32>
    %cst_67 = arith.constant dense<0xFF800000> : vector<32xf32>
    %213 = vector.multi_reduction <maximumf>, %212, %cst_67 [1] : vector<32x32xf32> to vector<32xf32>
    %214 = vector.shape_cast %213 : vector<32xf32> to vector<32x1xf32>
    %215 = vector.broadcast %214 : vector<32x1xf32> to vector<32x32xf32>
    %216 = arith.subf %212, %215 : vector<32x32xf32>
    %217 = math.exp %216 : vector<32x32xf32>
    %cst_68 = arith.constant dense<0.000000e+00> : vector<32xf32>
    %218 = vector.multi_reduction <add>, %217, %cst_68 [1] : vector<32x32xf32> to vector<32xf32>
    %219 = vector.shape_cast %218 : vector<32xf32> to vector<32x1xf32>
    %220 = tpu.reciprocal %219 {approx = true} : vector<32x1xf32> -> vector<32x1xf32>
    %221 = vector.broadcast %220 : vector<32x1xf32> to vector<32x32xf32>
    %222 = arith.mulf %217, %221 : vector<32x32xf32>
    %223 = vector.extract_strided_slice %195 {offsets = [0, 128], sizes = [32, 32], strides = [1, 1]} : vector<32x256xf32> to vector<32x32xf32>
    %cst_69 = arith.constant dense<0.000000e+00> : vector<32x32xf32>
    %224 = tpu.matmul %222, %223, %cst_69 {dimension_numbers = #tpu.dot_dimension_numbers<[1], [0], [0], [1], [0, 0, 1, 1], [], []>} : vector<32x32xf32>, vector<32x32xf32>, vector<32x32xf32> -> vector<32x32xf32>
    %225 = arith.addf %206, %224 : vector<32x32xf32>
    %226 = vector.extract_strided_slice %200 {offsets = [0, 8], sizes = [32, 8], strides = [1, 1]} : vector<32x32xf32> to vector<32x8xf32>
    %227 = vector.extract_strided_slice %205 {offsets = [0, 8], sizes = [32, 8], strides = [1, 1]} : vector<32x32xf32> to vector<32x8xf32>
    %cst_70 = arith.constant dense<0.000000e+00> : vector<32x32xf32>
    %228 = tpu.matmul %226, %227, %cst_70 {dimension_numbers = #tpu.dot_dimension_numbers<[1], [1], [0], [0], [0, 0, 1, 0], [], []>} : vector<32x8xf32>, vector<32x8xf32>, vector<32x32xf32> -> vector<32x32xf32>
    %cst_71 = arith.constant 0.353553385 : f32
    %229 = vector.broadcast %cst_71 : f32 to vector<32x32xf32>
    %230 = arith.mulf %228, %229 : vector<32x32xf32>
    %231 = arith.addf %230, %2 : vector<32x32xf32>
    %cst_72 = arith.constant dense<0xFF800000> : vector<32xf32>
    %232 = vector.multi_reduction <maximumf>, %231, %cst_72 [1] : vector<32x32xf32> to vector<32xf32>
    %233 = vector.shape_cast %232 : vector<32xf32> to vector<32x1xf32>
    %234 = vector.broadcast %233 : vector<32x1xf32> to vector<32x32xf32>
    %235 = arith.subf %231, %234 : vector<32x32xf32>
    %236 = math.exp %235 : vector<32x32xf32>
    %cst_73 = arith.constant dense<0.000000e+00> : vector<32xf32>
    %237 = vector.multi_reduction <add>, %236, %cst_73 [1] : vector<32x32xf32> to vector<32xf32>
    %238 = vector.shape_cast %237 : vector<32xf32> to vector<32x1xf32>
    %239 = tpu.reciprocal %238 {approx = true} : vector<32x1xf32> -> vector<32x1xf32>
    %240 = vector.broadcast %239 : vector<32x1xf32> to vector<32x32xf32>
    %241 = arith.mulf %236, %240 : vector<32x32xf32>
    %242 = vector.extract_strided_slice %195 {offsets = [0, 160], sizes = [32, 32], strides = [1, 1]} : vector<32x256xf32> to vector<32x32xf32>
    %cst_74 = arith.constant dense<0.000000e+00> : vector<32x32xf32>
    %243 = tpu.matmul %241, %242, %cst_74 {dimension_numbers = #tpu.dot_dimension_numbers<[1], [0], [0], [1], [0, 0, 1, 1], [], []>} : vector<32x32xf32>, vector<32x32xf32>, vector<32x32xf32> -> vector<32x32xf32>
    %244 = arith.addf %225, %243 : vector<32x32xf32>
    %245 = vector.extract_strided_slice %200 {offsets = [0, 16], sizes = [32, 8], strides = [1, 1]} : vector<32x32xf32> to vector<32x8xf32>
    %246 = vector.extract_strided_slice %205 {offsets = [0, 16], sizes = [32, 8], strides = [1, 1]} : vector<32x32xf32> to vector<32x8xf32>
    %cst_75 = arith.constant dense<0.000000e+00> : vector<32x32xf32>
    %247 = tpu.matmul %245, %246, %cst_75 {dimension_numbers = #tpu.dot_dimension_numbers<[1], [1], [0], [0], [0, 0, 1, 0], [], []>} : vector<32x8xf32>, vector<32x8xf32>, vector<32x32xf32> -> vector<32x32xf32>
    %cst_76 = arith.constant 0.353553385 : f32
    %248 = vector.broadcast %cst_76 : f32 to vector<32x32xf32>
    %249 = arith.mulf %247, %248 : vector<32x32xf32>
    %250 = arith.addf %249, %2 : vector<32x32xf32>
    %cst_77 = arith.constant dense<0xFF800000> : vector<32xf32>
    %251 = vector.multi_reduction <maximumf>, %250, %cst_77 [1] : vector<32x32xf32> to vector<32xf32>
    %252 = vector.shape_cast %251 : vector<32xf32> to vector<32x1xf32>
    %253 = vector.broadcast %252 : vector<32x1xf32> to vector<32x32xf32>
    %254 = arith.subf %250, %253 : vector<32x32xf32>
    %255 = math.exp %254 : vector<32x32xf32>
    %cst_78 = arith.constant dense<0.000000e+00> : vector<32xf32>
    %256 = vector.multi_reduction <add>, %255, %cst_78 [1] : vector<32x32xf32> to vector<32xf32>
    %257 = vector.shape_cast %256 : vector<32xf32> to vector<32x1xf32>
    %258 = tpu.reciprocal %257 {approx = true} : vector<32x1xf32> -> vector<32x1xf32>
    %259 = vector.broadcast %258 : vector<32x1xf32> to vector<32x32xf32>
    %260 = arith.mulf %255, %259 : vector<32x32xf32>
    %261 = vector.extract_strided_slice %195 {offsets = [0, 192], sizes = [32, 32], strides = [1, 1]} : vector<32x256xf32> to vector<32x32xf32>
    %cst_79 = arith.constant dense<0.000000e+00> : vector<32x32xf32>
    %262 = tpu.matmul %260, %261, %cst_79 {dimension_numbers = #tpu.dot_dimension_numbers<[1], [0], [0], [1], [0, 0, 1, 1], [], []>} : vector<32x32xf32>, vector<32x32xf32>, vector<32x32xf32> -> vector<32x32xf32>
    %263 = arith.addf %244, %262 : vector<32x32xf32>
    %264 = vector.extract_strided_slice %200 {offsets = [0, 24], sizes = [32, 8], strides = [1, 1]} : vector<32x32xf32> to vector<32x8xf32>
    %265 = vector.extract_strided_slice %205 {offsets = [0, 24], sizes = [32, 8], strides = [1, 1]} : vector<32x32xf32> to vector<32x8xf32>
    %cst_80 = arith.constant dense<0.000000e+00> : vector<32x32xf32>
    %266 = tpu.matmul %264, %265, %cst_80 {dimension_numbers = #tpu.dot_dimension_numbers<[1], [1], [0], [0], [0, 0, 1, 0], [], []>} : vector<32x8xf32>, vector<32x8xf32>, vector<32x32xf32> -> vector<32x32xf32>
    %cst_81 = arith.constant 0.353553385 : f32
    %267 = vector.broadcast %cst_81 : f32 to vector<32x32xf32>
    %268 = arith.mulf %266, %267 : vector<32x32xf32>
    %269 = arith.addf %268, %2 : vector<32x32xf32>
    %cst_82 = arith.constant dense<0xFF800000> : vector<32xf32>
    %270 = vector.multi_reduction <maximumf>, %269, %cst_82 [1] : vector<32x32xf32> to vector<32xf32>
    %271 = vector.shape_cast %270 : vector<32xf32> to vector<32x1xf32>
    %272 = vector.broadcast %271 : vector<32x1xf32> to vector<32x32xf32>
    %273 = arith.subf %269, %272 : vector<32x32xf32>
    %274 = math.exp %273 : vector<32x32xf32>
    %cst_83 = arith.constant dense<0.000000e+00> : vector<32xf32>
    %275 = vector.multi_reduction <add>, %274, %cst_83 [1] : vector<32x32xf32> to vector<32xf32>
    %276 = vector.shape_cast %275 : vector<32xf32> to vector<32x1xf32>
    %277 = tpu.reciprocal %276 {approx = true} : vector<32x1xf32> -> vector<32x1xf32>
    %278 = vector.broadcast %277 : vector<32x1xf32> to vector<32x32xf32>
    %279 = arith.mulf %274, %278 : vector<32x32xf32>
    %280 = vector.extract_strided_slice %195 {offsets = [0, 224], sizes = [32, 32], strides = [1, 1]} : vector<32x256xf32> to vector<32x32xf32>
    %cst_84 = arith.constant dense<0.000000e+00> : vector<32x32xf32>
    %281 = tpu.matmul %279, %280, %cst_84 {dimension_numbers = #tpu.dot_dimension_numbers<[1], [0], [0], [1], [0, 0, 1, 1], [], []>} : vector<32x32xf32>, vector<32x32xf32>, vector<32x32xf32> -> vector<32x32xf32>
    %282 = arith.addf %263, %281 : vector<32x32xf32>
    %283 = arith.addf %164, %282 : vector<32x32xf32>
    %284 = vector.extract_strided_slice %168 {offsets = [2, 0], sizes = [1, 32], strides = [1, 1]} : vector<8x256xf32> to vector<1x32xf32>
    %285 = vector.broadcast %284 : vector<1x32xf32> to vector<32x32xf32>
    %286 = arith.addf %283, %285 : vector<32x32xf32>
    %287 = vector.extract_strided_slice %168 {offsets = [6, 0], sizes = [1, 32], strides = [1, 1]} : vector<8x256xf32> to vector<1x32xf32>
    %288 = vector.extract_strided_slice %168 {offsets = [7, 0], sizes = [1, 32], strides = [1, 1]} : vector<8x256xf32> to vector<1x32xf32>
    %cst_85 = arith.constant dense<0.000000e+00> : vector<32xf32>
    %289 = vector.multi_reduction <add>, %286, %cst_85 [1] : vector<32x32xf32> to vector<32xf32>
    %290 = vector.shape_cast %289 : vector<32xf32> to vector<32x1xf32>
    %cst_86 = arith.constant 3.200000e+01 : f32
    %291 = vector.broadcast %cst_86 : f32 to vector<32x1xf32>
    %292 = arith.divf %290, %291 : vector<32x1xf32>
    %293 = vector.broadcast %292 : vector<32x1xf32> to vector<32x32xf32>
    %294 = arith.subf %286, %293 : vector<32x32xf32>
    %295 = arith.mulf %294, %294 : vector<32x32xf32>
    %cst_87 = arith.constant dense<0.000000e+00> : vector<32xf32>
    %296 = vector.multi_reduction <add>, %295, %cst_87 [1] : vector<32x32xf32> to vector<32xf32>
    %297 = vector.shape_cast %296 : vector<32xf32> to vector<32x1xf32>
    %cst_88 = arith.constant 3.200000e+01 : f32
    %298 = vector.broadcast %cst_88 : f32 to vector<32x1xf32>
    %299 = arith.divf %297, %298 : vector<32x1xf32>
    %cst_89 = arith.constant 9.99999974E-6 : f32
    %300 = vector.broadcast %cst_89 : f32 to vector<32x1xf32>
    %301 = arith.addf %299, %300 : vector<32x1xf32>
    %302 = math.rsqrt %301 : vector<32x1xf32>
    %303 = vector.broadcast %302 : vector<32x1xf32> to vector<32x32xf32>
    %304 = arith.mulf %294, %303 : vector<32x32xf32>
    %305 = vector.broadcast %287 : vector<1x32xf32> to vector<32x32xf32>
    %306 = arith.mulf %304, %305 : vector<32x32xf32>
    %307 = vector.broadcast %288 : vector<1x32xf32> to vector<32x32xf32>
    %308 = arith.addf %306, %307 : vector<32x32xf32>
    %309 = vector.extract_strided_slice %166 {offsets = [0, 256], sizes = [32, 64], strides = [1, 1]} : vector<32x320xf32> to vector<32x64xf32>
    %cst_90 = arith.constant dense<0.000000e+00> : vector<32x64xf32>
    %310 = tpu.matmul %308, %309, %cst_90 {dimension_numbers = #tpu.dot_dimension_numbers<[1], [0], [0], [1], [0, 0, 1, 1], [], []>} : vector<32x32xf32>, vector<32x64xf32>, vector<32x64xf32> -> vector<32x64xf32>
    %311 = vector.extract_strided_slice %168 {offsets = [1, 0], sizes = [1, 64], strides = [1, 1]} : vector<8x256xf32> to vector<1x64xf32>
    %312 = vector.broadcast %311 : vector<1x64xf32> to vector<32x64xf32>
    %313 = arith.addf %310, %312 : vector<32x64xf32>
    %cst_91 = arith.constant 0.000000e+00 : f32
    %314 = vector.broadcast %cst_91 : f32 to vector<32x64xf32>
    %315 = arith.maximumf %313, %314 : vector<32x64xf32>
    %c1_92 = arith.constant 1 : index
    %c0_93 = arith.constant 0 : index
    %c0_94 = arith.constant 0 : index
    %316 = vector.load %arg5[%c1_92, %c0_93, %c0_94] : memref<2x64x32xf32, #tpu.memory_space<vmem>>, vector<1x64x32xf32>
    %317 = vector.shape_cast %316 : vector<1x64x32xf32> to vector<64x32xf32>
    %cst_95 = arith.constant dense<0.000000e+00> : vector<32x32xf32>
    %318 = tpu.matmul %315, %317, %cst_95 {dimension_numbers = #tpu.dot_dimension_numbers<[1], [0], [0], [1], [0, 0, 1, 1], [], []>} : vector<32x64xf32>, vector<64x32xf32>, vector<32x32xf32> -> vector<32x32xf32>
    %319 = arith.addf %286, %318 : vector<32x32xf32>
    %320 = vector.extract_strided_slice %168 {offsets = [3, 0], sizes = [1, 32], strides = [1, 1]} : vector<8x256xf32> to vector<1x32xf32>
    %321 = vector.broadcast %320 : vector<1x32xf32> to vector<32x32xf32>
    %322 = arith.addf %319, %321 : vector<32x32xf32>
    %c0_96 = arith.constant 0 : index
    %c0_97 = arith.constant 0 : index
    %323 = vector.load %arg7[%c0_96, %c0_97] : memref<2x32xf32, #tpu.memory_space<vmem>>, vector<2x32xf32>
    %324 = vector.extract_strided_slice %323 {offsets = [0, 0], sizes = [1, 32], strides = [1, 1]} : vector<2x32xf32> to vector<1x32xf32>
    %325 = vector.extract_strided_slice %323 {offsets = [1, 0], sizes = [1, 32], strides = [1, 1]} : vector<2x32xf32> to vector<1x32xf32>
    %cst_98 = arith.constant dense<0.000000e+00> : vector<32xf32>
    %326 = vector.multi_reduction <add>, %322, %cst_98 [1] : vector<32x32xf32> to vector<32xf32>
    %327 = vector.shape_cast %326 : vector<32xf32> to vector<32x1xf32>
    %cst_99 = arith.constant 3.200000e+01 : f32
    %328 = vector.broadcast %cst_99 : f32 to vector<32x1xf32>
    %329 = arith.divf %327, %328 : vector<32x1xf32>
    %330 = vector.broadcast %329 : vector<32x1xf32> to vector<32x32xf32>
    %331 = arith.subf %322, %330 : vector<32x32xf32>
    %332 = arith.mulf %331, %331 : vector<32x32xf32>
    %cst_100 = arith.constant dense<0.000000e+00> : vector<32xf32>
    %333 = vector.multi_reduction <add>, %332, %cst_100 [1] : vector<32x32xf32> to vector<32xf32>
    %334 = vector.shape_cast %333 : vector<32xf32> to vector<32x1xf32>
    %cst_101 = arith.constant 3.200000e+01 : f32
    %335 = vector.broadcast %cst_101 : f32 to vector<32x1xf32>
    %336 = arith.divf %334, %335 : vector<32x1xf32>
    %cst_102 = arith.constant 9.99999974E-6 : f32
    %337 = vector.broadcast %cst_102 : f32 to vector<32x1xf32>
    %338 = arith.addf %336, %337 : vector<32x1xf32>
    %339 = math.rsqrt %338 : vector<32x1xf32>
    %340 = vector.broadcast %339 : vector<32x1xf32> to vector<32x32xf32>
    %341 = arith.mulf %331, %340 : vector<32x32xf32>
    %342 = vector.broadcast %324 : vector<1x32xf32> to vector<32x32xf32>
    %343 = arith.mulf %341, %342 : vector<32x32xf32>
    %344 = vector.broadcast %325 : vector<1x32xf32> to vector<32x32xf32>
    %345 = arith.addf %343, %344 : vector<32x32xf32>
    %c0_103 = arith.constant 0 : index
    %c0_104 = arith.constant 0 : index
    %346 = vector.load %arg8[%c0_103, %c0_104] : memref<32x32xf32, #tpu.memory_space<vmem>>, vector<32x32xf32>
    tpu.vector_store %arg8[%c0_103, %c0_104], %345 {strides = array<i32>} : memref<32x32xf32, #tpu.memory_space<vmem>>, vector<32x32xf32>,
    return
  }
  func.func @transform_0(%arg0: i32) -> (i32, i32) {
    %c0_i32 = arith.constant 0 : i32
    %c0_i32_0 = arith.constant 0 : i32
    return %arg0, %c0_i32 : i32, i32
  }
  func.func @transform_1(%arg0: i32) -> (i32, i32, i32) {
    %c0_i32 = arith.constant 0 : i32
    %c0_i32_0 = arith.constant 0 : i32
    %c0_i32_1 = arith.constant 0 : i32
    return %arg0, %c0_i32, %c0_i32_0 : i32, i32, i32
  }
  func.func @transform_2(%arg0: i32) -> (i32, i32, i32) {
    %c0_i32 = arith.constant 0 : i32
    %c0_i32_0 = arith.constant 0 : i32
    %c0_i32_1 = arith.constant 0 : i32
    %c0_i32_2 = arith.constant 0 : i32
    return %c0_i32, %c0_i32_0, %c0_i32_1 : i32, i32, i32
  }
  func.func @transform_3(%arg0: i32) -> (i32, i32, i32) {
    %c0_i32 = arith.constant 0 : i32
    %c0_i32_0 = arith.constant 0 : i32
    %c0_i32_1 = arith.constant 0 : i32
    %c0_i32_2 = arith.constant 0 : i32
    return %c0_i32, %c0_i32_0, %c0_i32_1 : i32, i32, i32
  }
  func.func @transform_4(%arg0: i32) -> (i32, i32, i32) {
    %c0_i32 = arith.constant 0 : i32
    %c0_i32_0 = arith.constant 0 : i32
    %c0_i32_1 = arith.constant 0 : i32
    %c0_i32_2 = arith.constant 0 : i32
    return %c0_i32, %c0_i32_0, %c0_i32_1 : i32, i32, i32
  }
  func.func @transform_5(%arg0: i32) -> (i32, i32, i32) {
    %c0_i32 = arith.constant 0 : i32
    %c0_i32_0 = arith.constant 0 : i32
    %c0_i32_1 = arith.constant 0 : i32
    %c0_i32_2 = arith.constant 0 : i32
    return %c0_i32, %c0_i32_0, %c0_i32_1 : i32, i32, i32
  }
  func.func @transform_6(%arg0: i32) -> (i32, i32) {
    %c0_i32 = arith.constant 0 : i32
    %c0_i32_0 = arith.constant 0 : i32
    %c0_i32_1 = arith.constant 0 : i32
    return %c0_i32, %c0_i32_0 : i32, i32
  }
  func.func @transform_7(%arg0: i32) -> (i32, i32) {
    %c0_i32 = arith.constant 0 : i32
    %c0_i32_0 = arith.constant 0 : i32
    return %arg0, %c0_i32 : i32, i32
  }
}

</mosaic_0001>

<bundles_post_ra>
// kernel: rope_encoder_forward.1
= control target key start
LH: loop header
LB: loop body
LE: loop exit
PB: predicated region body
PF: predicated region fallthrough
CT: control target
= control target key end

     0   :  { %vm58_vm0 = vcmask 261120   ;;  %s5969_s0 = inlined_call_operand.vmem [shape: f32[32,32], index: 0, kind: input, shape index: {}]   ;;  %s5970_s1 = inlined_call_operand.vmem [shape: f32[1,32,32], index: 1, kind: input, shape index: {}]   ;;  %s5971_s2 = inlined_call_operand.vmem [shape: f32[2,32,32], index: 2, kind: input, shape index: {}]   ;;  %s5972_s3 = inlined_call_operand.vmem [shape: f32[2,32,320], index: 3, kind: input, shape index: {}]   ;;  %s5973_s4 = inlined_call_operand.vmem [shape: f32[2,64,32], index: 4, kind: input, shape index: {}]   ;;  %s5974_s5 = inlined_call_operand.vmem [shape: f32[2,8,256], index: 5, kind: input, shape index: {}]   ;;  %s5975_s6 = inlined_call_operand.vmem [shape: f32[2,32], index: 6, kind: input, shape index: {}]   ;;  %s5976_s7 = inlined_call_operand.hbm [shape: f32[32,32], index: 7, kind: output, shape index: {}]  }
   0x1   :  { %v27_v0 = vld [vmem:[%s5969_s0] sm:$0xff]  ;;  %v29_v1 = vld [vmem:[%s5969_s0 + $0x10] sm:$0xff]  ;;  %v28_v2 = vld [vmem:[%s5969_s0 + $0x8] sm:$0xff] }
   0x2   :  { %v59_v3 = vsel %vm58_vm0, %v27_v0, 0.0  ;;  %v65_v4 = vsel %vm58_vm0, %v29_v1, 0.0  ;;  %v30_v5 = vld [vmem:[%s5969_s0 + $0x18] sm:$0xff] }
   0x3   :  { %12 = vsyncpa [#allocation3], 0  ;;  %60 = vadd.xlane.f32.xlu0 %v59_v3  ;;  %66 = vadd.xlane.f32.xlu1 %v65_v4  ;;  %v62_v6 = vsel %vm58_vm0, %v28_v2, 0.0  ;;  %v68_v7 = vsel %vm58_vm0, %v30_v5, 0.0  ;;  %v45_v28 = vld [vmem:[%s5972_s3 + $0x8] sm:$0xff]  ;;  %v48_v29 = vld [vmem:[%s5972_s3 + $0x20] sm:$0xff]  ;;  %v112_v49 = vlaneseq }
   0x4   :  { %v4116_v30 = vpack.c.bf16 %v48_v29, %v45_v28  ;;  %v44_v31 = vld [vmem:[%s5972_s3] sm:$0xff]  ;;  %v47_v32 = vld [vmem:[%s5972_s3 + $0x18] sm:$0xff]  ;;  %v54_v35 = vld [vmem:[%s5972_s3 + $0x50] sm:$0xff]  ;;  %v4723_v38 = vmov 0.0   ;;  %s4724_s29 = smov 96   ;;  %s4725_s9 = smov 32  }
   0x5   :  { %v51_v33 = vld [vmem:[%s5972_s3 + $0x38] sm:$0xff]  ;;  %v4118_v34 = vpack.c.bf16 %v47_v32, %v44_v31  ;;  %v50_v36 = vld [vmem:[%s5972_s3 + $0x30] sm:$0xff]  ;;  %v53_v37 = vld [vmem:[%s5972_s3 + $0x48] sm:$0xff]  ;;  %212 = vmatprep.mubr.f32.mxu1 %v4723_v38  ;;  %s4726_s14 = smov 64   ;;  %v4871_v55 = vshrl.u32 %v112_v49, 7  ;;  %s4727_s25 = smov 56  }
   0x6   :  { %4117 = vmatprep.subr.bf16.mxu1 %v4116_v30  ;;  %v4120_v39 = vpack.c.bf16 %v54_v35, %v51_v33  ;;  %v4122_v40 = vpack.c.bf16 %v53_v37, %v50_v36  ;;  %v3507_v41 = vld [vmem:[%s5971_s2 + $0x28] sm:$0xff]  ;;  %v3506_v42 = vld [vmem:[%s5971_s2 + $0x20] sm:$0xff]  ;;  %v3508_v43 = vld [vmem:[%s5971_s2 + $0x30] sm:$0xff]  ;;  %vm349_vm1 = vcmask 64512   ;;  %s4728_s26 = smov 120   ;;  %s4729_s27 = smov 48  }
   0x7   :  { %63 = vadd.xlane.f32.xlu0 %v62_v6  ;;  %69 = vadd.xlane.f32.xlu1 %v68_v7  ;;  %v3509_v44 = vld [vmem:[%s5971_s2 + $0x38] sm:$0xff]  ;;  %v4858_v45 = vld [vmem:[%s5971_s2] sm:$0xff]  ;;  %v4867_v46 = vld [vmem:[%s5971_s2 + $0x8] sm:$0xff]  ;;  %v114_v60 = vsub.s32 4, %v4871_v55  ;;  %v122_v63 = vsub.s32 5, %v4871_v55  ;;  %s4730_s28 = smov 40  }
   0x8   :  { %4119 = vmatpush1.bf16.msra.mxu1 %v4118_v34  ;;  %v56_v62 = vld [vmem:[%s5974_s5] sm:$0xff]  ;;  %v4917_v34 = vld [vmem:[%s5971_s2 + $0x10] sm:$0xff]  ;;  %s4731_s30 = smov 112   ;;  %s4732_s8 = smov 104   ;;  %vm5021_vm2 = vmpackc.low %vm349_vm1, %vm349_vm1  ;;  %vm1643_vm3 = vcmask 523264  }
   0x9   :  { %4121 = vmatprep.subr.bf16.mxu1 %v4120_v39  ;;  %v123_v3 = vrot.slane %v56_v62, %v122_v63 }
   0xc   :  { %4123 = vmatpush1.bf16.msra.mxu1 %v4122_v40 }
  0x90   :  { %v61_v8 = vpop.xlane.xlu0 %60  ;;  %v67_v9 = vpop.xlane.xlu1 %66 }
  0x91   :  { %v72_v10 = vmul.f32 0.03125, %v61_v8  ;;  %v74_v11 = vmul.f32 0.03125, %v67_v9 }
  0x93   :  { %v4792_v12 = vsub.f32 %v27_v0, %v72_v10  ;;  %v4794_v13 = vsub.f32 %v29_v1, %v74_v11  ;;  %v115_v0 = vrot.slane %v56_v62, %v114_v60 }
  0x94   :  { %v64_v14 = vpop.xlane.xlu0 %63  ;;  %v70_v15 = vpop.xlane.xlu1 %69 }
  0x95   :  { %v73_v16 = vmul.f32 0.03125, %v64_v14  ;;  %v75_v17 = vmul.f32 0.03125, %v70_v15  ;;  %v80_v18 = vmul.f32 %v4792_v12, %v4792_v12  ;;  %v82_v19 = vmul.f32 %v4794_v13, %v4794_v13 }
  0x97   :  { %v4800_v20 = vsub.f32 %v28_v2, %v73_v16  ;;  %v4802_v21 = vsub.f32 %v30_v5, %v75_v17  ;;  %v84_v22 = vsel %vm58_vm0, %v80_v18, 0.0  ;;  %v90_v23 = vsel %vm58_vm0, %v82_v19, 0.0 }
  0x98   :  { %85 = vadd.xlane.f32.xlu0 %v84_v22  ;;  %v4894_v18 = vsub.s32 0, %v4871_v55 }
  0x99   :  { %v81_v24 = vmul.f32 %v4800_v20, %v4800_v20  ;;  %v83_v25 = vmul.f32 %v4802_v21, %v4802_v21 }
  0x9a   :  { %v131_v19 = vrot.slane %v56_v62, %v4894_v18 }
  0x9b   :  { %v87_v26 = vsel %vm58_vm0, %v81_v24, 0.0  ;;  %v93_v27 = vsel %vm58_vm0, %v83_v25, 0.0 }
  0x9c   :  { %91 = vadd.xlane.f32.xlu0 %v90_v23  ;;  %88 = vadd.xlane.f32.xlu1 %v87_v26 }
  0xa0   :  { %94 = vadd.xlane.f32.xlu1 %v93_v27 }
  0xb1   :  { %303 = vrot.lane.b32.xlu1 %v3507_v41, %s4724_s29 }
  0xb2   :  { %301 = vrot.lane.b32.xlu0 %v3506_v42, %s4724_s29 }
  0xb5   :  { %305 = vrot.lane.b32.xlu1 %v3508_v43, %s4724_s29 }
  0xb6   :  { %245 = vrot.lane.b32.xlu0 %v3506_v42, %s4725_s9 }
  0xb9   :  { %307 = vrot.lane.b32.xlu1 %v3509_v44, %s4724_s29 }
  0xba   :  { %249 = vrot.lane.b32.xlu0 %v3508_v43, %s4725_s9  ;;  %v4933_v43 = vld [vmem:[%s5971_s2 + $0x18] sm:$0xff] }
  0xbd   :  { %247 = vrot.lane.b32.xlu1 %v3507_v41, %s4725_s9 }
  0xbe   :  { %285 = vrot.lane.b32.xlu0 %v4858_v45, %s4726_s14 }
  0xc1   :  { %251 = vrot.lane.b32.xlu1 %v3509_v44, %s4725_s9 }
  0xc5   :  { %287 = vrot.lane.b32.xlu1 %v4867_v46, %s4726_s14 }
 0x125   :  { %v86_v47 = vpop.xlane.xlu0 %85 }
 0x126   :  { %v96_v48 = vmul.f32 0.03125, %v86_v47 }
 0x128   :  { %v100_v50 = vadd.f32 1e-05, %v96_v48 }
 0x129   :  { %v89_v51 = vpop.xlane.xlu1 %88  ;;  %v92_v52 = vpop.xlane.xlu0 %91 }
 0x12a   :  { %4517 = vrsqrt.f32 %v100_v50  ;;  %v97_v53 = vmul.f32 0.03125, %v89_v51  ;;  %v98_v54 = vmul.f32 0.03125, %v92_v52 }
 0x12c   :  { %v101_v56 = vadd.f32 1e-05, %v97_v53  ;;  %v102_v57 = vadd.f32 1e-05, %v98_v54 }
 0x12d   :  { %v95_v58 = vpop.xlane.xlu1 %94  ;;  %v4904_v25 = vpop.permute.xlu0 %301 }
 0x12e   :  { %4519 = vrsqrt.f32 %v101_v56  ;;  %v99_v59 = vmul.f32 0.03125, %v95_v58 }
 0x12f   :  { %4521 = vrsqrt.f32 %v102_v57 }
 0x130   :  { %v103_v61 = vadd.f32 1e-05, %v99_v59 }
 0x131   :  { %v4936_v47 = vpop.permute.xlu0 %245 }
 0x132   :  { %4523 = vrsqrt.f32 %v103_v61 }
 0x134   :  { %v4518_v1 = vpop.eup %4517 }
 0x135   :  { %v108_v2 = vmul.f32 %v4518_v1, %v4792_v12  ;;  %v4952_v59 = vpop.permute.xlu0 %249 }
 0x137   :  { %v116_v4 = vmul.f32 %v115_v0, %v108_v2 }
 0x138   :  { %v4520_v5 = vpop.eup %4519 }
 0x139   :  { %v4522_v6 = vpop.eup %4521  ;;  %v124_v7 = vadd.f32 %v123_v3, %v116_v4  ;;  %v109_v8 = vmul.f32 %v4520_v5, %v4800_v20  ;;  %v4897_v20 = vpop.permute.xlu1 %303 }
 0x13a   :  { %v110_v9 = vmul.f32 %v4522_v6, %v4794_v13  ;;  %v4963_v2 = vpop.permute.xlu0 %285 }
 0x13b   :  { %3510 = vmatmul.mubr.msk.f32.vlgmr.msra.gmra.mrb[0].mxu1 %vm58_vm0, %v124_v7  ;;  %v117_v10 = vmul.f32 %v115_v0, %v109_v8 }
 0x13c   :  { %v4524_v11 = vpop.eup %4523  ;;  %218 = vmatprep.mubr.f32.mxu1 %v4723_v38  ;;  %v118_v15 = vmul.f32 %v115_v0, %v110_v9 }
 0x13d   :  { %v125_v14 = vadd.f32 %v123_v3, %v117_v10  ;;  %v111_v12 = vmul.f32 %v4524_v11, %v4802_v21  ;;  %v57_v21 = vld [vmem:[%s5974_s5 + $0x8] sm:$0xff]  ;;  %v4909_v28 = vpop.permute.xlu1 %305 }
 0x13e   :  { %v126_v16 = vadd.f32 %v123_v3, %v118_v15  ;;  %v135_v26 = vrot.slane %v57_v21, %v4894_v18 }
 0x13f   :  { %3511 = vmatmul.mubr.msk.f32.gmra.mrb[2].mxu1 %vm58_vm0, %v125_v14  ;;  %v119_v17 = vmul.f32 %v115_v0, %v111_v12 }
 0x140   :  { %224 = vmatprep.mubr.f32.mxu1 %v4723_v38 }
 0x141   :  { %v127_v13 = vadd.f32 %v123_v3, %v119_v17  ;;  %v4928_v42 = vpop.permute.xlu1 %307 }
 0x143   :  { %3512 = vmatmul.mubr.msk.f32.gmra.mrb[4].mxu1 %vm58_vm0, %v126_v16 }
 0x144   :  { %230 = vmatprep.mubr.f32.mxu1 %v4723_v38 }
 0x145   :  { %v4944_v56 = vpop.permute.xlu1 %247 }
 0x147   :  { %3513 = vmatmul.mubr.msk.f32.gmra.mrb[6].mxu1 %vm58_vm0, %v127_v13 }
 0x149   :  { %v4959_v0 = vpop.permute.xlu1 %251 }
 0x14d   :  { %v4965_v3 = vpop.permute.xlu1 %287 }
 0x20e   :  { %v214_v22 = vpop.f32.mrb[0].mxu1 }
 0x20f   :  { %v4902_v23 = vadd.f32 %v214_v22, %v131_v19  ;;  %v216_v24 = vpop.f32.mrb[1].mxu1 }
 0x210   :  { %v217_v32 = vadd.f32 %v216_v24, %v135_v26 }
 0x211   :  { %v313_v27 = vmul.f32 %v4904_v25, %v4902_v23  ;;  %v257_v54 = vmul.f32 %v4936_v47, %v4902_v23  ;;  %v297_v5 = vmul.f32 %v4963_v2, %v4902_v23  ;;  %v237_v17 = vmul.f32 %v4902_v23, %v4858_v45 }
 0x212   :  { %v220_v29 = vpop.f32.mrb[2].mxu1 }
 0x213   :  { %v4911_v30 = vadd.f32 %v220_v29, %v131_v19  ;;  %v222_v31 = vpop.f32.mrb[3].mxu1  ;;  %321 = vrot.lane.b32.xlu0 %v313_v27, %s4724_s29 }
 0x214   :  { %v223_v33 = vadd.f32 %v222_v31, %v135_v26 }
 0x215   :  { %v314_v35 = vmul.f32 %v4897_v20, %v4911_v30  ;;  %v258_v61 = vmul.f32 %v4944_v56, %v4911_v30  ;;  %v298_v6 = vmul.f32 %v4965_v3, %v4911_v30  ;;  %v238_v45 = vmul.f32 %v4911_v30, %v4867_v46 }
 0x216   :  { %v226_v36 = vpop.f32.mrb[4].mxu1  ;;  %v4921_v37 = vpack.i.bf16 %v223_v33, %v217_v32  ;;  %v4923_v39 = vpack.c.bf16 %v223_v33, %v217_v32 }
 0x217   :  { %v227_v40 = vadd.f32 %v226_v36, %v131_v19  ;;  %323 = vrot.lane.b32.xlu1 %v314_v35, %s4724_s29  ;;  %v228_v41 = vpop.f32.mrb[5].mxu1  ;;  %289 = vrot.lane.b32.xlu0 %v4917_v34, %s4726_s14 }
 0x218   :  { %v229_v51 = vadd.f32 %v228_v41, %v135_v26 }
 0x219   :  { %v315_v44 = vmul.f32 %v4909_v28, %v227_v40  ;;  %v259_v62 = vmul.f32 %v4952_v59, %v227_v40  ;;  %v239_v23 = vmul.f32 %v227_v40, %v4917_v34 }
 0x21a   :  { %v232_v48 = vpop.f32.mrb[6].mxu1 }
 0x21b   :  { %v233_v49 = vadd.f32 %v232_v48, %v131_v19  ;;  %291 = vrot.lane.b32.xlu1 %v4933_v43, %s4726_s14  ;;  %v234_v50 = vpop.f32.mrb[7].mxu1  ;;  %325 = vrot.lane.b32.xlu0 %v315_v44, %s4724_s29 }
 0x21c   :  { %v235_v52 = vadd.f32 %v234_v50, %v135_v26 }
 0x21d   :  { %v316_v53 = vmul.f32 %v4928_v42, %v233_v49  ;;  %v260_v1 = vmul.f32 %v4959_v0, %v233_v49  ;;  %v240_v46 = vmul.f32 %v233_v49, %v4933_v43 }
 0x21e   :  { %v4946_v57 = vpack.i.bf16 %v235_v52, %v229_v51  ;;  %v4948_v58 = vpack.c.bf16 %v235_v52, %v229_v51 }
 0x21f   :  { %327 = vrot.lane.b32.xlu1 %v316_v53, %s4724_s29  ;;  %265 = vrot.lane.b32.xlu0 %v257_v54, %s4724_s29 }
 0x223   :  { %267 = vrot.lane.b32.xlu1 %v258_v61, %s4724_s29  ;;  %269 = vrot.lane.b32.xlu0 %v259_v62, %s4724_s29 }
 0x227   :  { %271 = vrot.lane.b32.xlu1 %v260_v1, %s4724_s29 }
 0x285   :  { %v322_v4 = vpop.permute.xlu0 %321 }
 0x286   :  { %v333_v9 = vadd.f32 %v322_v4, %v297_v5 }
 0x289   :  { %v324_v7 = vpop.permute.xlu1 %323  ;;  %v4971_v8 = vpop.permute.xlu0 %289 }
 0x28a   :  { %v334_v10 = vadd.f32 %v324_v7, %v298_v6  ;;  %v299_v12 = vmul.f32 %v4971_v8, %v227_v40 }
 0x28c   :  { %v4377_v11 = vpack.i.bf16 %v334_v10, %v333_v9 }
 0x28d   :  { %v4973_v14 = vpop.permute.xlu1 %291  ;;  %v326_v15 = vpop.permute.xlu0 %325 }
 0x28e   :  { %4378 = vrot.lane.b32.xlu0 %v4377_v11, %s4727_s25  ;;  %v300_v16 = vmul.f32 %v4973_v14, %v233_v49  ;;  %v335_v21 = vadd.f32 %v326_v15, %v299_v12 }
 0x291   :  { %v328_v13 = vpop.permute.xlu1 %327  ;;  %v266_v19 = vpop.permute.xlu0 %265 }
 0x292   :  { %v336_v22 = vadd.f32 %v328_v13, %v300_v16  ;;  %v277_v24 = vadd.f32 %v266_v19, %v237_v17  ;;  %4388 = vrot.lane.b32.xlu0 %v4377_v11, %s4726_s14 }
 0x294   :  { %3828 = vmatprep.mubr.msk.f32.mxu1 %vm349_vm1, %v277_v24  ;;  %v4382_v26 = vpack.i.bf16 %v336_v22, %v335_v21 }
 0x295   :  { %v268_v27 = vpop.permute.xlu1 %267  ;;  %v270_v29 = vpop.permute.xlu0 %269 }
 0x296   :  { %4383 = vrot.lane.b32.xlu1 %v4382_v26, %s4727_s25  ;;  %507 = vrot.lane.b32.xlu0 %v277_v24, %s4728_s26  ;;  %v4989_v31 = vadd.f32 %v268_v27, %v238_v45  ;;  %v4991_v32 = vadd.f32 %v270_v29, %v239_v23 }
 0x299   :  { %v272_v33 = vpop.permute.xlu1 %271 }
 0x29a   :  { %4393 = vrot.lane.b32.xlu1 %v4377_v11, %s4729_s27  ;;  %4398 = vrot.lane.b32.xlu0 %v4382_v26, %s4726_s14  ;;  %v5000_v30 = vadd.f32 %v272_v33, %v240_v46 }
 0x29e   :  { %509 = vrot.lane.b32.xlu1 %v4989_v31, %s4728_s26  ;;  %511 = vrot.lane.b32.xlu0 %v4991_v32, %s4728_s26 }
 0x2a2   :  { %4403 = vrot.lane.b32.xlu1 %v4382_v26, %s4729_s27  ;;  %4408 = vrot.lane.b32.xlu0 %v4377_v11, %s4730_s28 }
 0x2a6   :  { %513 = vrot.lane.b32.xlu1 %v5000_v30, %s4728_s26  ;;  %888 = vrot.lane.b32.xlu0 %v4989_v31, %s4731_s30 }
 0x2aa   :  { %886 = vrot.lane.b32.xlu1 %v277_v24, %s4731_s30  ;;  %890 = vrot.lane.b32.xlu0 %v4991_v32, %s4731_s30 }
 0x2ae   :  { %4413 = vrot.lane.b32.xlu1 %v4382_v26, %s4730_s28  ;;  %1168 = vrot.lane.b32.xlu0 %v277_v24, %s4732_s8 }
 0x2b2   :  { %892 = vrot.lane.b32.xlu1 %v5000_v30, %s4731_s30  ;;  %1172 = vrot.lane.b32.xlu0 %v4991_v32, %s4732_s8 }
 0x2b6   :  { %1170 = vrot.lane.b32.xlu1 %v4989_v31, %s4732_s8 }
 0x2ba   :  { %1174 = vrot.lane.b32.xlu1 %v5000_v30, %s4732_s8 }
 0x300   :  { %v4379_v34 = vpop.permute.xlu0 %4378 }
 0x301   :  { %v4381_v35 = vunpack.i.h.bf16 %v4379_v34  ;;  %v4380_v36 = vunpack.i.l.bf16 %v4379_v34 }
 0x303   :  { %v4136_v41 = vpack.c.bf16 %v4381_v35, %v4380_v36 }
 0x304   :  { %v4389_v43 = vpop.permute.xlu0 %4388 }
 0x305   :  { %v4391_v44 = vunpack.i.h.bf16 %v4389_v43  ;;  %v4390_v48 = vunpack.i.l.bf16 %v4389_v43  ;;  %4138 = vmatprep.subr.msk.bf16.mxu0 %vm5021_vm2, %v4136_v41 }
 0x306   :  { %4141 = vmatpush3.bf16.xpose.msk.msra.mxu0 %vm5021_vm2, %v4136_v41  ;;  %v5078_v41 = vld [vmem:[%s5970_s1 + $0x8] sm:$0xff] }
 0x307   :  { %v4124_v49 = vpack.c.bf16 %v4391_v44, %v4390_v48  ;;  %v5083_v48 = vld [vmem:[%s5970_s1] sm:$0xff] }
 0x308   :  { %v4384_v50 = vpop.permute.xlu1 %4383  ;;  %v508_v51 = vpop.permute.xlu0 %507 }
 0x309   :  { %v4386_v52 = vunpack.i.h.bf16 %v4384_v50  ;;  %v4385_v53 = vunpack.i.l.bf16 %v4384_v50  ;;  %4126 = vmatprep.subr.msk.bf16.mxu1 %vm5021_vm2, %v4124_v49  ;;  %3842 = vmatprep.mubr.msk.f32.mxu0 %vm349_vm1, %v508_v51 }
 0x30a   :  { %4129 = vmatpush3.bf16.xpose.msk.msra.mxu1 %vm5021_vm2, %v4124_v49 }
 0x30b   :  { %v4142_v54 = vpack.c.bf16 %v4386_v52, %v4385_v53 }
 0x30c   :  { %v4394_v61 = vpop.permute.xlu1 %4393  ;;  %v4399_v62 = vpop.permute.xlu0 %4398 }
 0x30d   :  { %v4396_v1 = vunpack.i.h.bf16 %v4394_v61  ;;  %v4395_v4 = vunpack.i.l.bf16 %v4394_v61  ;;  %v4401_v5 = vunpack.i.h.bf16 %v4399_v62  ;;  %v4400_v6 = vunpack.i.l.bf16 %v4399_v62  ;;  %4144 = vmatprep.subr.msk.bf16.mxu0 %vm5021_vm2, %v4142_v54 }
 0x30e   :  { %4147 = vmatpush3.bf16.xpose.msk.msra.mxu0 %vm5021_vm2, %v4142_v54 }
 0x30f   :  { %v4164_v7 = vpack.c.bf16 %v4396_v1, %v4395_v4  ;;  %v4130_v9 = vpack.c.bf16 %v4401_v5, %v4400_v6 }
 0x310   :  { %v510_v10 = vpop.permute.xlu1 %509  ;;  %v512_v11 = vpop.permute.xlu0 %511 }
 0x311   :  { %4132 = vmatprep.subr.msk.bf16.mxu1 %vm5021_vm2, %v4130_v9  ;;  %4166 = vmatprep.subr.msk.bf16.mxu0 %vm5021_vm2, %v4164_v7 }
 0x312   :  { %4135 = vmatpush3.bf16.xpose.msk.msra.mxu1 %vm5021_vm2, %v4130_v9  ;;  %v34_v9 = vld [vmem:[%s5970_s1 + $0x18] sm:$0xff] }
 0x314   :  { %v4404_v15 = vpop.permute.xlu1 %4403  ;;  %v4409_v17 = vpop.permute.xlu0 %4408 }
 0x315   :  { %v4406_v12 = vunpack.i.h.bf16 %v4404_v15  ;;  %v4405_v16 = vunpack.i.l.bf16 %v4404_v15  ;;  %3843 = vmatmul.mubr.msk.f32.vlgmr.msra.gmra.mrb[0].mxu0 %vm349_vm1, %v510_v10  ;;  %v4411_v21 = vunpack.i.h.bf16 %v4409_v17  ;;  %v4410_v22 = vunpack.i.l.bf16 %v4409_v17 }
 0x316   :  { %3845 = vmatprep.mubr.msk.f32.mxu0 %vm349_vm1, %v512_v11  ;;  %4169 = vmatpush3.bf16.xpose.msk.msra.mxu0 %vm5021_vm2, %v4164_v7 }
 0x317   :  { %v4170_v13 = vpack.c.bf16 %v4406_v12, %v4405_v16  ;;  %v4184_v26 = vpack.c.bf16 %v4411_v21, %v4410_v22  ;;  %v33_v22 = vld [vmem:[%s5970_s1 + $0x10] sm:$0xff] }
 0x318   :  { %v514_v19 = vpop.permute.xlu1 %513  ;;  %v889_v27 = vpop.permute.xlu0 %888 }
 0x319   :  { %3829 = vmatmul.mubr.msk.f32.vlgmr.msra.gmra.mrb[8].mxu1 %vm349_vm1, %v4989_v31  ;;  %3846 = vmatmul.mubr.msk.f32.gmra.mrb[2].mxu0 %vm349_vm1, %v514_v19 }
 0x31a   :  { %4172 = vmatprep.subr.msk.bf16.mxu0 %vm5021_vm2, %v4170_v13  ;;  %3831 = vmatprep.mubr.msk.f32.mxu1 %vm349_vm1, %v4991_v32 }
 0x31c   :  { %v887_v24 = vpop.permute.xlu1 %886  ;;  %v891_v31 = vpop.permute.xlu0 %890 }
 0x31d   :  { %3832 = vmatmul.mubr.msk.f32.gmra.mrb[10].mxu1 %vm349_vm1, %v5000_v30  ;;  %3884 = vmatprep.mubr.msk.f32.mxu0 %vm349_vm1, %v887_v24 }
 0x31e   :  { %4175 = vmatpush3.bf16.xpose.msk.msra.mxu0 %vm5021_vm2, %v4170_v13 }
 0x31f   :  { %4186 = vmatprep.subr.msk.bf16.mxu0 %vm5021_vm2, %v4184_v26 }
 0x320   :  { %v4414_v29 = vpop.permute.xlu1 %4413  ;;  %v1169_v46 = vpop.permute.xlu0 %1168 }
 0x321   :  { %v4416_v45 = vunpack.i.h.bf16 %v4414_v29  ;;  %v4415_v23 = vunpack.i.l.bf16 %v4414_v29 }
 0x323   :  { %v4190_v33 = vpack.c.bf16 %v4416_v45, %v4415_v23 }
 0x324   :  { %v893_v32 = vpop.permute.xlu1 %892  ;;  %v1173_v34 = vpop.permute.xlu0 %1172 }
 0x325   :  { %3885 = vmatmul.mubr.msk.f32.vlgmr.msra.gmra.mrb[4].mxu0 %vm349_vm1, %v889_v27 }
 0x326   :  { %3887 = vmatprep.mubr.msk.f32.mxu0 %vm349_vm1, %v891_v31  ;;  %4189 = vmatpush3.bf16.xpose.msk.msra.mxu0 %vm5021_vm2, %v4184_v26 }
 0x327   :  { %4192 = vmatprep.subr.msk.bf16.mxu0 %vm5021_vm2, %v4190_v33 }
 0x328   :  { %v1171_v30 = vpop.permute.xlu1 %1170 }
 0x329   :  { %3888 = vmatmul.mubr.msk.f32.gmra.mrb[6].mxu0 %vm349_vm1, %v893_v32 }
 0x32a   :  { %3912 = vmatprep.mubr.msk.f32.mxu0 %vm349_vm1, %v1169_v46 }
 0x32c   :  { %v1175_v35 = vpop.permute.xlu1 %1174 }
 0x32e   :  { %4195 = vmatpush3.bf16.xpose.msk.msra.mxu0 %vm5021_vm2, %v4190_v33 }
 0x335   :  { %3913 = vmatmul.mubr.msk.f32.vlgmr.msra.gmra.mrb[8].mxu0 %vm349_vm1, %v1171_v30 }
 0x336   :  { %3915 = vmatprep.mubr.msk.f32.mxu0 %vm349_vm1, %v1173_v34 }
 0x339   :  { %3916 = vmatmul.mubr.msk.f32.gmra.mrb[10].mxu0 %vm349_vm1, %v1175_v35 }
 0x3e8   :  { %v3844_v36 = vpop.f32.mrb[0].mxu0 }
 0x3e9   :  { %v625_v43 = vmul.f32 0.35355338, %v3844_v36  ;;  %v605_v44 = vpop.f32.mrb[1].mxu0 }
 0x3ea   :  { %v624_v49 = vmul.f32 0.35355338, %v605_v44 }
 0x3eb   :  { %v5086_v50 = vadd.f32 %v625_v43, %v5078_v41 }
 0x3ec   :  { %v3830_v51 = vpop.f32.mrb[8].mxu1  ;;  %v3847_v52 = vpop.f32.mrb[2].mxu0  ;;  %v5089_v53 = vadd.f32 %v624_v49, %v5083_v48 }
 0x3ed   :  { %v456_v54 = vmul.f32 0.35355338, %v3830_v51  ;;  %v436_v61 = vpop.f32.mrb[9].mxu1  ;;  %v615_v62 = vpop.f32.mrb[3].mxu0  ;;  %v627_v1 = vmul.f32 0.35355338, %v3847_v52 }
 0x3ee   :  { %v455_v4 = vmul.f32 0.35355338, %v436_v61  ;;  %v635_v5 = vsel %vm58_vm0, %v5086_v50, -inf  ;;  %v632_v6 = vsel %vm58_vm0, %v5089_v53, -inf  ;;  %v626_v17 = vmul.f32 0.35355338, %v615_v62 }
 0x3ef   :  { %636 = vmax.xlane.f32.xlu1 %v635_v5  ;;  %633 = vmax.xlane.f32.xlu0 %v632_v6  ;;  %v5096_v7 = vadd.f32 %v456_v54, %v5078_v41  ;;  %v5108_v19 = vadd.f32 %v627_v1, %v34_v9 }
 0x3f0   :  { %v3833_v10 = vpop.f32.mrb[10].mxu1  ;;  %v5102_v11 = vadd.f32 %v455_v4, %v5083_v48  ;;  %v5119_v29 = vadd.f32 %v626_v17, %v33_v22 }
 0x3f1   :  { %v458_v15 = vmul.f32 0.35355338, %v3833_v10  ;;  %v446_v12 = vpop.f32.mrb[11].mxu1  ;;  %v466_v16 = vsel %vm58_vm0, %v5096_v7, -inf  ;;  %v641_v27 = vsel %vm58_vm0, %v5108_v19, -inf }
 0x3f2   :  { %v463_v13 = vsel %vm58_vm0, %v5102_v11, -inf  ;;  %v457_v26 = vmul.f32 0.35355338, %v446_v12  ;;  %v638_v32 = vsel %vm58_vm0, %v5119_v29, -inf }
 0x3f3   :  { %467 = vmax.xlane.f32.xlu1 %v466_v16  ;;  %464 = vmax.xlane.f32.xlu0 %v463_v13  ;;  %v5110_v21 = vadd.f32 %v458_v15, %v34_v9 }
 0x3f4   :  { %v5123_v46 = vadd.f32 %v457_v26, %v33_v22 }
 0x3f5   :  { %v472_v24 = vsel %vm58_vm0, %v5110_v21, -inf }
 0x3f6   :  { %v469_v49 = vsel %vm58_vm0, %v5123_v46, -inf }
 0x3f7   :  { %473 = vmax.xlane.f32.xlu1 %v472_v24  ;;  %642 = vmax.xlane.f32.xlu0 %v641_v27 }
 0x3f8   :  { %v3886_v45 = vpop.f32.mrb[4].mxu0 }
 0x3f9   :  { %v1004_v23 = vmul.f32 0.35355338, %v3886_v45  ;;  %v984_v31 = vpop.f32.mrb[5].mxu0 }
 0x3fa   :  { %v1003_v33 = vmul.f32 0.35355338, %v984_v31 }
 0x3fb   :  { %639 = vmax.xlane.f32.xlu0 %v638_v32  ;;  %v5126_v30 = vadd.f32 %v1004_v23, %v5078_v41 }
 0x3fc   :  { %v3889_v34 = vpop.f32.mrb[6].mxu0  ;;  %v5133_v51 = vadd.f32 %v1003_v33, %v5083_v48 }
 0x3fd   :  { %v1006_v35 = vmul.f32 0.35355338, %v3889_v34  ;;  %v994_v36 = vpop.f32.mrb[7].mxu0  ;;  %v1014_v43 = vsel %vm58_vm0, %v5126_v30, -inf }
 0x3fe   :  { %v1005_v44 = vmul.f32 0.35355338, %v994_v36  ;;  %1015 = vmax.xlane.f32.xlu1 %v1014_v43  ;;  %v1011_v61 = vsel %vm58_vm0, %v5133_v51, -inf }
 0x3ff   :  { %470 = vmax.xlane.f32.xlu0 %v469_v49  ;;  %v5135_v52 = vadd.f32 %v1006_v35, %v34_v9 }
 0x400   :  { %v5141_v62 = vadd.f32 %v1005_v44, %v33_v22 }
 0x401   :  { %v1020_v54 = vsel %vm58_vm0, %v5135_v52, -inf }
 0x402   :  { %1021 = vmax.xlane.f32.xlu1 %v1020_v54  ;;  %v1017_v1 = vsel %vm58_vm0, %v5141_v62, -inf }
 0x403   :  { %1012 = vmax.xlane.f32.xlu0 %v1011_v61 }
 0x407   :  { %1018 = vmax.xlane.f32.xlu0 %v1017_v1 }
 0x408   :  { %v3914_v4 = vpop.f32.mrb[8].mxu0 }
 0x409   :  { %v1286_v5 = vmul.f32 0.35355338, %v3914_v4  ;;  %v1266_v6 = vpop.f32.mrb[9].mxu0 }
 0x40a   :  { %v1285_v10 = vmul.f32 0.35355338, %v1266_v6 }
 0x40b   :  { %v5146_v15 = vadd.f32 %v1286_v5, %v5078_v41 }
 0x40c   :  { %v3917_v12 = vpop.f32.mrb[10].mxu0  ;;  %v5149_v16 = vadd.f32 %v1285_v10, %v5083_v48 }
 0x40d   :  { %v1288_v17 = vmul.f32 0.35355338, %v3917_v12  ;;  %v1276_v13 = vpop.f32.mrb[11].mxu0  ;;  %v1296_v24 = vsel %vm58_vm0, %v5146_v15, -inf }
 0x40e   :  { %v1287_v26 = vmul.f32 0.35355338, %v1276_v13  ;;  %1297 = vmax.xlane.f32.xlu1 %v1296_v24  ;;  %v1293_v27 = vsel %vm58_vm0, %v5149_v16, -inf }
 0x40f   :  { %1294 = vmax.xlane.f32.xlu0 %v1293_v27  ;;  %v5155_v45 = vadd.f32 %v1288_v17, %v34_v9 }
 0x410   :  { %v5157_v23 = vadd.f32 %v1287_v26, %v33_v22 }
 0x411   :  { %v1302_v41 = vsel %vm58_vm0, %v5155_v45, -inf }
 0x412   :  { %1303 = vmax.xlane.f32.xlu1 %v1302_v41  ;;  %v1299_v48 = vsel %vm58_vm0, %v5157_v23, -inf }
 0x413   :  { %1300 = vmax.xlane.f32.xlu0 %v1299_v48 }
 0x423   :  { %4423 = vrot.lane.b32.xlu1 %v4946_v57, %s4724_s29 }
 0x429   :  { %4418 = vrot.lane.b32.xlu0 %v4921_v37, %s4724_s29 }
 0x47c   :  { %v637_v31 = vpop.xlane.xlu1 %636  ;;  %v634_v33 = vpop.xlane.xlu0 %633 }
 0x47d   :  { %v645_v9 = vsub.f32 %v5086_v50, %v637_v31  ;;  %v644_v22 = vsub.f32 %v5089_v53, %v634_v33 }
 0x47f   :  { %v650_v32 = vmul.f32 1.442695, %v645_v9  ;;  %v648_v34 = vmul.f32 1.442695, %v644_v22 }
 0x480   :  { %v468_v35 = vpop.xlane.xlu1 %467  ;;  %v465_v36 = vpop.xlane.xlu0 %464 }
 0x481   :  { %4525 = vpow2.f32 %v650_v32  ;;  %v476_v43 = vsub.f32 %v5096_v7, %v468_v35  ;;  %v475_v44 = vsub.f32 %v5102_v11, %v465_v36 }
 0x482   :  { %4527 = vpow2.f32 %v648_v34 }
 0x483   :  { %v481_v49 = vmul.f32 1.442695, %v476_v43  ;;  %v479_v54 = vmul.f32 1.442695, %v475_v44 }
 0x484   :  { %v474_v61 = vpop.xlane.xlu1 %473  ;;  %v643_v1 = vpop.xlane.xlu0 %642 }
 0x485   :  { %4529 = vpow2.f32 %v481_v49  ;;  %v478_v4 = vsub.f32 %v5110_v21, %v474_v61  ;;  %v647_v50 = vsub.f32 %v5108_v19, %v643_v1 }
 0x486   :  { %4531 = vpow2.f32 %v479_v54 }
 0x487   :  { %v654_v53 = vmul.f32 1.442695, %v647_v50  ;;  %v485_v5 = vmul.f32 1.442695, %v478_v4 }
 0x488   :  { %v640_v6 = vpop.xlane.xlu0 %639 }
 0x489   :  { %v646_v10 = vsub.f32 %v5119_v29, %v640_v6  ;;  %4533 = vpow2.f32 %v654_v53 }
 0x48a   :  { %4535 = vpow2.f32 %v485_v5 }
 0x48b   :  { %v5174_v7 = vpop.eup %4525  ;;  %v652_v11 = vmul.f32 1.442695, %v646_v10  ;;  %v1016_v12 = vpop.xlane.xlu1 %1015 }
 0x48c   :  { %v5176_v17 = vpop.eup %4527  ;;  %v1024_v13 = vsub.f32 %v5126_v30, %v1016_v12  ;;  %v659_v21 = vsel %vm58_vm0, %v5174_v7, 0.0  ;;  %v471_v19 = vpop.xlane.xlu0 %470 }
 0x48d   :  { %4537 = vpow2.f32 %v652_v11  ;;  %660 = vadd.xlane.f32.xlu1 %v659_v21  ;;  %v477_v24 = vsub.f32 %v5123_v46, %v471_v19  ;;  %v656_v29 = vsel %vm58_vm0, %v5176_v17, 0.0 }
 0x48e   :  { %v1029_v26 = vmul.f32 1.442695, %v1024_v13  ;;  %657 = vadd.xlane.f32.xlu0 %v656_v29 }
 0x48f   :  { %v5184_v27 = vpop.eup %4529  ;;  %v483_v41 = vmul.f32 1.442695, %v477_v24  ;;  %v1022_v48 = vpop.xlane.xlu1 %1021 }
 0x490   :  { %v5186_v31 = vpop.eup %4531  ;;  %4539 = vpow2.f32 %v1029_v26  ;;  %v1026_v30 = vsub.f32 %v5135_v52, %v1022_v48  ;;  %v490_v33 = vsel %vm58_vm0, %v5184_v27, 0.0  ;;  %v1013_v9 = vpop.xlane.xlu0 %1012 }
 0x491   :  { %4541 = vpow2.f32 %v483_v41  ;;  %491 = vadd.xlane.f32.xlu1 %v490_v33  ;;  %v1023_v46 = vsub.f32 %v5133_v51, %v1013_v9  ;;  %v487_v22 = vsel %vm58_vm0, %v5186_v31, 0.0 }
 0x492   :  { %v1033_v32 = vmul.f32 1.442695, %v1026_v30  ;;  %488 = vadd.xlane.f32.xlu0 %v487_v22 }
 0x493   :  { %v1027_v34 = vmul.f32 1.442695, %v1023_v46  ;;  %v5194_v35 = vpop.eup %4533 }
 0x494   :  { %4543 = vpow2.f32 %v1033_v32  ;;  %v1019_v36 = vpop.xlane.xlu0 %1018  ;;  %v665_v43 = vsel %vm58_vm0, %v5194_v35, 0.0  ;;  %v5199_v44 = vpop.eup %4535 }
 0x495   :  { %4545 = vpow2.f32 %v1027_v34  ;;  %v1025_v52 = vsub.f32 %v5141_v62, %v1019_v36  ;;  %666 = vadd.xlane.f32.xlu1 %v665_v43  ;;  %v496_v61 = vsel %vm58_vm0, %v5199_v44, 0.0 }
 0x497   :  { %v5201_v51 = vpop.eup %4537  ;;  %v1031_v49 = vmul.f32 1.442695, %v1025_v52 }
 0x498   :  { %v662_v54 = vsel %vm58_vm0, %v5201_v51, 0.0 }
 0x499   :  { %4547 = vpow2.f32 %v1031_v49  ;;  %663 = vadd.xlane.f32.xlu0 %v662_v54  ;;  %497 = vadd.xlane.f32.xlu1 %v496_v61 }
 0x49a   :  { %v5207_v1 = vpop.eup %4539 }
 0x49b   :  { %v5209_v62 = vpop.eup %4541  ;;  %v1298_v4 = vpop.xlane.xlu1 %1297  ;;  %v1038_v50 = vsel %vm58_vm0, %v5207_v1, 0.0 }
 0x49c   :  { %v1306_v53 = vsub.f32 %v5146_v15, %v1298_v4  ;;  %v1295_v5 = vpop.xlane.xlu0 %1294  ;;  %v493_v6 = vsel %vm58_vm0, %v5209_v62, 0.0 }
 0x49d   :  { %v1305_v10 = vsub.f32 %v5149_v16, %v1295_v5  ;;  %494 = vadd.xlane.f32.xlu0 %v493_v6  ;;  %1039 = vadd.xlane.f32.xlu1 %v1038_v50 }
 0x49e   :  { %v5217_v11 = vpop.eup %4543  ;;  %v1311_v12 = vmul.f32 1.442695, %v1306_v53 }
 0x49f   :  { %v5219_v13 = vpop.eup %4545  ;;  %v1309_v21 = vmul.f32 1.442695, %v1305_v10  ;;  %v1304_v19 = vpop.xlane.xlu1 %1303  ;;  %v1044_v24 = vsel %vm58_vm0, %v5217_v11, 0.0 }
 0x4a0   :  { %4549 = vpow2.f32 %v1311_v12  ;;  %v1308_v15 = vsub.f32 %v5155_v45, %v1304_v19  ;;  %v1301_v29 = vpop.xlane.xlu0 %1300  ;;  %v1035_v26 = vsel %vm58_vm0, %v5219_v13, 0.0 }
 0x4a1   :  { %4551 = vpow2.f32 %v1309_v21  ;;  %v1307_v16 = vsub.f32 %v5157_v23, %v1301_v29  ;;  %1036 = vadd.xlane.f32.xlu0 %v1035_v26  ;;  %1045 = vadd.xlane.f32.xlu1 %v1044_v24 }
 0x4a2   :  { %v1315_v41 = vmul.f32 1.442695, %v1308_v15 }
 0x4a3   :  { %v5227_v48 = vpop.eup %4547  ;;  %v1313_v30 = vmul.f32 1.442695, %v1307_v16  ;;  %v4424_v33 = vpop.permute.xlu1 %4423 }
 0x4a4   :  { %4553 = vpow2.f32 %v1315_v41  ;;  %v4419_v9 = vpop.permute.xlu0 %4418  ;;  %v1041_v46 = vsel %vm58_vm0, %v5227_v48, 0.0  ;;  %v4426_v45 = vunpack.i.h.bf16 %v4424_v33  ;;  %v4425_v22 = vunpack.i.l.bf16 %v4424_v33 }
 0x4a5   :  { %v4421_v32 = vunpack.i.h.bf16 %v4419_v9  ;;  %v4420_v34 = vunpack.i.l.bf16 %v4419_v9  ;;  %1042 = vadd.xlane.f32.xlu1 %v1041_v46  ;;  %4555 = vpow2.f32 %v1313_v30 }
 0x4a6   :  { %v4152_v23 = vpack.c.bf16 %v4426_v45, %v4425_v22 }
 0x4a7   :  { %v4148_v36 = vpack.c.bf16 %v4421_v32, %v4420_v34 }
 0x4a9   :  { %4149 = vmatprep.subr.bf16.mxu1 %v4148_v36 }
 0x4aa   :  { %v5231_v52 = vpop.eup %4549  ;;  %4151 = vmatpush3.bf16.msra.mxu1 %v4148_v36 }
 0x4ab   :  { %v5233_v43 = vpop.eup %4551  ;;  %4153 = vmatprep.subr.bf16.mxu1 %v4152_v23  ;;  %v1320_v49 = vsel %vm58_vm0, %v5231_v52, 0.0 }
 0x4ac   :  { %1321 = vadd.xlane.f32.xlu1 %v1320_v49  ;;  %v1317_v54 = vsel %vm58_vm0, %v5233_v43, 0.0 }
 0x4ad   :  { %1318 = vadd.xlane.f32.xlu0 %v1317_v54 }
 0x4ae   :  { %v5239_v61 = vpop.eup %4553  ;;  %4155 = vmatpush3.bf16.msra.mxu1 %v4152_v23 }
 0x4af   :  { %4157 = vmatprep.subr.bf16.mxu1 %v4923_v39  ;;  %v1326_v4 = vsel %vm58_vm0, %v5239_v61, 0.0  ;;  %v5244_v50 = vpop.eup %4555 }
 0x4b0   :  { %v1323_v53 = vsel %vm58_vm0, %v5244_v50, 0.0 }
 0x4b1   :  { %1327 = vadd.xlane.f32.xlu0 %v1326_v4 }
 0x4b5   :  { %1324 = vadd.xlane.f32.xlu0 %v1323_v53 }
 0x4bd   :  { %4433 = vrot.lane.b32.xlu1 %v4946_v57, %s4726_s14 }
 0x4c1   :  { %4438 = vrot.lane.b32.xlu1 %v4921_v37, %s4725_s9 }
 0x4c5   :  { %4443 = vrot.lane.b32.xlu1 %v4946_v57, %s4725_s9 }
 0x4cb   :  { %4428 = vrot.lane.b32.xlu0 %v4921_v37, %s4726_s14 }
 0x51a   :  { %v661_v5 = vpop.xlane.xlu1 %660 }
 0x51b   :  { %4557 = vrcp.f32 %v661_v5  ;;  %v658_v6 = vpop.xlane.xlu0 %657 }
 0x51c   :  { %4559 = vrcp.f32 %v658_v6 }
 0x51e   :  { %v492_v10 = vpop.xlane.xlu1 %491 }
 0x51f   :  { %v489_v12 = vpop.xlane.xlu0 %488 }
 0x520   :  { %4561 = vrcp.f32 %v489_v12 }
 0x522   :  { %v667_v21 = vpop.xlane.xlu1 %666 }
 0x523   :  { %4563 = vrcp.f32 %v667_v21 }
 0x525   :  { %v4558_v19 = vpop.eup %4557 }
 0x526   :  { %v4560_v24 = vpop.eup %4559  ;;  %v664_v15 = vpop.xlane.xlu0 %663  ;;  %v673_v57 = vmul.f32 %v4558_v19, %v5174_v7 }
 0x527   :  { %v498_v29 = vpop.xlane.xlu1 %497  ;;  %4565 = vrcp.f32 %v664_v15  ;;  %v672_v26 = vmul.f32 %v4560_v24, %v5176_v17 }
 0x528   :  { %4567 = vrcp.f32 %v492_v10 }
 0x529   :  { %3856 = vmatprep.mubr.msk.f32.mxu1 %vm58_vm0, %v672_v26 }
 0x52a   :  { %3857 = vmatmul.mubr.msk.f32.vlgmr.msra.gmra.mrb[12].mxu1 %vm58_vm0, %v673_v57  ;;  %v495_v37 = vpop.xlane.xlu0 %494  ;;  %v4562_v30 = vpop.eup %4561 }
 0x52b   :  { %4159 = vmatpush3.bf16.msra.mxu1 %v4923_v39  ;;  %v1040_v16 = vpop.xlane.xlu1 %1039  ;;  %4569 = vrcp.f32 %v495_v37  ;;  %v503_v39 = vmul.f32 %v4562_v30, %v5186_v31 }
 0x52c   :  { %4161 = vmatprep.subr.bf16.mxu1 %v4948_v58  ;;  %4571 = vrcp.f32 %v498_v29 }
 0x52d   :  { %v4564_v17 = vpop.eup %4563 }
 0x52e   :  { %v1037_v41 = vpop.xlane.xlu0 %1036  ;;  %v675_v46 = vmul.f32 %v4564_v17, %v5194_v35 }
 0x52f   :  { %4163 = vmatpush3.bf16.msra.mxu1 %v4948_v58  ;;  %4573 = vrcp.f32 %v1037_v41  ;;  %v1046_v7 = vpop.xlane.xlu1 %1045 }
 0x530   :  { %4575 = vrcp.f32 %v1040_v16 }
 0x531   :  { %v4566_v33 = vpop.eup %4565 }
 0x532   :  { %v674_v9 = vmul.f32 %v4566_v33, %v5201_v51  ;;  %v4568_v45 = vpop.eup %4567 }
 0x533   :  { %v1043_v32 = vpop.xlane.xlu1 %1042  ;;  %v504_v58 = vmul.f32 %v4568_v45, %v5184_v27 }
 0x534   :  { %3859 = vmatprep.mubr.msk.f32.mxu1 %vm58_vm0, %v674_v9  ;;  %4577 = vrcp.f32 %v1043_v32  ;;  %v4686_v32 = vld [vmem:[%s5969_s0 + $0x8] sm:$0xff] }
 0x535   :  { %v4570_v22 = vpop.eup %4569  ;;  %3860 = vmatmul.mubr.msk.f32.gmra.mrb[14].mxu1 %vm58_vm0, %v675_v46  ;;  %4579 = vrcp.f32 %v1046_v7 }
 0x536   :  { %3870 = vmatprep.mubr.msk.f32.mxu1 %vm58_vm0, %v503_v39  ;;  %v4572_v34 = vpop.eup %4571  ;;  %v505_v36 = vmul.f32 %v4570_v22, %v5209_v62  ;;  %v5295_v22 = vld [vmem:[%s5974_s5] sm:$0xff] }
 0x537   :  { %v506_v31 = vmul.f32 %v4572_v34, %v5199_v44  ;;  %v4687_v34 = vld [vmem:[%s5969_s0] sm:$0xff] }
 0x539   :  { %v4574_v23 = vpop.eup %4573  ;;  %3871 = vmatmul.mubr.msk.f32.vlgmr.msra.gmra.mrb[12].mxu1 %vm58_vm0, %v504_v58  ;;  %v1322_v35 = vpop.xlane.xlu1 %1321 }
 0x53a   :  { %v1319_v51 = vpop.xlane.xlu0 %1318  ;;  %3873 = vmatprep.mubr.msk.f32.mxu1 %vm58_vm0, %v505_v36  ;;  %v1051_v49 = vmul.f32 %v4574_v23, %v5219_v13  ;;  %v4576_v15 = vpop.eup %4575 }
 0x53b   :  { %4581 = vrcp.f32 %v1319_v51  ;;  %v1052_v16 = vmul.f32 %v4576_v15, %v5207_v1 }
 0x53c   :  { %4583 = vrcp.f32 %v1322_v35 }
 0x53d   :  { %3874 = vmatmul.mubr.msk.f32.gmra.mrb[14].mxu1 %vm58_vm0, %v506_v31  ;;  %v4434_v27 = vpop.permute.xlu1 %4433 }
 0x53e   :  { %v1328_v54 = vpop.xlane.xlu0 %1327  ;;  %3898 = vmatprep.mubr.msk.f32.mxu1 %vm58_vm0, %v1051_v49  ;;  %v4436_v5 = vunpack.i.h.bf16 %v4434_v27  ;;  %v4435_v6 = vunpack.i.l.bf16 %v4434_v27  ;;  %v4578_v29 = vpop.eup %4577 }
 0x53f   :  { %v4580_v41 = vpop.eup %4579  ;;  %v1053_v30 = vmul.f32 %v4578_v29, %v5227_v48 }
 0x540   :  { %v4180_v19 = vpack.c.bf16 %v4436_v5, %v4435_v6  ;;  %v1054_v33 = vmul.f32 %v4580_v41, %v5217_v11 }
 0x541   :  { %v4439_v62 = vpop.permute.xlu1 %4438 }
 0x542   :  { %v1325_v4 = vpop.xlane.xlu0 %1324  ;;  %v4441_v21 = vunpack.i.h.bf16 %v4439_v62  ;;  %v4440_v13 = vunpack.i.l.bf16 %v4439_v62 }
 0x543   :  { %4585 = vrcp.f32 %v1325_v4  ;;  %v4689_v4 = vld [vmem:[%s5969_s0 + $0x10] sm:$0xff] }
 0x544   :  { %v4196_v37 = vpack.c.bf16 %v4441_v21, %v4440_v13  ;;  %4587 = vrcp.f32 %v1328_v54  ;;  %v4688_v54 = vld [vmem:[%s5969_s0 + $0x18] sm:$0xff] }
 0x545   :  { %v4444_v24 = vpop.permute.xlu1 %4443  ;;  %v4582_v17 = vpop.eup %4581 }
 0x546   :  { %v4429_v53 = vpop.permute.xlu0 %4428  ;;  %v4446_v26 = vunpack.i.h.bf16 %v4444_v24  ;;  %v4445_v57 = vunpack.i.l.bf16 %v4444_v24  ;;  %v4584_v9 = vpop.eup %4583  ;;  %v1333_v46 = vmul.f32 %v4582_v17, %v5233_v43  ;;  %v1456_v43 = vsub.s32 2, %v4871_v55 }
 0x547   :  { %v4431_v10 = vunpack.i.h.bf16 %v4429_v53  ;;  %v4430_v12 = vunpack.i.l.bf16 %v4429_v53  ;;  %v1334_v1 = vmul.f32 %v4584_v9, %v5231_v52 }
 0x548   :  { %v4200_v7 = vpack.c.bf16 %v4446_v26, %v4445_v57  ;;  %v1457_v52 = vrot.slane %v5295_v22, %v1456_v43 }
 0x549   :  { %v4176_v44 = vpack.c.bf16 %v4431_v10, %v4430_v12 }
 0x54b   :  { %4177 = vmatprep.subr.bf16.mxu1 %v4176_v44 }
 0x54c   :  { %4179 = vmatpush3.bf16.msra.mxu1 %v4176_v44 }
 0x54d   :  { %4181 = vmatprep.subr.bf16.mxu1 %v4180_v19  ;;  %v4586_v45 = vpop.eup %4585 }
 0x54e   :  { %v4588_v48 = vpop.eup %4587  ;;  %v1335_v39 = vmul.f32 %v4586_v45, %v5244_v50 }
 0x54f   :  { %v1336_v11 = vmul.f32 %v4588_v48, %v5239_v61  ;;  %v46_v48 = vld [vmem:[%s5972_s3 + $0x10] sm:$0xff] }
 0x550   :  { %4183 = vmatpush3.bf16.msra.mxu1 %v4180_v19 }
 0x551   :  { %4197 = vmatprep.subr.bf16.mxu1 %v4196_v37 }
 0x553   :  { %3899 = vmatmul.mubr.msk.f32.vlgmr.msra.gmra.mrb[12].mxu1 %vm58_vm0, %v1052_v16 }
 0x554   :  { %3901 = vmatprep.mubr.msk.f32.mxu1 %vm58_vm0, %v1053_v30  ;;  %4199 = vmatpush3.bf16.msra.mxu1 %v4196_v37 }
 0x555   :  { %4201 = vmatprep.subr.bf16.mxu1 %v4200_v7 }
 0x557   :  { %3902 = vmatmul.mubr.msk.f32.gmra.mrb[14].mxu1 %vm58_vm0, %v1054_v33 }
 0x558   :  { %4203 = vmatpush3.bf16.msra.mxu1 %v4200_v7  ;;  %3926 = vmatprep.mubr.msk.f32.mxu1 %vm58_vm0, %v1333_v46 }
 0x55b   :  { %3927 = vmatmul.mubr.msk.f32.vlgmr.msra.gmra.mrb[12].mxu1 %vm58_vm0, %v1334_v1 }
 0x55c   :  { %3929 = vmatprep.mubr.msk.f32.mxu1 %vm58_vm0, %v1335_v39  ;;  %v49_v39 = vld [vmem:[%s5972_s3 + $0x28] sm:$0xff] }
 0x55f   :  { %3930 = vmatmul.mubr.msk.f32.gmra.mrb[14].mxu1 %vm58_vm0, %v1336_v11  ;;  %v4204_v11 = vpack.c.bf16 %v49_v39, %v46_v48 }
 0x561   :  { %4205 = vmatprep.subr.bf16.mxu1 %v4204_v11 }
 0x562   :  { %4207 = vmatpush3.bf16.msra.mxu1 %v4204_v11 }
 0x62e   :  { %v3928_v50 = vpop.f32.mrb[12].mxu1 }
 0x62f   :  { %v1451_v58 = vadd.f32 %v4686_v32, %v3928_v50  ;;  %v1427_v61 = vpop.f32.mrb[13].mxu1  ;;  %v55_v50 = vld [vmem:[%s5972_s3 + $0x58] sm:$0xff] }
 0x630   :  { %v1450_v36 = vadd.f32 %v4687_v34, %v1427_v61  ;;  %v1636_v61 = vld [vmem:[%s5973_s4 + $0x8] sm:$0xff]  ;;  %v1637_v34 = vld [vmem:[%s5973_s4 + $0x10] sm:$0xff] }
 0x631   :  { %v5306_v23 = vadd.f32 %v1457_v52, %v1451_v58  ;;  %v1635_v58 = vld [vmem:[%s5973_s4] sm:$0xff] }
 0x632   :  { %v5308_v35 = vadd.f32 %v1457_v52, %v1450_v36  ;;  %v3931_v51 = vpop.f32.mrb[14].mxu1  ;;  %v4212_v36 = vpack.c.bf16 %v1636_v61, %v1635_v58 }
 0x633   :  { %v1437_v31 = vpop.f32.mrb[15].mxu1  ;;  %v1465_v49 = vsel %vm58_vm0, %v5306_v23, 0.0  ;;  %v1453_v27 = vadd.f32 %v4688_v54, %v3931_v51  ;;  %v1638_v51 = vld [vmem:[%s5973_s4 + $0x18] sm:$0xff]  ;;  %v1640_v54 = vld [vmem:[%s5973_s4 + $0x28] sm:$0xff] }
 0x634   :  { %v1452_v62 = vadd.f32 %v4689_v4, %v1437_v31  ;;  %1466 = vadd.xlane.f32.xlu1 %v1465_v49  ;;  %v1462_v53 = vsel %vm58_vm0, %v5308_v35, 0.0  ;;  %v4216_v31 = vpack.c.bf16 %v1638_v51, %v1637_v34  ;;  %v1639_v49 = vld [vmem:[%s5973_s4 + $0x20] sm:$0xff]  ;;  %4213 = vmatprep.subr.bf16.mxu0 %v4212_v36 }
 0x635   :  { %1463 = vadd.xlane.f32.xlu0 %v1462_v53  ;;  %v5322_v6 = vadd.f32 %v1457_v52, %v1453_v27  ;;  %4215 = vmatpush3.bf16.msra.mxu0 %v4212_v36  ;;  %v4220_v27 = vpack.c.bf16 %v1640_v54, %v1639_v49  ;;  %v1642_v36 = vld [vmem:[%s5973_s4 + $0x38] sm:$0xff] }
 0x636   :  { %v5320_v5 = vadd.f32 %v1457_v52, %v1452_v62  ;;  %v52_v52 = vld [vmem:[%s5972_s3 + $0x40] sm:$0xff]  ;;  %4217 = vmatprep.subr.bf16.mxu0 %v4216_v31 }
 0x637   :  { %v1471_v12 = vsel %vm58_vm0, %v5322_v6, 0.0  ;;  %v4208_v32 = vpack.c.bf16 %v55_v50, %v52_v52 }
 0x638   :  { %v1468_v10 = vsel %vm58_vm0, %v5320_v5, 0.0 }
 0x639   :  { %1469 = vadd.xlane.f32.xlu0 %v1468_v10  ;;  %4209 = vmatprep.subr.bf16.mxu1 %v4208_v32 }
 0x63a   :  { %4211 = vmatpush3.bf16.msra.mxu1 %v4208_v32  ;;  %4219 = vmatpush3.bf16.msra.mxu0 %v4216_v31 }
 0x63b   :  { %4221 = vmatprep.subr.bf16.mxu0 %v4220_v27 }
 0x63d   :  { %1472 = vadd.xlane.f32.xlu0 %v1471_v12 }
 0x63e   :  { %4223 = vmatpush3.bf16.msra.mxu0 %v4220_v27 }
 0x6c1   :  { %v1467_v44 = vpop.xlane.xlu1 %1466 }
 0x6c2   :  { %v1475_v21 = vmul.f32 0.03125, %v1467_v44  ;;  %v1464_v13 = vpop.xlane.xlu0 %1463 }
 0x6c3   :  { %v1474_v19 = vmul.f32 0.03125, %v1464_v13 }
 0x6c4   :  { %v5329_v24 = vsub.f32 %v5306_v23, %v1475_v21 }
 0x6c5   :  { %v5332_v15 = vsub.f32 %v5308_v35, %v1474_v19 }
 0x6c6   :  { %v1470_v29 = vpop.xlane.xlu0 %1469  ;;  %v1483_v26 = vmul.f32 %v5329_v24, %v5329_v24 }
 0x6c7   :  { %v1476_v57 = vmul.f32 0.03125, %v1470_v29  ;;  %v1482_v37 = vmul.f32 %v5332_v15, %v5332_v15 }
 0x6c8   :  { %v1489_v16 = vsel %vm58_vm0, %v1483_v26, 0.0  ;;  %v1516_v26 = vsub.s32 6, %v4871_v55 }
 0x6c9   :  { %v5340_v41 = vsub.f32 %v5320_v5, %v1476_v57  ;;  %1490 = vadd.xlane.f32.xlu1 %v1489_v16  ;;  %v1486_v30 = vsel %vm58_vm0, %v1482_v37, 0.0  ;;  %v1524_v16 = vsub.s32 7, %v4871_v55 }
 0x6ca   :  { %1487 = vadd.xlane.f32.xlu0 %v1486_v30  ;;  %v1473_v17 = vpop.xlane.xlu0 %1472  ;;  %v1517_v30 = vrot.slane %v5295_v22, %v1516_v26 }
 0x6cb   :  { %v1477_v7 = vmul.f32 0.03125, %v1473_v17  ;;  %v1484_v33 = vmul.f32 %v5340_v41, %v5340_v41 }
 0x6cd   :  { %v5346_v9 = vsub.f32 %v5322_v6, %v1477_v7  ;;  %v1492_v46 = vsel %vm58_vm0, %v1484_v33, 0.0 }
 0x6ce   :  { %1493 = vadd.xlane.f32.xlu0 %v1492_v46 }
 0x6cf   :  { %v1485_v45 = vmul.f32 %v5346_v9, %v5346_v9 }
 0x6d1   :  { %v1495_v1 = vsel %vm58_vm0, %v1485_v45, 0.0  ;;  %v1525_v45 = vrot.slane %v5295_v22, %v1524_v16 }
 0x6d2   :  { %1496 = vadd.xlane.f32.xlu1 %v1495_v1 }
 0x756   :  { %v1491_v4 = vpop.xlane.xlu1 %1490 }
 0x757   :  { %v1499_v62 = vmul.f32 0.03125, %v1491_v4  ;;  %v1488_v53 = vpop.xlane.xlu0 %1487 }
 0x758   :  { %v1498_v10 = vmul.f32 0.03125, %v1488_v53 }
 0x759   :  { %v1503_v12 = vadd.f32 1e-05, %v1499_v62 }
 0x75a   :  { %v1502_v44 = vadd.f32 1e-05, %v1498_v10 }
 0x75b   :  { %4589 = vrsqrt.f32 %v1503_v12  ;;  %v1494_v21 = vpop.xlane.xlu0 %1493 }
 0x75c   :  { %4591 = vrsqrt.f32 %v1502_v44  ;;  %v1500_v13 = vmul.f32 0.03125, %v1494_v21 }
 0x75e   :  { %v1504_v19 = vadd.f32 1e-05, %v1500_v13 }
 0x75f   :  { %v1497_v29 = vpop.xlane.xlu1 %1496 }
 0x760   :  { %4593 = vrsqrt.f32 %v1504_v19  ;;  %v1501_v57 = vmul.f32 0.03125, %v1497_v29  ;;  %v1747_v29 = vsub.s32 3, %v4871_v55 }
 0x762   :  { %v1505_v37 = vadd.f32 1e-05, %v1501_v57  ;;  %v1748_v57 = vrot.slane %v5295_v22, %v1747_v29 }
 0x764   :  { %4595 = vrsqrt.f32 %v1505_v37 }
 0x765   :  { %v4590_v17 = vpop.eup %4589 }
 0x766   :  { %v4592_v7 = vpop.eup %4591  ;;  %v1511_v33 = vmul.f32 %v4590_v17, %v5329_v24 }
 0x767   :  { %v1510_v46 = vmul.f32 %v4592_v7, %v5332_v15 }
 0x768   :  { %v1519_v1 = vmul.f32 %v1517_v30, %v1511_v33 }
 0x769   :  { %v1518_v48 = vmul.f32 %v1517_v30, %v1510_v46 }
 0x76a   :  { %v4594_v39 = vpop.eup %4593  ;;  %v1527_v50 = vadd.f32 %v1525_v45, %v1519_v1 }
 0x76b   :  { %v1526_v11 = vadd.f32 %v1525_v45, %v1518_v48  ;;  %v1512_v52 = vmul.f32 %v4594_v39, %v5340_v41  ;;  %v1641_v41 = vld [vmem:[%s5973_s4 + $0x30] sm:$0xff] }
 0x76c   :  { %v4224_v51 = vpack.c.bf16 %v1642_v36, %v1641_v41 }
 0x76d   :  { %3940 = vmatprep.mubr.msk.f32.mxu1 %vm58_vm0, %v1526_v11  ;;  %v1520_v32 = vmul.f32 %v1517_v30, %v1512_v52 }
 0x76e   :  { %v4596_v58 = vpop.eup %4595  ;;  %3941 = vmatmul.mubr.msk.f32.vlgmr.msra.gmra.mrb[16].mxu1 %vm58_vm0, %v1527_v50  ;;  %4225 = vmatprep.subr.bf16.mxu0 %v4224_v51 }
 0x76f   :  { %v1528_v24 = vadd.f32 %v1525_v45, %v1520_v32  ;;  %v1513_v15 = vmul.f32 %v4596_v58, %v5346_v9  ;;  %4227 = vmatpush3.bf16.msra.mxu0 %v4224_v51  ;;  %v5406_v9 = vsub.s32 1, %v4871_v55 }
 0x771   :  { %3943 = vmatprep.mubr.msk.f32.mxu1 %vm58_vm0, %v1528_v24  ;;  %v1521_v61 = vmul.f32 %v1517_v30, %v1513_v15  ;;  %v1533_v31 = vrot.slane %v5295_v22, %v5406_v9 }
 0x773   :  { %v1529_v34 = vadd.f32 %v1525_v45, %v1521_v61 }
 0x775   :  { %3944 = vmatmul.mubr.msk.f32.gmra.mrb[18].mxu1 %vm58_vm0, %v1529_v34 }
 0x776   :  { %1921 = vmatprep.mubr.f32.mxu1 %v4723_v38 }
 0x841   :  { %v3942_v49 = vpop.f32.mrb[16].mxu1 }
 0x842   :  { %v1618_v54 = vadd.f32 %v3942_v49, %v1533_v31  ;;  %v1612_v27 = vpop.f32.mrb[17].mxu1 }
 0x843   :  { %v1613_v4 = vadd.f32 %v1612_v27, %v1533_v31 }
 0x844   :  { %v1632_v53 = vmax.f32 %v1618_v54, 0.0 }
 0x845   :  { %v1631_v62 = vmax.f32 %v1613_v4, 0.0 }
 0x847   :  { %3962 = vmatprep.mubr.msk.f32.mxu0 %vm1643_vm3, %v1631_v62 }
 0x848   :  { %v3945_v10 = vpop.f32.mrb[18].mxu1  ;;  %3963 = vmatmul.mubr.msk.f32.vlgmr.msra.gmra.mrb[12].mxu0 %vm1643_vm3, %v1632_v53 }
 0x849   :  { %v1628_v12 = vadd.f32 %v3945_v10, %v1533_v31  ;;  %v1622_v44 = vpop.f32.mrb[19].mxu1 }
 0x84a   :  { %v1623_v21 = vadd.f32 %v1622_v44, %v1533_v31  ;;  %v3571_v44 = vld [vmem:[%s5972_s3 + $0x68] sm:$0xff] }
 0x84b   :  { %v1634_v19 = vmax.f32 %v1628_v12, 0.0 }
 0x84c   :  { %v1633_v13 = vmax.f32 %v1623_v21, 0.0  ;;  %v3574_v21 = vld [vmem:[%s5972_s3 + $0x80] sm:$0xff] }
 0x84e   :  { %3965 = vmatprep.mubr.msk.f32.mxu0 %vm1643_vm3, %v1633_v13  ;;  %v4228_v13 = vpack.c.bf16 %v3574_v21, %v3571_v44 }
 0x84f   :  { %3966 = vmatmul.mubr.msk.f32.gmra.mrb[14].mxu0 %vm1643_vm3, %v1634_v19  ;;  %v3570_v19 = vld [vmem:[%s5972_s3 + $0x60] sm:$0xff] }
 0x850   :  { %4229 = vmatprep.subr.bf16.mxu1 %v4228_v13 }
 0x91b   :  { %v3964_v37 = vpop.f32.mrb[12].mxu0 }
 0x91c   :  { %v1742_v30 = vadd.f32 %v3964_v37, %v5306_v23  ;;  %v1722_v17 = vpop.f32.mrb[13].mxu0 }
 0x91d   :  { %v1741_v7 = vadd.f32 %v1722_v17, %v5308_v35  ;;  %v3580_v17 = vld [vmem:[%s5972_s3 + $0xb0] sm:$0xff] }
 0x91e   :  { %v5420_v33 = vadd.f32 %v1748_v57, %v1742_v30  ;;  %v3577_v30 = vld [vmem:[%s5972_s3 + $0x98] sm:$0xff] }
 0x91f   :  { %v5422_v46 = vadd.f32 %v1748_v57, %v1741_v7  ;;  %v4232_v7 = vpack.c.bf16 %v3580_v17, %v3577_v30 }
 0x920   :  { %v1772_v45 = vsel %vm58_vm0, %v5420_v33, 0.0 }
 0x921   :  { %1773 = vadd.xlane.f32.xlu1 %v1772_v45  ;;  %v1769_v1 = vsel %vm58_vm0, %v5422_v46, 0.0  ;;  %v3576_v45 = vld [vmem:[%s5972_s3 + $0x90] sm:$0xff] }
 0x922   :  { %1770 = vadd.xlane.f32.xlu0 %v1769_v1  ;;  %v3967_v48 = vpop.f32.mrb[14].mxu0  ;;  %v3579_v1 = vld [vmem:[%s5972_s3 + $0xa8] sm:$0xff] }
 0x923   :  { %v1744_v22 = vadd.f32 %v3967_v48, %v5322_v6  ;;  %v1732_v39 = vpop.f32.mrb[15].mxu0  ;;  %v4234_v48 = vpack.c.bf16 %v3579_v1, %v3576_v45 }
 0x924   :  { %v1743_v23 = vadd.f32 %v1732_v39, %v5320_v5 }
 0x925   :  { %v5430_v11 = vadd.f32 %v1748_v57, %v1744_v22 }
 0x926   :  { %v5432_v35 = vadd.f32 %v1748_v57, %v1743_v23  ;;  %v3573_v57 = vld [vmem:[%s5972_s3 + $0x78] sm:$0xff] }
 0x927   :  { %v1778_v52 = vsel %vm58_vm0, %v5430_v11, 0.0  ;;  %v4230_v37 = vpack.c.bf16 %v3573_v57, %v3570_v19 }
 0x928   :  { %1779 = vadd.xlane.f32.xlu1 %v1778_v52  ;;  %v1775_v50 = vsel %vm58_vm0, %v5432_v35, 0.0 }
 0x929   :  { %1776 = vadd.xlane.f32.xlu0 %v1775_v50  ;;  %4231 = vmatpush1.bf16.msra.mxu1 %v4230_v37 }
 0x92a   :  { %4233 = vmatprep.subr.bf16.mxu1 %v4232_v7 }
 0x92d   :  { %4235 = vmatpush1.bf16.msra.mxu1 %v4234_v48 }
 0x9ae   :  { %v1774_v32 = vpop.xlane.xlu1 %1773 }
 0x9af   :  { %v1782_v58 = vmul.f32 0.03125, %v1774_v32  ;;  %v1771_v24 = vpop.xlane.xlu0 %1770 }
 0x9b0   :  { %v1781_v15 = vmul.f32 0.03125, %v1771_v24 }
 0x9b1   :  { %v1786_v6 = vsub.f32 %v5420_v33, %v1782_v58 }
 0x9b2   :  { %v1785_v5 = vsub.f32 %v5422_v46, %v1781_v15 }
 0x9b3   :  { %v1790_v61 = vmul.f32 %v1786_v6, %v1786_v6 }
 0x9b4   :  { %v1789_v34 = vmul.f32 %v1785_v5, %v1785_v5 }
 0x9b5   :  { %v1780_v41 = vpop.xlane.xlu1 %1779  ;;  %v1796_v36 = vsel %vm58_vm0, %v1790_v61, 0.0 }
 0x9b6   :  { %v1784_v51 = vmul.f32 0.03125, %v1780_v41  ;;  %1797 = vadd.xlane.f32.xlu1 %v1796_v36  ;;  %v1777_v31 = vpop.xlane.xlu0 %1776  ;;  %v1793_v49 = vsel %vm58_vm0, %v1789_v34, 0.0  ;;  %v3582_v41 = vld [vmem:[%s5974_s5 + $0x10] sm:$0xff] }
 0x9b7   :  { %v1783_v54 = vmul.f32 0.03125, %v1777_v31  ;;  %1794 = vadd.xlane.f32.xlu0 %v1793_v49 }
 0x9b8   :  { %v1788_v27 = vsub.f32 %v5430_v11, %v1784_v51  ;;  %v1824_v51 = vrot.slane %v3582_v41, %v114_v60 }
 0x9b9   :  { %v1787_v4 = vsub.f32 %v5432_v35, %v1783_v54  ;;  %v1832_v54 = vrot.slane %v3582_v41, %v122_v63 }
 0x9ba   :  { %v1792_v62 = vmul.f32 %v1788_v27, %v1788_v27 }
 0x9bb   :  { %v1791_v53 = vmul.f32 %v1787_v4, %v1787_v4 }
 0x9bc   :  { %v1802_v10 = vsel %vm58_vm0, %v1792_v62, 0.0 }
 0x9bd   :  { %1803 = vadd.xlane.f32.xlu1 %v1802_v10  ;;  %v1799_v12 = vsel %vm58_vm0, %v1791_v53, 0.0 }
 0x9be   :  { %1800 = vadd.xlane.f32.xlu0 %v1799_v12 }
 0xa43   :  { %v1798_v22 = vpop.xlane.xlu1 %1797 }
 0xa44   :  { %v1806_v39 = vmul.f32 0.03125, %v1798_v22  ;;  %v1795_v23 = vpop.xlane.xlu0 %1794 }
 0xa45   :  { %v1805_v52 = vmul.f32 0.03125, %v1795_v23 }
 0xa46   :  { %v1810_v50 = vadd.f32 1e-05, %v1806_v39 }
 0xa47   :  { %v1809_v32 = vadd.f32 1e-05, %v1805_v52 }
 0xa48   :  { %4597 = vrsqrt.f32 %v1810_v50 }
 0xa49   :  { %4599 = vrsqrt.f32 %v1809_v32 }
 0xa4a   :  { %v1804_v58 = vpop.xlane.xlu1 %1803 }
 0xa4b   :  { %v1808_v24 = vmul.f32 0.03125, %v1804_v58  ;;  %v1801_v15 = vpop.xlane.xlu0 %1800 }
 0xa4c   :  { %v1807_v61 = vmul.f32 0.03125, %v1801_v15 }
 0xa4d   :  { %v1812_v34 = vadd.f32 1e-05, %v1808_v24 }
 0xa4e   :  { %v1811_v36 = vadd.f32 1e-05, %v1807_v61 }
 0xa4f   :  { %4601 = vrsqrt.f32 %v1812_v34 }
 0xa50   :  { %4603 = vrsqrt.f32 %v1811_v36 }
 0xa52   :  { %v4598_v31 = vpop.eup %4597 }
 0xa53   :  { %v4600_v49 = vpop.eup %4599  ;;  %v1818_v62 = vmul.f32 %v4598_v31, %v1786_v6  ;;  %v1840_v6 = vrot.slane %v3582_v41, %v4894_v18 }
 0xa54   :  { %v1817_v53 = vmul.f32 %v4600_v49, %v1785_v5  ;;  %v3583_v5 = vld [vmem:[%s5974_s5 + $0x18] sm:$0xff] }
 0xa55   :  { %v1826_v10 = vmul.f32 %v1824_v51, %v1818_v62  ;;  %v1844_v45 = vrot.slane %v3583_v5, %v4894_v18  ;;  %v4691_v5 = vld [vmem:[%s5971_s2 + $0x10] sm:$0xff] }
 0xa56   :  { %v1825_v12 = vmul.f32 %v1824_v51, %v1817_v53 }
 0xa57   :  { %v1834_v44 = vadd.f32 %v1832_v54, %v1826_v10 }
 0xa58   :  { %v1833_v21 = vadd.f32 %v1832_v54, %v1825_v12 }
 0xa59   :  { %v4602_v13 = vpop.eup %4601 }
 0xa5a   :  { %v4604_v19 = vpop.eup %4603  ;;  %3584 = vmatmul.mubr.msk.f32.vlgmr.msra.gmra.mrb[20].mxu1 %vm58_vm0, %v1833_v21  ;;  %v1820_v57 = vmul.f32 %v4602_v13, %v1788_v27 }
 0xa5b   :  { %1927 = vmatprep.mubr.f32.mxu1 %v4723_v38  ;;  %v1819_v37 = vmul.f32 %v4604_v19, %v1787_v4 }
 0xa5c   :  { %v1828_v60 = vmul.f32 %v1824_v51, %v1820_v57 }
 0xa5d   :  { %v1827_v30 = vmul.f32 %v1824_v51, %v1819_v37 }
 0xa5e   :  { %3585 = vmatmul.mubr.msk.f32.gmra.mrb[22].mxu1 %vm58_vm0, %v1834_v44  ;;  %v1836_v17 = vadd.f32 %v1832_v54, %v1828_v60 }
 0xa5f   :  { %1933 = vmatprep.mubr.f32.mxu1 %v4723_v38  ;;  %v1835_v63 = vadd.f32 %v1832_v54, %v1827_v30 }
 0xa62   :  { %3586 = vmatmul.mubr.msk.f32.gmra.mrb[24].mxu1 %vm58_vm0, %v1835_v63 }
 0xa63   :  { %1939 = vmatprep.mubr.f32.mxu1 %v4723_v38 }
 0xa66   :  { %3587 = vmatmul.mubr.msk.f32.gmra.mrb[26].mxu1 %vm58_vm0, %v1836_v17 }
 0xb2d   :  { %v1923_v27 = vpop.f32.mrb[20].mxu1 }
 0xb2e   :  { %v1924_v4 = vadd.f32 %v1923_v27, %v1840_v6  ;;  %v1925_v7 = vpop.f32.mrb[21].mxu1 }
 0xb2f   :  { %v1926_v38 = vadd.f32 %v1925_v7, %v1844_v45 }
 0xb30   :  { %v1978_v1 = vmul.f32 %v1924_v4, %v4904_v25  ;;  %v1950_v50 = vmul.f32 %v1924_v4, %v4936_v47  ;;  %v1974_v53 = vmul.f32 %v1924_v4, %v4963_v2 }
 0xb31   :  { %v1929_v48 = vpop.f32.mrb[22].mxu1 }
 0xb32   :  { %v1930_v22 = vadd.f32 %v1929_v48, %v1840_v6  ;;  %v1931_v39 = vpop.f32.mrb[23].mxu1  ;;  %1986 = vrot.lane.b32.xlu0 %v1978_v1, %s4724_s29  ;;  %v4693_v1 = vld [vmem:[%s5971_s2 + $0x18] sm:$0xff] }
 0xb33   :  { %v1932_v23 = vadd.f32 %v1931_v39, %v1844_v45 }
 0xb34   :  { %v1979_v52 = vmul.f32 %v1930_v22, %v4897_v20  ;;  %v1975_v10 = vmul.f32 %v1930_v22, %v4965_v3 }
 0xb35   :  { %v1935_v32 = vpop.f32.mrb[24].mxu1  ;;  %v5493_v58 = vpack.i.bf16 %v1932_v23, %v1926_v38  ;;  %v5495_v24 = vpack.c.bf16 %v1932_v23, %v1926_v38 }
 0xb36   :  { %v1936_v15 = vadd.f32 %v1935_v32, %v1840_v6  ;;  %1988 = vrot.lane.b32.xlu1 %v1979_v52, %s4724_s29  ;;  %1958 = vrot.lane.b32.xlu0 %v1950_v50, %s4724_s29  ;;  %v1937_v25 = vpop.f32.mrb[25].mxu1 }
 0xb37   :  { %v1938_v47 = vadd.f32 %v1937_v25, %v1844_v45 }
 0xb38   :  { %v1980_v61 = vmul.f32 %v1936_v15, %v4909_v28  ;;  %v1952_v34 = vmul.f32 %v1936_v15, %v4952_v59  ;;  %v1951_v28 = vmul.f32 %v1930_v22, %v4944_v56  ;;  %v1976_v2 = vmul.f32 %v1936_v15, %v4971_v8  ;;  %v4692_v8 = vld [vmem:[%s5971_s2 + $0x8] sm:$0xff] }
 0xb39   :  { %v1941_v41 = vpop.f32.mrb[26].mxu1  ;;  %v1948_v27 = vmul.f32 %v4691_v5, %v1936_v15 }
 0xb3a   :  { %v1942_v36 = vadd.f32 %v1941_v41, %v1840_v6  ;;  %v1943_v20 = vpop.f32.mrb[27].mxu1  ;;  %1990 = vrot.lane.b32.xlu1 %v1980_v61, %s4724_s29  ;;  %1962 = vrot.lane.b32.xlu0 %v1952_v34, %s4724_s29 }
 0xb3b   :  { %v1944_v51 = vadd.f32 %v1943_v20, %v1844_v45 }
 0xb3c   :  { %v1981_v31 = vmul.f32 %v1942_v36, %v4928_v42  ;;  %v1953_v59 = vmul.f32 %v1942_v36, %v4959_v0  ;;  %v4690_v42 = vld [vmem:[%s5971_s2] sm:$0xff]  ;;  %v1977_v3 = vmul.f32 %v1942_v36, %v4973_v14  ;;  %v1947_v14 = vmul.f32 %v4692_v8, %v1930_v22 }
 0xb3d   :  { %v5504_v49 = vpack.i.bf16 %v1944_v51, %v1938_v47  ;;  %v5506_v54 = vpack.c.bf16 %v1944_v51, %v1938_v47  ;;  %v1946_v12 = vmul.f32 %v4690_v42, %v1924_v4  ;;  %v1949_v48 = vmul.f32 %v4693_v1, %v1942_v36 }
 0xb3e   :  { %1992 = vrot.lane.b32.xlu1 %v1981_v31, %s4724_s29 }
 0xb42   :  { %1960 = vrot.lane.b32.xlu1 %v1951_v28, %s4724_s29 }
 0xb46   :  { %1964 = vrot.lane.b32.xlu1 %v1953_v59, %s4724_s29 }
 0xba4   :  { %v1987_v62 = vpop.permute.xlu0 %1986 }
 0xba5   :  { %v1998_v13 = vadd.f32 %v1987_v62, %v1974_v53 }
 0xba8   :  { %v1989_v44 = vpop.permute.xlu1 %1988  ;;  %v1959_v21 = vpop.permute.xlu0 %1958 }
 0xba9   :  { %v1999_v56 = vadd.f32 %v1989_v44, %v1975_v10  ;;  %v1970_v19 = vadd.f32 %v1959_v21, %v1946_v12 }
 0xbab   :  { %3976 = vmatprep.mubr.msk.f32.mxu1 %vm349_vm1, %v1970_v19  ;;  %v4447_v0 = vpack.i.bf16 %v1999_v56, %v1998_v13 }
 0xbac   :  { %v1991_v57 = vpop.permute.xlu1 %1990  ;;  %v1963_v63 = vpop.permute.xlu0 %1962 }
 0xbad   :  { %4448 = vrot.lane.b32.xlu0 %v4447_v0, %s4727_s25  ;;  %v2000_v60 = vadd.f32 %v1991_v57, %v1976_v2  ;;  %v5533_v4 = vadd.f32 %v1963_v63, %v1948_v27 }
 0xbb0   :  { %v1993_v37 = vpop.permute.xlu1 %1992 }
 0xbb1   :  { %v2001_v30 = vadd.f32 %v1993_v37, %v1977_v3  ;;  %4458 = vrot.lane.b32.xlu0 %v4447_v0, %s4726_s14 }
 0xbb3   :  { %v4452_v17 = vpack.i.bf16 %v2001_v30, %v2000_v60 }
 0xbb4   :  { %v1961_v6 = vpop.permute.xlu1 %1960 }
 0xbb5   :  { %4453 = vrot.lane.b32.xlu1 %v4452_v17, %s4727_s25  ;;  %2171 = vrot.lane.b32.xlu0 %v1970_v19, %s4728_s26  ;;  %v5535_v7 = vadd.f32 %v1961_v6, %v1947_v14 }
 0xbb8   :  { %v1965_v45 = vpop.permute.xlu1 %1964 }
 0xbb9   :  { %4463 = vrot.lane.b32.xlu1 %v4447_v0, %s4729_s27  ;;  %4468 = vrot.lane.b32.xlu0 %v4452_v17, %s4726_s14  ;;  %v1973_v22 = vadd.f32 %v1965_v45, %v1949_v48 }
 0xbbd   :  { %2173 = vrot.lane.b32.xlu1 %v5535_v7, %s4728_s26  ;;  %2175 = vrot.lane.b32.xlu0 %v5533_v4, %s4728_s26 }
 0xbc1   :  { %4473 = vrot.lane.b32.xlu1 %v4452_v17, %s4729_s27  ;;  %4478 = vrot.lane.b32.xlu0 %v4447_v0, %s4730_s28 }
 0xbc5   :  { %2177 = vrot.lane.b32.xlu1 %v1973_v22, %s4728_s26  ;;  %2552 = vrot.lane.b32.xlu0 %v5535_v7, %s4731_s30 }
 0xbc9   :  { %2550 = vrot.lane.b32.xlu1 %v1970_v19, %s4731_s30  ;;  %2554 = vrot.lane.b32.xlu0 %v5533_v4, %s4731_s30 }
 0xbcd   :  { %4483 = vrot.lane.b32.xlu1 %v4452_v17, %s4730_s28  ;;  %2832 = vrot.lane.b32.xlu0 %v1970_v19, %s4732_s8 }
 0xbd1   :  { %2556 = vrot.lane.b32.xlu1 %v1973_v22, %s4731_s30  ;;  %2836 = vrot.lane.b32.xlu0 %v5533_v4, %s4732_s8 }
 0xbd5   :  { %2834 = vrot.lane.b32.xlu1 %v5535_v7, %s4732_s8 }
 0xbd9   :  { %2838 = vrot.lane.b32.xlu1 %v1973_v22, %s4732_s8 }
 0xc1f   :  { %v4449_v39 = vpop.permute.xlu0 %4448 }
 0xc20   :  { %v4451_v38 = vunpack.i.h.bf16 %v4449_v39  ;;  %v4450_v23 = vunpack.i.l.bf16 %v4449_v39  ;;  %v5612_v39 = vld [vmem:[%s5970_s1 + $0x8] sm:$0xff] }
 0xc22   :  { %v4248_v52 = vpack.c.bf16 %v4451_v38, %v4450_v23  ;;  %v5620_v38 = vld [vmem:[%s5970_s1] sm:$0xff] }
 0xc23   :  { %v4459_v50 = vpop.permute.xlu0 %4458 }
 0xc24   :  { %v4461_v32 = vunpack.i.h.bf16 %v4459_v50  ;;  %v4460_v15 = vunpack.i.l.bf16 %v4459_v50  ;;  %4250 = vmatprep.subr.msk.bf16.mxu0 %vm5021_vm2, %v4248_v52 }
 0xc25   :  { %4253 = vmatpush3.bf16.xpose.msk.msra.mxu0 %vm5021_vm2, %v4248_v52 }
 0xc26   :  { %v4236_v25 = vpack.c.bf16 %v4461_v32, %v4460_v15 }
 0xc27   :  { %v4454_v61 = vpop.permute.xlu1 %4453  ;;  %v2172_v34 = vpop.permute.xlu0 %2171 }
 0xc28   :  { %v4456_v41 = vunpack.i.h.bf16 %v4454_v61  ;;  %v4455_v36 = vunpack.i.l.bf16 %v4454_v61  ;;  %4238 = vmatprep.subr.msk.bf16.mxu1 %vm5021_vm2, %v4236_v25  ;;  %3990 = vmatprep.mubr.msk.f32.mxu0 %vm349_vm1, %v2172_v34 }
 0xc29   :  { %4241 = vmatpush3.bf16.xpose.msk.msra.mxu1 %vm5021_vm2, %v4236_v25 }
 0xc2a   :  { %v4254_v20 = vpack.c.bf16 %v4456_v41, %v4455_v36 }
 0xc2b   :  { %v4464_v47 = vpop.permute.xlu1 %4463  ;;  %v4469_v51 = vpop.permute.xlu0 %4468 }
 0xc2c   :  { %v4466_v31 = vunpack.i.h.bf16 %v4464_v47  ;;  %v4465_v28 = vunpack.i.l.bf16 %v4464_v47  ;;  %v4471_v59 = vunpack.i.h.bf16 %v4469_v51  ;;  %v4470_v62 = vunpack.i.l.bf16 %v4469_v51  ;;  %4256 = vmatprep.subr.msk.bf16.mxu0 %vm5021_vm2, %v4254_v20 }
 0xc2d   :  { %4259 = vmatpush3.bf16.xpose.msk.msra.mxu0 %vm5021_vm2, %v4254_v20 }
 0xc2e   :  { %v4276_v53 = vpack.c.bf16 %v4466_v31, %v4465_v28  ;;  %v4242_v10 = vpack.c.bf16 %v4471_v59, %v4470_v62  ;;  %v4696_v62 = vld [vmem:[%s5970_s1 + $0x18] sm:$0xff] }
 0xc2f   :  { %v2174_v42 = vpop.permute.xlu1 %2173  ;;  %v2176_v12 = vpop.permute.xlu0 %2175 }
 0xc30   :  { %4244 = vmatprep.subr.msk.bf16.mxu1 %vm5021_vm2, %v4242_v10  ;;  %4278 = vmatprep.subr.msk.bf16.mxu0 %vm5021_vm2, %v4276_v53 }
 0xc31   :  { %4247 = vmatpush3.bf16.xpose.msk.msra.mxu1 %vm5021_vm2, %v4242_v10 }
 0xc33   :  { %v4474_v44 = vpop.permute.xlu1 %4473  ;;  %v4479_v56 = vpop.permute.xlu0 %4478 }
 0xc34   :  { %v4476_v21 = vunpack.i.h.bf16 %v4474_v44  ;;  %v4475_v13 = vunpack.i.l.bf16 %v4474_v44  ;;  %3991 = vmatmul.mubr.msk.f32.vlgmr.msra.gmra.mrb[16].mxu0 %vm349_vm1, %v2174_v42  ;;  %v4481_v57 = vunpack.i.h.bf16 %v4479_v56  ;;  %v4480_v2 = vunpack.i.l.bf16 %v4479_v56 }
 0xc35   :  { %3993 = vmatprep.mubr.msk.f32.mxu0 %vm349_vm1, %v2176_v12  ;;  %4281 = vmatpush3.bf16.xpose.msk.msra.mxu0 %vm5021_vm2, %v4276_v53 }
 0xc36   :  { %v4282_v19 = vpack.c.bf16 %v4476_v21, %v4475_v13  ;;  %v4296_v37 = vpack.c.bf16 %v4481_v57, %v4480_v2  ;;  %v4697_v21 = vld [vmem:[%s5970_s1 + $0x10] sm:$0xff] }
 0xc37   :  { %v2178_v0 = vpop.permute.xlu1 %2177  ;;  %v2553_v60 = vpop.permute.xlu0 %2552 }
 0xc38   :  { %3977 = vmatmul.mubr.msk.f32.vlgmr.msra.gmra.mrb[28].mxu1 %vm349_vm1, %v5535_v7  ;;  %3994 = vmatmul.mubr.msk.f32.gmra.mrb[18].mxu0 %vm349_vm1, %v2178_v0 }
 0xc39   :  { %4284 = vmatprep.subr.msk.bf16.mxu0 %vm5021_vm2, %v4282_v19  ;;  %3979 = vmatprep.mubr.msk.f32.mxu1 %vm349_vm1, %v5533_v4 }
 0xc3b   :  { %v2551_v3 = vpop.permute.xlu1 %2550  ;;  %v2555_v6 = vpop.permute.xlu0 %2554 }
 0xc3c   :  { %3980 = vmatmul.mubr.msk.f32.gmra.mrb[30].mxu1 %vm349_vm1, %v1973_v22  ;;  %4032 = vmatprep.mubr.msk.f32.mxu0 %vm349_vm1, %v2551_v3 }
 0xc3d   :  { %4287 = vmatpush3.bf16.xpose.msk.msra.mxu0 %vm5021_vm2, %v4282_v19 }
 0xc3e   :  { %4298 = vmatprep.subr.msk.bf16.mxu0 %vm5021_vm2, %v4296_v37 }
 0xc3f   :  { %v4484_v30 = vpop.permute.xlu1 %4483  ;;  %v2833_v8 = vpop.permute.xlu0 %2832 }
 0xc40   :  { %v4486_v17 = vunpack.i.h.bf16 %v4484_v30  ;;  %v4485_v63 = vunpack.i.l.bf16 %v4484_v30 }
 0xc42   :  { %v4302_v5 = vpack.c.bf16 %v4486_v17, %v4485_v63 }
 0xc43   :  { %v2557_v27 = vpop.permute.xlu1 %2556  ;;  %v2837_v4 = vpop.permute.xlu0 %2836 }
 0xc44   :  { %4033 = vmatmul.mubr.msk.f32.vlgmr.msra.gmra.mrb[20].mxu0 %vm349_vm1, %v2553_v60 }
 0xc45   :  { %4035 = vmatprep.mubr.msk.f32.mxu0 %vm349_vm1, %v2555_v6  ;;  %4301 = vmatpush3.bf16.xpose.msk.msra.mxu0 %vm5021_vm2, %v4296_v37 }
 0xc46   :  { %4304 = vmatprep.subr.msk.bf16.mxu0 %vm5021_vm2, %v4302_v5 }
 0xc47   :  { %v2835_v14 = vpop.permute.xlu1 %2834 }
 0xc48   :  { %4036 = vmatmul.mubr.msk.f32.gmra.mrb[22].mxu0 %vm349_vm1, %v2557_v27 }
 0xc49   :  { %4060 = vmatprep.mubr.msk.f32.mxu0 %vm349_vm1, %v2833_v8 }
 0xc4b   :  { %v2839_v7 = vpop.permute.xlu1 %2838 }
 0xc4d   :  { %4307 = vmatpush3.bf16.xpose.msk.msra.mxu0 %vm5021_vm2, %v4302_v5 }
 0xc54   :  { %4061 = vmatmul.mubr.msk.f32.vlgmr.msra.gmra.mrb[24].mxu0 %vm349_vm1, %v2835_v14 }
 0xc55   :  { %4063 = vmatprep.mubr.msk.f32.mxu0 %vm349_vm1, %v2837_v4 }
 0xc58   :  { %4064 = vmatmul.mubr.msk.f32.gmra.mrb[26].mxu0 %vm349_vm1, %v2839_v7 }
 0xd07   :  { %v3992_v45 = vpop.f32.mrb[16].mxu0 }
 0xd08   :  { %v2289_v1 = vmul.f32 0.35355338, %v3992_v45  ;;  %v2269_v48 = vpop.f32.mrb[17].mxu0 }
 0xd09   :  { %v2288_v22 = vmul.f32 0.35355338, %v2269_v48 }
 0xd0a   :  { %v5615_v40 = vadd.f32 %v5612_v39, %v2289_v1 }
 0xd0b   :  { %v5623_v23 = vadd.f32 %v5620_v38, %v2288_v22  ;;  %v3978_v52 = vpop.f32.mrb[28].mxu1  ;;  %v3995_v50 = vpop.f32.mrb[18].mxu0 }
 0xd0c   :  { %v2120_v32 = vmul.f32 0.35355338, %v3978_v52  ;;  %v2100_v15 = vpop.f32.mrb[29].mxu1  ;;  %v2279_v25 = vpop.f32.mrb[19].mxu0  ;;  %v2291_v61 = vmul.f32 0.35355338, %v3995_v50 }
 0xd0d   :  { %v2119_v34 = vmul.f32 0.35355338, %v2100_v15  ;;  %v2299_v41 = vsel %vm58_vm0, %v5615_v40, -inf  ;;  %v2296_v36 = vsel %vm58_vm0, %v5623_v23, -inf  ;;  %v2290_v10 = vmul.f32 0.35355338, %v2279_v25 }
 0xd0e   :  { %v5630_v20 = vadd.f32 %v5612_v39, %v2120_v32  ;;  %2300 = vmax.xlane.f32.xlu1 %v2299_v41  ;;  %2297 = vmax.xlane.f32.xlu0 %v2296_v36  ;;  %v5640_v53 = vadd.f32 %v4696_v62, %v2291_v61 }
 0xd0f   :  { %v5633_v47 = vadd.f32 %v5620_v38, %v2119_v34  ;;  %v3981_v51 = vpop.f32.mrb[30].mxu1  ;;  %v5651_v13 = vadd.f32 %v4697_v21, %v2290_v10 }
 0xd10   :  { %v2122_v31 = vmul.f32 0.35355338, %v3981_v51  ;;  %v2110_v28 = vpop.f32.mrb[31].mxu1  ;;  %v2130_v59 = vsel %vm58_vm0, %v5630_v20, -inf  ;;  %v2305_v19 = vsel %vm58_vm0, %v5640_v53, -inf }
 0xd11   :  { %v2127_v42 = vsel %vm58_vm0, %v5633_v47, -inf  ;;  %v2121_v56 = vmul.f32 0.35355338, %v2110_v28  ;;  %v2302_v60 = vsel %vm58_vm0, %v5651_v13, -inf }
 0xd12   :  { %v5644_v12 = vadd.f32 %v4696_v62, %v2122_v31  ;;  %2131 = vmax.xlane.f32.xlu1 %v2130_v59  ;;  %2128 = vmax.xlane.f32.xlu0 %v2127_v42 }
 0xd13   :  { %v5655_v3 = vadd.f32 %v4697_v21, %v2121_v56 }
 0xd14   :  { %v2136_v44 = vsel %vm58_vm0, %v5644_v12, -inf }
 0xd15   :  { %v2133_v14 = vsel %vm58_vm0, %v5655_v3, -inf }
 0xd16   :  { %2137 = vmax.xlane.f32.xlu1 %v2136_v44  ;;  %2306 = vmax.xlane.f32.xlu0 %v2305_v19 }
 0xd17   :  { %v4034_v0 = vpop.f32.mrb[20].mxu0 }
 0xd18   :  { %v2668_v57 = vmul.f32 0.35355338, %v4034_v0  ;;  %v2648_v2 = vpop.f32.mrb[21].mxu0 }
 0xd19   :  { %v2667_v37 = vmul.f32 0.35355338, %v2648_v2 }
 0xd1a   :  { %v5660_v30 = vadd.f32 %v5612_v39, %v2668_v57  ;;  %2303 = vmax.xlane.f32.xlu0 %v2302_v60 }
 0xd1b   :  { %v4037_v17 = vpop.f32.mrb[22].mxu0  ;;  %v5665_v27 = vadd.f32 %v5620_v38, %v2667_v37 }
 0xd1c   :  { %v2670_v63 = vmul.f32 0.35355338, %v4037_v17  ;;  %v2658_v6 = vpop.f32.mrb[23].mxu0  ;;  %v2678_v5 = vsel %vm58_vm0, %v5660_v30, -inf }
 0xd1d   :  { %v2669_v8 = vmul.f32 0.35355338, %v2658_v6  ;;  %2679 = vmax.xlane.f32.xlu1 %v2678_v5  ;;  %v2675_v1 = vsel %vm58_vm0, %v5665_v27, -inf }
 0xd1e   :  { %v5669_v4 = vadd.f32 %v4696_v62, %v2670_v63  ;;  %2134 = vmax.xlane.f32.xlu0 %v2133_v14 }
 0xd1f   :  { %v5673_v45 = vadd.f32 %v4697_v21, %v2669_v8 }
 0xd20   :  { %v2684_v7 = vsel %vm58_vm0, %v5669_v4, -inf }
 0xd21   :  { %2685 = vmax.xlane.f32.xlu1 %v2684_v7  ;;  %v2681_v48 = vsel %vm58_vm0, %v5673_v45, -inf }
 0xd22   :  { %2676 = vmax.xlane.f32.xlu0 %v2675_v1 }
 0xd26   :  { %2682 = vmax.xlane.f32.xlu0 %v2681_v48 }
 0xd27   :  { %v4062_v22 = vpop.f32.mrb[24].mxu0 }
 0xd28   :  { %v2950_v52 = vmul.f32 0.35355338, %v4062_v22  ;;  %v2930_v50 = vpop.f32.mrb[25].mxu0 }
 0xd29   :  { %v2949_v32 = vmul.f32 0.35355338, %v2930_v50 }
 0xd2a   :  { %v5680_v15 = vadd.f32 %v5612_v39, %v2950_v52 }
 0xd2b   :  { %v5683_v25 = vadd.f32 %v5620_v38, %v2949_v32  ;;  %v4065_v61 = vpop.f32.mrb[26].mxu0 }
 0xd2c   :  { %v2952_v34 = vmul.f32 0.35355338, %v4065_v61  ;;  %v2940_v41 = vpop.f32.mrb[27].mxu0  ;;  %v2960_v36 = vsel %vm58_vm0, %v5680_v15, -inf }
 0xd2d   :  { %v2951_v51 = vmul.f32 0.35355338, %v2940_v41  ;;  %2961 = vmax.xlane.f32.xlu1 %v2960_v36  ;;  %v2957_v31 = vsel %vm58_vm0, %v5683_v25, -inf }
 0xd2e   :  { %v5689_v28 = vadd.f32 %v4696_v62, %v2952_v34  ;;  %2958 = vmax.xlane.f32.xlu0 %v2957_v31 }
 0xd2f   :  { %v5691_v59 = vadd.f32 %v4697_v21, %v2951_v51 }
 0xd30   :  { %v2966_v39 = vsel %vm58_vm0, %v5689_v28, -inf }
 0xd31   :  { %2967 = vmax.xlane.f32.xlu1 %v2966_v39  ;;  %v2963_v38 = vsel %vm58_vm0, %v5691_v59, -inf }
 0xd32   :  { %2964 = vmax.xlane.f32.xlu0 %v2963_v38 }
 0xd42   :  { %4493 = vrot.lane.b32.xlu1 %v5504_v49, %s4724_s29 }
 0xd48   :  { %4488 = vrot.lane.b32.xlu0 %v5493_v58, %s4724_s29 }
 0xd9b   :  { %v2301_v10 = vpop.xlane.xlu1 %2300  ;;  %v2298_v62 = vpop.xlane.xlu0 %2297 }
 0xd9c   :  { %v2309_v42 = vsub.f32 %v5615_v40, %v2301_v10  ;;  %v2308_v44 = vsub.f32 %v5623_v23, %v2298_v62 }
 0xd9e   :  { %v2314_v21 = vmul.f32 1.442695, %v2309_v42  ;;  %v2312_v56 = vmul.f32 1.442695, %v2308_v44 }
 0xd9f   :  { %v2132_v19 = vpop.xlane.xlu1 %2131  ;;  %v2129_v0 = vpop.xlane.xlu0 %2128 }
 0xda0   :  { %4605 = vpow2.f32 %v2314_v21  ;;  %v2140_v57 = vsub.f32 %v5630_v20, %v2132_v19  ;;  %v2139_v2 = vsub.f32 %v5633_v47, %v2129_v0 }
 0xda1   :  { %4607 = vpow2.f32 %v2312_v56 }
 0xda2   :  { %v2145_v37 = vmul.f32 1.442695, %v2140_v57  ;;  %v2143_v60 = vmul.f32 1.442695, %v2139_v2 }
 0xda3   :  { %v2138_v17 = vpop.xlane.xlu1 %2137  ;;  %v2307_v63 = vpop.xlane.xlu0 %2306 }
 0xda4   :  { %4609 = vpow2.f32 %v2145_v37  ;;  %v2142_v6 = vsub.f32 %v5644_v12, %v2138_v17  ;;  %v2311_v40 = vsub.f32 %v5640_v53, %v2307_v63 }
 0xda5   :  { %4611 = vpow2.f32 %v2143_v60 }
 0xda6   :  { %v2318_v23 = vmul.f32 1.442695, %v2311_v40  ;;  %v2149_v5 = vmul.f32 1.442695, %v2142_v6 }
 0xda7   :  { %v2304_v8 = vpop.xlane.xlu0 %2303 }
 0xda8   :  { %v2310_v14 = vsub.f32 %v5651_v13, %v2304_v8  ;;  %4613 = vpow2.f32 %v2318_v23 }
 0xda9   :  { %4615 = vpow2.f32 %v2149_v5 }
 0xdaa   :  { %v5708_v20 = vpop.eup %4605  ;;  %v2316_v47 = vmul.f32 1.442695, %v2310_v14  ;;  %v2680_v7 = vpop.xlane.xlu1 %2679 }
 0xdab   :  { %v5710_v1 = vpop.eup %4607  ;;  %v2688_v48 = vsub.f32 %v5660_v30, %v2680_v7  ;;  %v2323_v12 = vsel %vm58_vm0, %v5708_v20, 0.0  ;;  %v2135_v53 = vpop.xlane.xlu0 %2134 }
 0xdac   :  { %4617 = vpow2.f32 %v2316_v47  ;;  %2324 = vadd.xlane.f32.xlu1 %v2323_v12  ;;  %v2141_v22 = vsub.f32 %v5655_v3, %v2135_v53  ;;  %v2320_v13 = vsel %vm58_vm0, %v5710_v1, 0.0 }
 0xdad   :  { %v2693_v52 = vmul.f32 1.442695, %v2688_v48  ;;  %2321 = vadd.xlane.f32.xlu0 %v2320_v13 }
 0xdae   :  { %v5718_v50 = vpop.eup %4609  ;;  %v2147_v32 = vmul.f32 1.442695, %v2141_v22  ;;  %v2686_v61 = vpop.xlane.xlu1 %2685 }
 0xdaf   :  { %v5720_v34 = vpop.eup %4611  ;;  %4619 = vpow2.f32 %v2693_v52  ;;  %v2690_v30 = vsub.f32 %v5669_v4, %v2686_v61  ;;  %v2154_v41 = vsel %vm58_vm0, %v5718_v50, 0.0  ;;  %v2677_v36 = vpop.xlane.xlu0 %2676 }
 0xdb0   :  { %4621 = vpow2.f32 %v2147_v32  ;;  %2155 = vadd.xlane.f32.xlu1 %v2154_v41  ;;  %v2687_v3 = vsub.f32 %v5665_v27, %v2677_v36  ;;  %v2151_v51 = vsel %vm58_vm0, %v5720_v34, 0.0 }
 0xdb1   :  { %v2697_v31 = vmul.f32 1.442695, %v2690_v30  ;;  %2152 = vadd.xlane.f32.xlu0 %v2151_v51 }
 0xdb2   :  { %v2691_v39 = vmul.f32 1.442695, %v2687_v3  ;;  %v5728_v38 = vpop.eup %4613 }
 0xdb3   :  { %4623 = vpow2.f32 %v2697_v31  ;;  %v2683_v10 = vpop.xlane.xlu0 %2682  ;;  %v2329_v62 = vsel %vm58_vm0, %v5728_v38, 0.0  ;;  %v5733_v42 = vpop.eup %4615 }
 0xdb4   :  { %4625 = vpow2.f32 %v2691_v39  ;;  %v2689_v4 = vsub.f32 %v5673_v45, %v2683_v10  ;;  %2330 = vadd.xlane.f32.xlu1 %v2329_v62  ;;  %v2160_v56 = vsel %vm58_vm0, %v5733_v42, 0.0 }
 0xdb6   :  { %v5735_v27 = vpop.eup %4617  ;;  %v2695_v44 = vmul.f32 1.442695, %v2689_v4 }
 0xdb7   :  { %v2326_v21 = vsel %vm58_vm0, %v5735_v27, 0.0 }
 0xdb8   :  { %4627 = vpow2.f32 %v2695_v44  ;;  %2327 = vadd.xlane.f32.xlu0 %v2326_v21  ;;  %2161 = vadd.xlane.f32.xlu1 %v2160_v56 }
 0xdb9   :  { %v5741_v19 = vpop.eup %4619 }
 0xdba   :  { %v5743_v45 = vpop.eup %4621  ;;  %v2962_v0 = vpop.xlane.xlu1 %2961  ;;  %v2702_v57 = vsel %vm58_vm0, %v5741_v19, 0.0 }
 0xdbb   :  { %v2970_v2 = vsub.f32 %v5680_v15, %v2962_v0  ;;  %v2959_v37 = vpop.xlane.xlu0 %2958  ;;  %v2157_v60 = vsel %vm58_vm0, %v5743_v45, 0.0 }
 0xdbc   :  { %v2969_v17 = vsub.f32 %v5683_v25, %v2959_v37  ;;  %2158 = vadd.xlane.f32.xlu0 %v2157_v60  ;;  %2703 = vadd.xlane.f32.xlu1 %v2702_v57 }
 0xdbd   :  { %v5751_v63 = vpop.eup %4623  ;;  %v2975_v6 = vmul.f32 1.442695, %v2970_v2 }
 0xdbe   :  { %v5753_v40 = vpop.eup %4625  ;;  %v2973_v23 = vmul.f32 1.442695, %v2969_v17  ;;  %v2968_v5 = vpop.xlane.xlu1 %2967  ;;  %v2708_v8 = vsel %vm58_vm0, %v5751_v63, 0.0 }
 0xdbf   :  { %4629 = vpow2.f32 %v2975_v6  ;;  %v2972_v15 = vsub.f32 %v5689_v28, %v2968_v5  ;;  %v2965_v14 = vpop.xlane.xlu0 %2964  ;;  %v2699_v47 = vsel %vm58_vm0, %v5753_v40, 0.0 }
 0xdc0   :  { %4631 = vpow2.f32 %v2973_v23  ;;  %v2971_v25 = vsub.f32 %v5691_v59, %v2965_v14  ;;  %2700 = vadd.xlane.f32.xlu0 %v2699_v47  ;;  %2709 = vadd.xlane.f32.xlu1 %v2708_v8 }
 0xdc1   :  { %v2979_v7 = vmul.f32 1.442695, %v2972_v15 }
 0xdc2   :  { %v5761_v48 = vpop.eup %4627  ;;  %v2977_v12 = vmul.f32 1.442695, %v2971_v25  ;;  %v4494_v53 = vpop.permute.xlu1 %4493 }
 0xdc3   :  { %4633 = vpow2.f32 %v2979_v7  ;;  %v4489_v22 = vpop.permute.xlu0 %4488  ;;  %v2705_v13 = vsel %vm58_vm0, %v5761_v48, 0.0  ;;  %v4496_v28 = vunpack.i.h.bf16 %v4494_v53  ;;  %v4495_v52 = vunpack.i.l.bf16 %v4494_v53 }
 0xdc4   :  { %v4491_v32 = vunpack.i.h.bf16 %v4489_v22  ;;  %v4490_v61 = vunpack.i.l.bf16 %v4489_v22  ;;  %2706 = vadd.xlane.f32.xlu1 %v2705_v13  ;;  %4635 = vpow2.f32 %v2977_v12 }
 0xdc5   :  { %v4264_v59 = vpack.c.bf16 %v4496_v28, %v4495_v52 }
 0xdc6   :  { %v4260_v30 = vpack.c.bf16 %v4491_v32, %v4490_v61 }
 0xdc8   :  { %4261 = vmatprep.subr.bf16.mxu1 %v4260_v30 }
 0xdc9   :  { %v5765_v41 = vpop.eup %4629  ;;  %4263 = vmatpush3.bf16.msra.mxu1 %v4260_v30 }
 0xdca   :  { %v5767_v36 = vpop.eup %4631  ;;  %4265 = vmatprep.subr.bf16.mxu1 %v4264_v59  ;;  %v2984_v3 = vsel %vm58_vm0, %v5765_v41, 0.0 }
 0xdcb   :  { %2985 = vadd.xlane.f32.xlu1 %v2984_v3  ;;  %v2981_v51 = vsel %vm58_vm0, %v5767_v36, 0.0 }
 0xdcc   :  { %2982 = vadd.xlane.f32.xlu0 %v2981_v51 }
 0xdcd   :  { %v5773_v31 = vpop.eup %4633  ;;  %4267 = vmatpush3.bf16.msra.mxu1 %v4264_v59 }
 0xdce   :  { %4269 = vmatprep.subr.bf16.mxu1 %v5495_v24  ;;  %v2990_v39 = vsel %vm58_vm0, %v5773_v31, 0.0  ;;  %v5778_v10 = vpop.eup %4635 }
 0xdcf   :  { %v2987_v4 = vsel %vm58_vm0, %v5778_v10, 0.0 }
 0xdd0   :  { %2991 = vadd.xlane.f32.xlu0 %v2990_v39 }
 0xdd4   :  { %2988 = vadd.xlane.f32.xlu0 %v2987_v4 }
 0xddc   :  { %4503 = vrot.lane.b32.xlu1 %v5504_v49, %s4726_s14 }
 0xde0   :  { %4508 = vrot.lane.b32.xlu1 %v5493_v58, %s4725_s9 }
 0xde4   :  { %4513 = vrot.lane.b32.xlu1 %v5504_v49, %s4725_s9 }
 0xdea   :  { %4498 = vrot.lane.b32.xlu0 %v5493_v58, %s4726_s14 }
 0xe39   :  { %v2325_v62 = vpop.xlane.xlu1 %2324 }
 0xe3a   :  { %4637 = vrcp.f32 %v2325_v62  ;;  %v2322_v44 = vpop.xlane.xlu0 %2321 }
 0xe3b   :  { %4639 = vrcp.f32 %v2322_v44 }
 0xe3d   :  { %v2156_v21 = vpop.xlane.xlu1 %2155 }
 0xe3e   :  { %v2153_v56 = vpop.xlane.xlu0 %2152 }
 0xe3f   :  { %4641 = vrcp.f32 %v2153_v56 }
 0xe41   :  { %v2331_v0 = vpop.xlane.xlu1 %2330 }
 0xe42   :  { %4643 = vrcp.f32 %v2331_v0 }
 0xe44   :  { %v4638_v57 = vpop.eup %4637 }
 0xe45   :  { %v4640_v2 = vpop.eup %4639  ;;  %v2328_v37 = vpop.xlane.xlu0 %2327  ;;  %v2337_v49 = vmul.f32 %v4638_v57, %v5708_v20 }
 0xe46   :  { %v2162_v60 = vpop.xlane.xlu1 %2161  ;;  %4645 = vrcp.f32 %v2328_v37  ;;  %v2336_v17 = vmul.f32 %v4640_v2, %v5710_v1 }
 0xe47   :  { %4647 = vrcp.f32 %v2156_v21 }
 0xe48   :  { %4004 = vmatprep.mubr.msk.f32.mxu1 %vm58_vm0, %v2336_v17 }
 0xe49   :  { %4005 = vmatmul.mubr.msk.f32.vlgmr.msra.gmra.mrb[32].mxu1 %vm58_vm0, %v2337_v49  ;;  %v2159_v58 = vpop.xlane.xlu0 %2158  ;;  %v4642_v5 = vpop.eup %4641 }
 0xe4a   :  { %4271 = vmatpush3.bf16.msra.mxu1 %v5495_v24  ;;  %v2704_v6 = vpop.xlane.xlu1 %2703  ;;  %4649 = vrcp.f32 %v2159_v58  ;;  %v2167_v24 = vmul.f32 %v4642_v5, %v5720_v34 }
 0xe4b   :  { %4273 = vmatprep.subr.bf16.mxu1 %v5506_v54  ;;  %4651 = vrcp.f32 %v2162_v60 }
 0xe4c   :  { %v4644_v1 = vpop.eup %4643 }
 0xe4d   :  { %v2701_v23 = vpop.xlane.xlu0 %2700  ;;  %v2339_v14 = vmul.f32 %v4644_v1, %v5728_v38 }
 0xe4e   :  { %4275 = vmatpush3.bf16.msra.mxu1 %v5506_v54  ;;  %4653 = vrcp.f32 %v2701_v23  ;;  %v2710_v20 = vpop.xlane.xlu1 %2709 }
 0xe4f   :  { %4655 = vrcp.f32 %v2704_v6 }
 0xe50   :  { %v4646_v8 = vpop.eup %4645 }
 0xe51   :  { %v2338_v15 = vmul.f32 %v4646_v8, %v5735_v27  ;;  %v4648_v47 = vpop.eup %4647 }
 0xe52   :  { %v2707_v7 = vpop.xlane.xlu1 %2706  ;;  %v2168_v54 = vmul.f32 %v4648_v47, %v5718_v50 }
 0xe53   :  { %4007 = vmatprep.mubr.msk.f32.mxu1 %vm58_vm0, %v2338_v15  ;;  %4657 = vrcp.f32 %v2707_v7 }
 0xe54   :  { %v4650_v25 = vpop.eup %4649  ;;  %4008 = vmatmul.mubr.msk.f32.gmra.mrb[34].mxu1 %vm58_vm0, %v2339_v14  ;;  %4659 = vrcp.f32 %v2710_v20 }
 0xe55   :  { %4018 = vmatprep.mubr.msk.f32.mxu1 %vm58_vm0, %v2167_v24  ;;  %v4652_v12 = vpop.eup %4651  ;;  %v2169_v53 = vmul.f32 %v4650_v25, %v5743_v45 }
 0xe56   :  { %v2170_v34 = vmul.f32 %v4652_v12, %v5733_v42 }
 0xe58   :  { %v4654_v22 = vpop.eup %4653  ;;  %4019 = vmatmul.mubr.msk.f32.vlgmr.msra.gmra.mrb[32].mxu1 %vm58_vm0, %v2168_v54  ;;  %v2986_v38 = vpop.xlane.xlu1 %2985 }
 0xe59   :  { %v2983_v27 = vpop.xlane.xlu0 %2982  ;;  %4021 = vmatprep.mubr.msk.f32.mxu1 %vm58_vm0, %v2169_v53  ;;  %v2715_v13 = vmul.f32 %v4654_v22, %v5753_v40  ;;  %v4656_v62 = vpop.eup %4655 }
 0xe5a   :  { %4661 = vrcp.f32 %v2983_v27  ;;  %v2716_v57 = vmul.f32 %v4656_v62, %v5741_v19 }
 0xe5b   :  { %4663 = vrcp.f32 %v2986_v38 }
 0xe5c   :  { %4022 = vmatmul.mubr.msk.f32.gmra.mrb[34].mxu1 %vm58_vm0, %v2170_v34  ;;  %v4504_v50 = vpop.permute.xlu1 %4503 }
 0xe5d   :  { %v2992_v28 = vpop.xlane.xlu0 %2991  ;;  %4046 = vmatprep.mubr.msk.f32.mxu1 %vm58_vm0, %v2715_v13  ;;  %v4506_v61 = vunpack.i.h.bf16 %v4504_v50  ;;  %v4505_v30 = vunpack.i.l.bf16 %v4504_v50  ;;  %v4658_v44 = vpop.eup %4657 }
 0xe5e   :  { %v4660_v2 = vpop.eup %4659  ;;  %v2717_v37 = vmul.f32 %v4658_v44, %v5761_v48  ;;  %v3578_v44 = vld [vmem:[%s5972_s3 + $0xa0] sm:$0xff] }
 0xe5f   :  { %v4292_v51 = vpack.c.bf16 %v4506_v61, %v4505_v30  ;;  %v2718_v49 = vmul.f32 %v4660_v2, %v5751_v63  ;;  %v3642_v2 = vld [vmem:[%s5973_s4 + $0x50] sm:$0xff] }
 0xe60   :  { %v4509_v45 = vpop.permute.xlu1 %4508 }
 0xe61   :  { %v2989_v52 = vpop.xlane.xlu0 %2988  ;;  %v4511_v40 = vunpack.i.h.bf16 %v4509_v45  ;;  %v4510_v39 = vunpack.i.l.bf16 %v4509_v45 }
 0xe62   :  { %4665 = vrcp.f32 %v2989_v52 }
 0xe63   :  { %v4308_v21 = vpack.c.bf16 %v4511_v40, %v4510_v39  ;;  %4667 = vrcp.f32 %v2992_v28  ;;  %v3572_v39 = vld [vmem:[%s5972_s3 + $0x70] sm:$0xff] }
 0xe64   :  { %v4514_v4 = vpop.permute.xlu1 %4513  ;;  %v4662_v60 = vpop.eup %4661 }
 0xe65   :  { %v4499_v32 = vpop.permute.xlu0 %4498  ;;  %v4516_v56 = vunpack.i.h.bf16 %v4514_v4  ;;  %v4515_v0 = vunpack.i.l.bf16 %v4514_v4  ;;  %v4664_v58 = vpop.eup %4663  ;;  %v2997_v6 = vmul.f32 %v4662_v60, %v5767_v36  ;;  %v5828_v36 = vld [vmem:[%s5974_s5 + $0x10] sm:$0xff]  ;;  %v3575_v4 = vld [vmem:[%s5972_s3 + $0x88] sm:$0xff]  ;;  %v3643_v60 = vld [vmem:[%s5973_s4 + $0x58] sm:$0xff] }
 0xe66   :  { %v4501_v59 = vunpack.i.h.bf16 %v4499_v32  ;;  %v4500_v3 = vunpack.i.l.bf16 %v4499_v32  ;;  %v2998_v19 = vmul.f32 %v4664_v58, %v5765_v41  ;;  %v3121_v41 = vrot.slane %v5828_v36, %v1456_v43  ;;  %v3645_v58 = vld [vmem:[%s5973_s4 + $0x68] sm:$0xff] }
 0xe67   :  { %v4312_v17 = vpack.c.bf16 %v4516_v56, %v4515_v0  ;;  %v4316_v62 = vpack.c.bf16 %v3575_v4, %v3572_v39  ;;  %v3640_v0 = vld [vmem:[%s5973_s4 + $0x40] sm:$0xff] }
 0xe68   :  { %v4288_v42 = vpack.c.bf16 %v4501_v59, %v4500_v3 }
 0xe6a   :  { %4289 = vmatprep.subr.bf16.mxu1 %v4288_v42 }
 0xe6b   :  { %4291 = vmatpush3.bf16.msra.mxu1 %v4288_v42 }
 0xe6c   :  { %4293 = vmatprep.subr.bf16.mxu1 %v4292_v51  ;;  %v4666_v23 = vpop.eup %4665 }
 0xe6d   :  { %v4668_v48 = vpop.eup %4667  ;;  %v2999_v5 = vmul.f32 %v4666_v23, %v5778_v10 }
 0xe6e   :  { %v3000_v63 = vmul.f32 %v4668_v48, %v5773_v31 }
 0xe6f   :  { %4295 = vmatpush3.bf16.msra.mxu1 %v4292_v51 }
 0xe70   :  { %4309 = vmatprep.subr.bf16.mxu1 %v4308_v21 }
 0xe72   :  { %4047 = vmatmul.mubr.msk.f32.vlgmr.msra.gmra.mrb[32].mxu1 %vm58_vm0, %v2716_v57  ;;  %v3641_v57 = vld [vmem:[%s5973_s4 + $0x48] sm:$0xff] }
 0xe73   :  { %4049 = vmatprep.mubr.msk.f32.mxu1 %vm58_vm0, %v2717_v37  ;;  %4311 = vmatpush3.bf16.msra.mxu1 %v4308_v21  ;;  %v3581_v21 = vld [vmem:[%s5972_s3 + $0xb8] sm:$0xff]  ;;  %v4324_v37 = vpack.c.bf16 %v3641_v57, %v3640_v0  ;;  %v3412_v0 = vrot.slane %v5828_v36, %v1747_v29 }
 0xe74   :  { %4313 = vmatprep.subr.bf16.mxu1 %v4312_v17  ;;  %v4320_v56 = vpack.c.bf16 %v3581_v21, %v3578_v44 }
 0xe75   :  { %4325 = vmatprep.subr.bf16.mxu0 %v4324_v37 }
 0xe76   :  { %4050 = vmatmul.mubr.msk.f32.gmra.mrb[34].mxu1 %vm58_vm0, %v2718_v49  ;;  %v3644_v49 = vld [vmem:[%s5973_s4 + $0x60] sm:$0xff]  ;;  %4327 = vmatpush3.bf16.msra.mxu0 %v4324_v37 }
 0xe77   :  { %4315 = vmatpush3.bf16.msra.mxu1 %v4312_v17  ;;  %4074 = vmatprep.mubr.msk.f32.mxu1 %vm58_vm0, %v2997_v6  ;;  %v4328_v17 = vpack.c.bf16 %v3643_v60, %v3642_v2  ;;  %v4332_v6 = vpack.c.bf16 %v3645_v58, %v3644_v49 }
 0xe78   :  { %4317 = vmatprep.subr.bf16.mxu1 %v4316_v62 }
 0xe79   :  { %4329 = vmatprep.subr.bf16.mxu0 %v4328_v17 }
 0xe7a   :  { %4075 = vmatmul.mubr.msk.f32.vlgmr.msra.gmra.mrb[32].mxu1 %vm58_vm0, %v2998_v19  ;;  %4331 = vmatpush3.bf16.msra.mxu0 %v4328_v17 }
 0xe7b   :  { %4077 = vmatprep.mubr.msk.f32.mxu1 %vm58_vm0, %v2999_v5  ;;  %4319 = vmatpush3.bf16.msra.mxu1 %v4316_v62 }
 0xe7c   :  { %4321 = vmatprep.subr.bf16.mxu1 %v4320_v56  ;;  %4333 = vmatprep.subr.bf16.mxu0 %v4332_v6 }
 0xe7e   :  { %4078 = vmatmul.mubr.msk.f32.gmra.mrb[34].mxu1 %vm58_vm0, %v3000_v63  ;;  %4335 = vmatpush3.bf16.msra.mxu0 %v4332_v6 }
 0xe7f   :  { %4323 = vmatpush3.bf16.msra.mxu1 %v4320_v56 }
 0xf4d   :  { %v4076_v1 = vpop.f32.mrb[32].mxu1 }
 0xf4e   :  { %v3115_v10 = vadd.f32 %v4076_v1, %v5420_v33  ;;  %v3091_v20 = vpop.f32.mrb[33].mxu1 }
 0xf4f   :  { %v3114_v8 = vadd.f32 %v3091_v20, %v5422_v46 }
 0xf50   :  { %v5835_v15 = vadd.f32 %v3121_v41, %v3115_v10 }
 0xf51   :  { %v5837_v31 = vadd.f32 %v3121_v41, %v3114_v8  ;;  %v4079_v14 = vpop.f32.mrb[34].mxu1 }
 0xf52   :  { %v3101_v47 = vpop.f32.mrb[35].mxu1  ;;  %v3129_v24 = vsel %vm58_vm0, %v5835_v15, 0.0  ;;  %v3117_v25 = vadd.f32 %v4079_v14, %v5430_v11 }
 0xf53   :  { %v3116_v7 = vadd.f32 %v3101_v47, %v5432_v35  ;;  %3130 = vadd.xlane.f32.xlu1 %v3129_v24  ;;  %v3126_v43 = vsel %vm58_vm0, %v5837_v31, 0.0  ;;  %v3181_v24 = vrot.slane %v5828_v36, %v1516_v26 }
 0xf54   :  { %3127 = vadd.xlane.f32.xlu0 %v3126_v43  ;;  %v5847_v46 = vadd.f32 %v3121_v41, %v3117_v25 }
 0xf55   :  { %v5845_v33 = vadd.f32 %v3121_v41, %v3116_v7 }
 0xf56   :  { %v3135_v12 = vsel %vm58_vm0, %v5847_v46, 0.0 }
 0xf57   :  { %v3132_v54 = vsel %vm58_vm0, %v5845_v33, 0.0 }
 0xf58   :  { %3133 = vadd.xlane.f32.xlu0 %v3132_v54 }
 0xf5c   :  { %3136 = vadd.xlane.f32.xlu0 %v3135_v12  ;;  %v3189_v12 = vrot.slane %v5828_v36, %v1524_v16 }
 0xfe0   :  { %v3131_v11 = vpop.xlane.xlu1 %3130 }
 0xfe1   :  { %v3139_v53 = vmul.f32 0.03125, %v3131_v11  ;;  %v3128_v35 = vpop.xlane.xlu0 %3127 }
 0xfe2   :  { %v3138_v22 = vmul.f32 0.03125, %v3128_v35 }
 0xfe3   :  { %v5854_v38 = vsub.f32 %v5835_v15, %v3139_v53 }
 0xfe4   :  { %v5857_v27 = vsub.f32 %v5837_v31, %v3138_v22 }
 0xfe5   :  { %v3134_v34 = vpop.xlane.xlu0 %3133  ;;  %v3147_v13 = vmul.f32 %v5854_v38, %v5854_v38 }
 0xfe6   :  { %v3140_v28 = vmul.f32 0.03125, %v3134_v34  ;;  %v3146_v50 = vmul.f32 %v5857_v27, %v5857_v27 }
 0xfe7   :  { %v3153_v52 = vsel %vm58_vm0, %v3147_v13, 0.0 }
 0xfe8   :  { %v5865_v45 = vsub.f32 %v5845_v33, %v3140_v28  ;;  %3154 = vadd.xlane.f32.xlu1 %v3153_v52  ;;  %v3150_v32 = vsel %vm58_vm0, %v3146_v50, 0.0  ;;  %v3646_v52 = vld [vmem:[%s5973_s4 + $0x70] sm:$0xff] }
 0xfe9   :  { %3151 = vadd.xlane.f32.xlu0 %v3150_v32  ;;  %v3137_v61 = vpop.xlane.xlu0 %3136 }
 0xfea   :  { %v3141_v30 = vmul.f32 0.03125, %v3137_v61  ;;  %v3148_v59 = vmul.f32 %v5865_v45, %v5865_v45  ;;  %v3197_v61 = vrot.slane %v5828_v36, %v5406_v9 }
 0xfec   :  { %v5871_v3 = vsub.f32 %v5847_v46, %v3141_v30  ;;  %v3156_v42 = vsel %vm58_vm0, %v3148_v59, 0.0 }
 0xfed   :  { %3157 = vadd.xlane.f32.xlu0 %v3156_v42 }
 0xfee   :  { %v3149_v51 = vmul.f32 %v5871_v3, %v5871_v3 }
 0xff0   :  { %v3159_v40 = vsel %vm58_vm0, %v3149_v51, 0.0 }
 0xff1   :  { %3160 = vadd.xlane.f32.xlu1 %v3159_v40 }
0x1075   :  { %v3155_v23 = vpop.xlane.xlu1 %3154 }
0x1076   :  { %v3163_v19 = vmul.f32 0.03125, %v3155_v23  ;;  %v3152_v48 = vpop.xlane.xlu0 %3151 }
0x1077   :  { %v3162_v5 = vmul.f32 0.03125, %v3152_v48 }
0x1078   :  { %v3167_v63 = vadd.f32 1e-05, %v3163_v19 }
0x1079   :  { %v3166_v41 = vadd.f32 1e-05, %v3162_v5 }
0x107a   :  { %4669 = vrsqrt.f32 %v3167_v63  ;;  %v3158_v1 = vpop.xlane.xlu0 %3157 }
0x107b   :  { %4671 = vrsqrt.f32 %v3166_v41  ;;  %v3164_v10 = vmul.f32 0.03125, %v3158_v1 }
0x107d   :  { %v3168_v20 = vadd.f32 1e-05, %v3164_v10 }
0x107e   :  { %v3161_v8 = vpop.xlane.xlu1 %3160 }
0x107f   :  { %4673 = vrsqrt.f32 %v3168_v20  ;;  %v3165_v14 = vmul.f32 0.03125, %v3161_v8 }
0x1081   :  { %v3169_v47 = vadd.f32 1e-05, %v3165_v14 }
0x1083   :  { %4675 = vrsqrt.f32 %v3169_v47 }
0x1084   :  { %v4670_v25 = vpop.eup %4669 }
0x1085   :  { %v4672_v7 = vpop.eup %4671  ;;  %v3175_v43 = vmul.f32 %v4670_v25, %v5854_v38 }
0x1086   :  { %v3174_v54 = vmul.f32 %v4672_v7, %v5857_v27 }
0x1087   :  { %v3183_v11 = vmul.f32 %v3181_v24, %v3175_v43 }
0x1088   :  { %v3182_v53 = vmul.f32 %v3181_v24, %v3174_v54 }
0x1089   :  { %v4674_v35 = vpop.eup %4673  ;;  %v3191_v13 = vadd.f32 %v3189_v12, %v3183_v11 }
0x108a   :  { %v3190_v22 = vadd.f32 %v3189_v12, %v3182_v53  ;;  %v3176_v34 = vmul.f32 %v4674_v35, %v5865_v45  ;;  %v3647_v45 = vld [vmem:[%s5973_s4 + $0x78] sm:$0xff] }
0x108b   :  { %v4336_v32 = vpack.c.bf16 %v3647_v45, %v3646_v52 }
0x108c   :  { %4088 = vmatprep.mubr.msk.f32.mxu1 %vm58_vm0, %v3190_v22  ;;  %v3184_v26 = vmul.f32 %v3181_v24, %v3176_v34 }
0x108d   :  { %v4676_v28 = vpop.eup %4675  ;;  %4089 = vmatmul.mubr.msk.f32.vlgmr.msra.gmra.mrb[36].mxu1 %vm58_vm0, %v3191_v13  ;;  %4337 = vmatprep.subr.bf16.mxu0 %v4336_v32 }
0x108e   :  { %v3192_v38 = vadd.f32 %v3189_v12, %v3184_v26  ;;  %v3177_v27 = vmul.f32 %v4676_v28, %v5871_v3  ;;  %4339 = vmatpush3.bf16.msra.mxu0 %v4336_v32  ;;  %v3417_v32 = vld [vmem:[%s5975_s6] sm:$0x3]  ;;  %s4733_s6 = smov [#allocation2]  }
0x108f   :  { %s3495_s21 = sshll.u32 %s4733_s6, 4  ;;  %s3496_s21 = int_to_ptr.vmem [resolvable:$true] %s3495_s21 }
0x1090   :  { %4091 = vmatprep.mubr.msk.f32.mxu1 %vm58_vm0, %v3192_v38  ;;  %v3185_v50 = vmul.f32 %v3181_v24, %v3177_v27  ;;  %s4699_s1 = scalar_lea.vmem %s3496_s21, 512  ;;  %p4704_p1 = scmp.lt.s32.totalorder %s3496_s21, %s3496_s21 }
0x1091   :  { %p4700_p0 = scmp.ne.s32.totalorder %s3496_s21, %s4699_s1  ;;  %p4705_p2 = scmp.lt.s32.totalorder %s4699_s1, %s4699_s1 }
0x1092   :  { %v3193_v16 = vadd.f32 %v3189_v12, %v3185_v50 }
0x1093   :  { %p4706_p3 = por %p4705_p2, %p4704_p1 }
0x1094   :  { %4092 = vmatmul.mubr.msk.f32.gmra.mrb[38].mxu1 %vm58_vm0, %v3193_v16 }
0x1095   :  { %p4707_p4 = pnand %p4706_p3, %p4700_p0 }
0x1160   :  { %v4090_v30 = vpop.f32.mrb[36].mxu1 }
0x1161   :  { %v3282_v59 = vadd.f32 %v4090_v30, %v3197_v61  ;;  %v3276_v3 = vpop.f32.mrb[37].mxu1  ;;  %v3473_v30 = vrot.slane %v3417_v32, %v4894_v18 }
0x1162   :  { %v3277_v42 = vadd.f32 %v3276_v3, %v3197_v61 }
0x1163   :  { %v3296_v40 = vmax.f32 %v3282_v59, 0.0 }
0x1164   :  { %v3295_v51 = vmax.f32 %v3277_v42, 0.0  ;;  %v3481_v42 = vrot.slane %v3417_v32, %v5406_v9 }
0x1166   :  { %4110 = vmatprep.mubr.msk.f32.mxu0 %vm1643_vm3, %v3295_v51 }
0x1167   :  { %v4093_v39 = vpop.f32.mrb[38].mxu1  ;;  %4111 = vmatmul.mubr.msk.f32.vlgmr.msra.gmra.mrb[28].mxu0 %vm1643_vm3, %v3296_v40 }
0x1168   :  { %v3292_v4 = vadd.f32 %v4093_v39, %v3197_v61  ;;  %v3286_v62 = vpop.f32.mrb[39].mxu1 }
0x1169   :  { %v3287_v44 = vadd.f32 %v3286_v62, %v3197_v61 }
0x116a   :  { %v3298_v56 = vmax.f32 %v3292_v4, 0.0 }
0x116b   :  { %v3297_v21 = vmax.f32 %v3287_v44, 0.0 }
0x116d   :  { %4113 = vmatprep.mubr.msk.f32.mxu0 %vm1643_vm3, %v3297_v21 }
0x116e   :  { %4114 = vmatmul.mubr.msk.f32.gmra.mrb[30].mxu0 %vm1643_vm3, %v3298_v56 }
0x123a   :  { %v4112_v57 = vpop.f32.mrb[28].mxu0 }
0x123b   :  { %v3406_v2 = vadd.f32 %v4112_v57, %v5835_v15  ;;  %v3386_v37 = vpop.f32.mrb[29].mxu0 }
0x123c   :  { %v3405_v60 = vadd.f32 %v3386_v37, %v5837_v31 }
0x123d   :  { %v3414_v17 = vadd.f32 %v3412_v0, %v3406_v2 }
0x123e   :  { %v3413_v49 = vadd.f32 %v3412_v0, %v3405_v60 }
0x123f   :  { %v3421_v58 = vsel %vm58_vm0, %v3414_v17, 0.0 }
0x1240   :  { %3422 = vadd.xlane.f32.xlu1 %v3421_v58  ;;  %v3418_v6 = vsel %vm58_vm0, %v3413_v49, 0.0 }
0x1241   :  { %3419 = vadd.xlane.f32.xlu0 %v3418_v6  ;;  %v4115_v23 = vpop.f32.mrb[30].mxu0 }
0x1242   :  { %v3408_v19 = vadd.f32 %v4115_v23, %v5847_v46  ;;  %v3396_v55 = vpop.f32.mrb[31].mxu0 }
0x1243   :  { %v3407_v29 = vadd.f32 %v3396_v55, %v5845_v33 }
0x1244   :  { %v3416_v36 = vadd.f32 %v3412_v0, %v3408_v19 }
0x1245   :  { %v3415_v48 = vadd.f32 %v3412_v0, %v3407_v29 }
0x1246   :  { %v3427_v15 = vsel %vm58_vm0, %v3416_v36, 0.0 }
0x1247   :  { %3428 = vadd.xlane.f32.xlu1 %v3427_v15  ;;  %v3424_v31 = vsel %vm58_vm0, %v3415_v48, 0.0 }
0x1248   :  { %3425 = vadd.xlane.f32.xlu0 %v3424_v31 }
0x12cd   :  { %v3423_v5 = vpop.xlane.xlu1 %3422 }
0x12ce   :  { %v3431_v63 = vmul.f32 0.03125, %v3423_v5  ;;  %v3420_v41 = vpop.xlane.xlu0 %3419 }
0x12cf   :  { %v3430_v1 = vmul.f32 0.03125, %v3420_v41 }
0x12d0   :  { %v3435_v10 = vsub.f32 %v3414_v17, %v3431_v63 }
0x12d1   :  { %v3434_v20 = vsub.f32 %v3413_v49, %v3430_v1 }
0x12d2   :  { %v3439_v8 = vmul.f32 %v3435_v10, %v3435_v10 }
0x12d3   :  { %v3438_v14 = vmul.f32 %v3434_v20, %v3434_v20 }
0x12d4   :  { %v3429_v46 = vpop.xlane.xlu1 %3428  ;;  %v3445_v47 = vsel %vm58_vm0, %v3439_v8, 0.0 }
0x12d5   :  { %v3433_v33 = vmul.f32 0.03125, %v3429_v46  ;;  %3446 = vadd.xlane.f32.xlu1 %v3445_v47  ;;  %v3426_v24 = vpop.xlane.xlu0 %3425  ;;  %v3442_v25 = vsel %vm58_vm0, %v3438_v14, 0.0 }
0x12d6   :  { %v3432_v7 = vmul.f32 0.03125, %v3426_v24  ;;  %3443 = vadd.xlane.f32.xlu0 %v3442_v25 }
0x12d7   :  { %v3437_v43 = vsub.f32 %v3416_v36, %v3433_v33 }
0x12d8   :  { %v3436_v54 = vsub.f32 %v3415_v48, %v3432_v7 }
0x12d9   :  { %v3441_v12 = vmul.f32 %v3437_v43, %v3437_v43 }
0x12da   :  { %v3440_v11 = vmul.f32 %v3436_v54, %v3436_v54 }
0x12db   :  { %v3451_v53 = vsel %vm58_vm0, %v3441_v12, 0.0 }
0x12dc   :  { %3452 = vadd.xlane.f32.xlu1 %v3451_v53  ;;  %v3448_v35 = vsel %vm58_vm0, %v3440_v11, 0.0 }
0x12dd   :  { %3449 = vadd.xlane.f32.xlu0 %v3448_v35 }
0x1362   :  { %v3447_v22 = vpop.xlane.xlu1 %3446 }
0x1363   :  { %v3455_v34 = vmul.f32 0.03125, %v3447_v22  ;;  %v3444_v13 = vpop.xlane.xlu0 %3443 }
0x1364   :  { %v3454_v26 = vmul.f32 0.03125, %v3444_v13 }
0x1365   :  { %v3459_v28 = vadd.f32 1e-05, %v3455_v34 }
0x1366   :  { %v3458_v38 = vadd.f32 1e-05, %v3454_v26 }
0x1367   :  { %4677 = vrsqrt.f32 %v3459_v28 }
0x1368   :  { %4679 = vrsqrt.f32 %v3458_v38 }
0x1369   :  { %v3453_v27 = vpop.xlane.xlu1 %3452 }
0x136a   :  { %v3457_v50 = vmul.f32 0.03125, %v3453_v27  ;;  %v3450_v16 = vpop.xlane.xlu0 %3449 }
0x136b   :  { %v3456_v52 = vmul.f32 0.03125, %v3450_v16 }
0x136c   :  { %v3461_v45 = vadd.f32 1e-05, %v3457_v50 }
0x136d   :  { %v3460_v61 = vadd.f32 1e-05, %v3456_v52 }
0x136e   :  { %4681 = vrsqrt.f32 %v3461_v45 }
0x136f   :  { %4683 = vrsqrt.f32 %v3460_v61 }
0x1371   :  { %v4678_v59 = vpop.eup %4677 }
0x1372   :  { %v4680_v3 = vpop.eup %4679  ;;  %v3467_v51 = vmul.f32 %v4678_v59, %v3435_v10 }
0x1373   :  { %v3466_v40 = vmul.f32 %v4680_v3, %v3434_v20 }
0x1374   :  { %v3475_v39 = vmul.f32 %v3473_v30, %v3467_v51 }
0x1375   :  { %v3474_v4 = vmul.f32 %v3473_v30, %v3466_v40 }
0x1376   :  { %v3483_v62 = vadd.f32 %v3481_v42, %v3475_v39 }
0x1377   :  { %v3482_v44 = vadd.f32 %v3481_v42, %v3474_v4 }
0x1378   :  { %v4682_v21 = vpop.eup %4681  ;;  %3487 = vst.msk [vmem:[#allocation2 + $0x8] sm:$0xff] %vm58_vm0, %v3483_v62 }
0x1379   :  { %v4684_v56 = vpop.eup %4683  ;;  %3486 = vst.msk [vmem:[#allocation2] sm:$0xff] %vm58_vm0, %v3482_v44  ;;  %v3469_v0 = vmul.f32 %v4682_v21, %v3437_v43 }
0x137a   :  { %v3468_v57 = vmul.f32 %v4684_v56, %v3436_v54 }
0x137b   :  { %v3477_v2 = vmul.f32 %v3473_v30, %v3469_v0 }
0x137c   :  { %v3476_v18 = vmul.f32 %v3473_v30, %v3468_v57 }
0x137d   :  { %v3485_v37 = vadd.f32 %v3481_v42, %v3477_v2 }
0x137e   :  { %v3484_v9 = vadd.f32 %v3481_v42, %v3476_v18 }
0x137f   :  { %3489 = vst.msk [vmem:[#allocation2 + $0x18] sm:$0xff] %vm58_vm0, %v3485_v37 }
0x1380   :  { %3488 = vst.msk [vmem:[#allocation2 + $0x10] sm:$0xff] %vm58_vm0, %v3484_v9 }
0x1381   :  { %4710 = shalt.err (!%p4707_p4)
}
0x1382   :  { %s4711_s9 = scalar_lea.hbm %s5976_s7, 512 }
0x1383   :  { %p4712_p5 = scmp.ne.s32.totalorder %s5976_s7, %s4711_s9  ;;  %p4715_p6 = scmp.lt.u32.totalorder %s4711_s9, %s5976_s7 }
0x1385   :  { %p4717_p7 = pnand %p4715_p6, %p4712_p5 }
0x1387   :  { %4720 = shalt.err (!%p4717_p7)
}
0x1388   :  { %s4734_s10 = smov 128   ;;  %s4735_s11 = smov 8  }
0x1389   :  { %3501 = dma.vmem_to_hbm [thread:$0]  %s3496_s21, 512, %s5976_s7, [#allocation3], %s4734_s10, %s4734_s10, %s4735_s11  }
0x138a   :  { %4721 = dma.done.wait [#allocation3], 512  }
0x138b   :  { %4722 = vsyncadd [#allocation3], 4294966784 }
0x138c   :  { %3505 = vsyncpa [#allocation3], 1 }

</bundles_post_ra>
